<compile_context>
chip_gen: v7x
topology: tpu7x:2x2x1
jax: 0.10.0
libtpu: 0.0.40
codegen_flags: <defaults>
</compile_context>

<pallas_src>
import functools

import numpy as np
import jax
import jax.numpy as jnp
from jax.experimental import pallas as pl
from jax.experimental.pallas import tpu as pltpu

EPS = 1e-5
NUM_CLASSES = 10
FC_PAD = 128                 # lane-dense FC output width (valid logits = first 10)

# Fixed geometry implied by the module: 28x28x1 -> 14x14x16 -> 7x7x32 -> 10
IMG = 28                     # input spatial size, Cin = 1
HO1, WO1, CO1 = 14, 14, 16   # layer-1 pooled output
HO2, WO2, CO2 = 7, 7, 32     # layer-2 pooled output
K1D = 6 * 32                 # deepened conv1 contraction: 6 padded rows x 32 padded cols
SLOT2 = 256                  # lane-aligned sub-row slot in the conv2 LHS (224 valid + 32 zeros)
K2D = 6 * SLOT2              # deepened conv2 contraction
N1 = WO1 * CO1               # 224: conv1 output row width, col index = wo*16 + c
N2 = WO2 * CO2               # 224: conv2 output row width, col index = wo*32 + c


# ----------------------------------------------------------------------------
# Fused kernel: conv1+BN+ReLU+pool -> conv2+BN+ReLU+pool -> FC, for NB images.
# ----------------------------------------------------------------------------
def _fused_cnn_kernel(lhs1_ref, w1_ref, b1_ref, w2_ref, b2_ref, wf_ref, bf_ref,
                      out_ref, lhs2_ref, *, nb):
    f32 = jnp.float32

    # ------------------ layer 1: conv5x5 + BN + ReLU + 2x2 maxpool -----------
    # lhs1_ref: (14, nb, 192), rows ordered (pooled_row, image).  The 2x2 pool,
    # the 5 vertical taps and the horizontal band are folded into the 4 banded
    # weight matrices w1_ref[k] (k = dy*2+dw), so conv+pool = 4 matmuls + max.
    lhs1 = lhs1_ref[...].reshape(HO1 * nb, K1D)
    p1 = jnp.dot(lhs1, w1_ref[0], preferred_element_type=f32)
    for k in range(1, 4):
        p1 = jnp.maximum(p1, jnp.dot(lhs1, w1_ref[k], preferred_element_type=f32))
    # bias + ReLU after the max is equivalent to PyTorch's Conv->BN->ReLU->Pool
    # order (bias is constant per channel inside the pool window, ReLU monotone).
    y1 = jnp.maximum(p1 + b1_ref[...], 0.0).astype(jnp.bfloat16)     # (14*nb, 224)

    # ------- scatter y1 into the deepened conv2 LHS (stays in VMEM) ----------
    # lhs2_ref[ho2, n, s*256 + wo1*16 + c] = padded layer-2 input row 2*ho2 + s.
    # Zero-padding rows/cols and the 32 spare lanes per slot stay zero; the
    # banded conv2 weights have zero rows there.  All stores are vreg-aligned.
    lhs2_ref[...] = jnp.zeros_like(lhs2_ref)
    for ho2 in range(HO2):
        for s in range(6):
            ho1 = 2 * ho2 + s - 2          # source pooled row of y1
            if 0 <= ho1 < HO1:
                lhs2_ref[ho2, :, s * SLOT2: s * SLOT2 + N1] = (
                    y1[ho1 * nb:(ho1 + 1) * nb, :])

    # ------------------ layer 2: conv5x5 + BN + ReLU + 2x2 maxpool -----------
    lhs2 = lhs2_ref[...].reshape(HO2 * nb, K2D)
    p2 = jnp.dot(lhs2, w2_ref[0], preferred_element_type=f32)
    for k in range(1, 4):
        p2 = jnp.maximum(p2, jnp.dot(lhs2, w2_ref[k], preferred_element_type=f32))
    y2 = jnp.maximum(p2 + b2_ref[...], 0.0).astype(jnp.bfloat16)     # (7*nb, 224)

    # ------------------ FC: consume y2 row-blocks directly (no reshape) ------
    acc = jnp.zeros((nb, FC_PAD), f32)
    for h in range(HO2):
        acc = acc + jnp.dot(y2[h * nb:(h + 1) * nb, :], wf_ref[h],
                            preferred_element_type=f32)
    out_ref[...] = acc + bf_ref[...]


# ----------------------------------------------------------------------------
# Forward pass wrapper
# ----------------------------------------------------------------------------
def cnn_forward(x_nchw, prep, *, nb=32):
    N = x_nchw.shape[0]
    NB = int(min(nb, 8 * ((N + 7) // 8)))        # images per grid step (mult of 8)
    Np = NB * ((N + NB - 1) // NB)               # batch padded to a multiple of NB

    # Cheap one-shot input prep (single XLA fusion on the raw input): pad
    # 28x28 -> 32x32 and gather the 6-row / stride-2 windows so the kernel's
    # conv1 LHS is a direct load: lhs1[ho, n, s*32 + w] = x_pad[n, 2*ho + s, w].
    x = x_nchw.reshape(N, IMG, IMG).astype(jnp.bfloat16)
    x = jnp.pad(x, ((0, Np - N), (2, 2), (2, 2)))                      # (Np, 32, 32)
    lhs1 = jnp.stack([x[:, s:s + 27:2, :] for s in range(6)], axis=2)  # (Np,14,6,32)
    lhs1 = lhs1.reshape(Np, HO1, K1D).transpose(1, 0, 2)               # (14, Np, 192)

    kernel = functools.partial(_fused_cnn_kernel, nb=NB)
    out = pl.pallas_call(
        kernel,
        out_shape=jax.ShapeDtypeStruct((Np, FC_PAD), jnp.float32),
        grid=(Np // NB,),
        in_specs=[
            pl.BlockSpec((HO1, NB, K1D), lambda i: (0, i, 0)),   # conv1 LHS block
            pl.BlockSpec((4, K1D, N1), lambda i: (0, 0, 0)),     # conv1 banded W (resident)
            pl.BlockSpec((1, N1), lambda i: (0, 0)),             # conv1 folded bias
            pl.BlockSpec((4, K2D, N2), lambda i: (0, 0, 0)),     # conv2 banded W (resident)
            pl.BlockSpec((1, N2), lambda i: (0, 0)),             # conv2 folded bias
            pl.BlockSpec((HO2, N2, FC_PAD), lambda i: (0, 0, 0)),  # FC weight (per-row blocks)
            pl.BlockSpec((1, FC_PAD), lambda i: (0, 0)),         # FC bias
        ],
        out_specs=pl.BlockSpec((NB, FC_PAD), lambda i: (i, 0)),
        scratch_shapes=[pltpu.VMEM((HO2, NB, K2D), jnp.bfloat16)],  # deepened conv2 LHS
        compiler_params=pltpu.CompilerParams(
            dimension_semantics=("parallel",),
            vmem_limit_bytes=32 * 1024 * 1024),
    )(lhs1, prep["c1_w"], prep["c1_b"], prep["c2_w"], prep["c2_b"],
      prep["fc_w"], prep["fc_b"])
    return out[:N, :NUM_CLASSES]


# ----------------------------------------------------------------------------
# One-time host-side weight preparation (BN folding + banded matrices + FC permute)
# ----------------------------------------------------------------------------
def prepare_params(p):
    def fold_bn(conv_b, gamma, beta, mean, var):
        s = gamma / np.sqrt(var + EPS)
        return s, (conv_b - mean) * s + beta

    # ---- conv1: banded, pool parities (dy, dw) and 5 vertical taps folded in.
    w = np.asarray(p["w1"], np.float32)                         # (16, 1, 5, 5)
    s1, bias1 = fold_bn(np.asarray(p["b1"], np.float32), np.asarray(p["g1"], np.float32),
                        np.asarray(p["be1"], np.float32), np.asarray(p["m1"], np.float32),
                        np.asarray(p["v1"], np.float32))
    ws = w * s1[:, None, None, None]
    B1 = np.zeros((2, 2, K1D, N1), np.float32)
    for dy in range(2):
        for dw in range(2):
            for ky in range(5):
                srow = dy + ky                                   # window sub-row in [0, 6)
                for wo in range(WO1):
                    for kx in range(5):
                        wc = 2 * wo + dw + kx                    # padded input column
                        B1[dy, dw, srow * 32 + wc, wo * CO1:(wo + 1) * CO1] = ws[:, 0, ky, kx]
    b1_row = np.tile(bias1, WO1)[None, :]

    # ---- conv2: same construction, input columns are un-padded (pad cols are
    #      simply absent from the layout and from the band).
    w = np.asarray(p["w2"], np.float32)                         # (32, 16, 5, 5)
    s2, bias2 = fold_bn(np.asarray(p["b2"], np.float32), np.asarray(p["g2"], np.float32),
                        np.asarray(p["be2"], np.float32), np.asarray(p["m2"], np.float32),
                        np.asarray(p["v2"], np.float32))
    ws = w * s2[:, None, None, None]
    B2 = np.zeros((2, 2, K2D, N2), np.float32)
    for dy in range(2):
        for dw in range(2):
            for ky in range(5):
                srow = dy + ky
                for wo in range(WO2):
                    for kx in range(5):
                        wc = 2 * wo + dw + kx - 2                # un-padded input column
                        if 0 <= wc < WO1:
                            r0 = srow * SLOT2 + wc * CO1
                            B2[dy, dw, r0:r0 + CO1, wo * CO2:(wo + 1) * CO2] = ws[:, :, ky, kx].T
    b2_row = np.tile(bias2, WO2)[None, :]

    # ---- FC: per-output-row weight blocks in the kernel's (wo*32 + c) column
    #      order, matching PyTorch's NCHW flatten (c*49 + h*7 + w); padded to 128.
    wf = np.asarray(p["wf"], np.float32).reshape(NUM_CLASSES, CO2, HO2, WO2)
    WF = np.zeros((HO2, N2, FC_PAD), np.float32)
    for h in range(HO2):
        WF[h, :, :NUM_CLASSES] = np.transpose(wf[:, :, h, :], (2, 1, 0)).reshape(N2, NUM_CLASSES)
    bf = np.zeros((1, FC_PAD), np.float32)
    bf[0, :NUM_CLASSES] = np.asarray(p["bf"], np.float32)

    return {
        "c1_w": jnp.asarray(B1.reshape(4, K1D, N1), jnp.bfloat16),
        "c1_b": jnp.asarray(b1_row, jnp.float32),
        "c2_w": jnp.asarray(B2.reshape(4, K2D, N2), jnp.bfloat16),
        "c2_b": jnp.asarray(b2_row, jnp.float32),
        "fc_w": jnp.asarray(WF, jnp.bfloat16),
        "fc_b": jnp.asarray(bf, jnp.float32),
    }


# ----------------------------------------------------------------------------
# Pure-JAX reference (correctness check only)
# ----------------------------------------------------------------------------
def reference_forward(x_nchw, p):
    hp = jax.lax.Precision.HIGHEST

    def conv_bn_relu_ref(x, w, b, gamma, beta, mean, var):
        y = jax.lax.conv_general_dilated(
            x, jnp.transpose(w, (2, 3, 1, 0)),
            window_strides=(1, 1), padding=((2, 2), (2, 2)),
            dimension_numbers=("NHWC", "HWIO", "NHWC"), precision=hp) + b
        y = (y - mean) / jnp.sqrt(var + EPS) * gamma + beta
        return jnp.maximum(y, 0.0)

    def pool_ref(x):
        return jax.lax.reduce_window(x, -jnp.inf, jax.lax.max,
                                     (1, 2, 2, 1), (1, 2, 2, 1), "VALID")

    x = jnp.transpose(x_nchw, (0, 2, 3, 1)).astype(jnp.float32)
    h = pool_ref(conv_bn_relu_ref(x, p["w1"], p["b1"], p["g1"], p["be1"],
                                  p["m1"], p["v1"]))
    h = pool_ref(conv_bn_relu_ref(h, p["w2"], p["b2"], p["g2"], p["be2"],
                                  p["m2"], p["v2"]))
    h = jnp.transpose(h, (0, 3, 1, 2)).reshape(x_nchw.shape[0], -1)
    return jnp.dot(h, p["wf"].T, precision=hp) + p["bf"]


# ----------------------------------------------------------------------------
def init_params():
    ks = jax.random.split(jax.random.PRNGKey(42), 16)
    f32 = jnp.float32
    return {
        "w1": 0.1 * jax.random.normal(ks[0], (16, 1, 5, 5), f32),
        "b1": 0.1 * jax.random.normal(ks[1], (16,), f32),
        "g1": 1.0 + 0.1 * jax.random.normal(ks[2], (16,), f32),
        "be1": 0.1 * jax.random.normal(ks[3], (16,), f32),
        "m1": 0.1 * jax.random.normal(ks[4], (16,), f32),
        "v1": 1.0 + 0.1 * jnp.abs(jax.random.normal(ks[5], (16,), f32)),
        "w2": 0.05 * jax.random.normal(ks[6], (32, 16, 5, 5), f32),
        "b2": 0.1 * jax.random.normal(ks[7], (32,), f32),
        "g2": 1.0 + 0.1 * jax.random.normal(ks[8], (32,), f32),
        "be2": 0.1 * jax.random.normal(ks[9], (32,), f32),
        "m2": 0.1 * jax.random.normal(ks[10], (32,), f32),
        "v2": 1.0 + 0.1 * jnp.abs(jax.random.normal(ks[11], (32,), f32)),
        "wf": 0.02 * jax.random.normal(ks[12], (NUM_CLASSES, HO2 * WO2 * CO2), f32),
        "bf": 0.1 * jax.random.normal(ks[13], (NUM_CLASSES,), f32),
    }


if __name__ == "__main__":
    params = init_params()
    prep = prepare_params(params)       # one-time host-side weight preparation

    fwd = jax.jit(cnn_forward)
    k0, k1 = jax.random.split(jax.random.PRNGKey(0))

    # Small batch (as implied by the module's 28x28x1 input -> 7*7*32 fc input).
    x = jax.random.normal(k0, (2, 1, 28, 28), jnp.float32)
    out = fwd(x, prep)
    jax.block_until_ready(out)
    ref = reference_forward(x, params)
    assert out.shape == (2, NUM_CLASSES)
    err = float(jnp.max(jnp.abs(out - ref)))
    assert jnp.allclose(out, ref, rtol=3e-2, atol=5e-2), f"mismatch: max abs err {err}"

    # Larger batch: exercises NB=32 blocking, batch padding and a multi-step grid.
    x2 = jax.random.normal(k1, (40, 1, 28, 28), jnp.float32)
    out2 = fwd(x2, prep)
    jax.block_until_ready(out2)
    ref2 = reference_forward(x2, params)
    assert out2.shape == (40, NUM_CLASSES)
    err2 = float(jnp.max(jnp.abs(out2 - ref2)))
    assert jnp.allclose(out2, ref2, rtol=3e-2, atol=5e-2), f"mismatch: max abs err {err2}"

    print("KERNEL_OK")
</pallas_src>

<mosaic_0001>
module attributes {stable_mosaic.version = 11 : i64} {
  func.func @_fused_cnn_kernel(%arg0: i32, %arg1: memref<14x8x192xbf16, #tpu.memory_space<vmem>>, %arg2: memref<4x192x224xbf16, #tpu.memory_space<vmem>>, %arg3: memref<1x224xf32, #tpu.memory_space<vmem>>, %arg4: memref<4x1536x224xbf16, #tpu.memory_space<vmem>>, %arg5: memref<1x224xf32, #tpu.memory_space<vmem>>, %arg6: memref<7x224x128xbf16, #tpu.memory_space<vmem>>, %arg7: memref<1x128xf32, #tpu.memory_space<vmem>>, %arg8: memref<8x128xf32, #tpu.memory_space<vmem>>, %arg9: memref<7x8x1536xbf16, #tpu.memory_space<vmem>>) attributes {dimension_semantics = [#tpu.dimension_semantics<parallel>], iteration_bounds = array<i64: 1>, scalar_prefetch = 0 : i64, scratch_operands = 1 : i64, tpu.core_type = #tpu.core_type<tc>, window_params = [{transform_indices = @transform_0, window_bounds = array<i64: 14, 8, 192>}, {pipeline_mode = #tpu.pipeline_mode<synchronous>, transform_indices = @transform_1, window_bounds = array<i64: 4, 192, 224>}, {pipeline_mode = #tpu.pipeline_mode<synchronous>, transform_indices = @transform_2, window_bounds = array<i64: 1, 224>}, {pipeline_mode = #tpu.pipeline_mode<synchronous>, transform_indices = @transform_3, window_bounds = array<i64: 4, 1536, 224>}, {pipeline_mode = #tpu.pipeline_mode<synchronous>, transform_indices = @transform_4, window_bounds = array<i64: 1, 224>}, {pipeline_mode = #tpu.pipeline_mode<synchronous>, transform_indices = @transform_5, window_bounds = array<i64: 7, 224, 128>}, {pipeline_mode = #tpu.pipeline_mode<synchronous>, transform_indices = @transform_6, window_bounds = array<i64: 1, 128>}, {transform_indices = @transform_7, window_bounds = array<i64: 8, 128>}]} {
    %c0 = arith.constant 0 : index
    %c0_0 = arith.constant 0 : index
    %c0_1 = arith.constant 0 : index
    %0 = vector.load %arg1[%c0, %c0_0, %c0_1] : memref<14x8x192xbf16, #tpu.memory_space<vmem>>, vector<14x8x192xbf16>
    %1 = vector.shape_cast %0 : vector<14x8x192xbf16> to vector<112x192xbf16>
    %c0_2 = arith.constant 0 : index
    %c0_3 = arith.constant 0 : index
    %c0_4 = arith.constant 0 : index
    %2 = vector.load %arg2[%c0_2, %c0_3, %c0_4] : memref<4x192x224xbf16, #tpu.memory_space<vmem>>, vector<1x192x224xbf16>
    %3 = vector.shape_cast %2 : vector<1x192x224xbf16> to vector<192x224xbf16>
    %cst = arith.constant dense<0.000000e+00> : vector<112x224xf32>
    %4 = tpu.matmul %1, %3, %cst {dimension_numbers = #tpu.dot_dimension_numbers<[1], [0], [0], [1], [0, 0, 1, 1], [], []>} : vector<112x192xbf16>, vector<192x224xbf16>, vector<112x224xf32> -> vector<112x224xf32>
    %c1 = arith.constant 1 : index
    %c0_5 = arith.constant 0 : index
    %c0_6 = arith.constant 0 : index
    %5 = vector.load %arg2[%c1, %c0_5, %c0_6] : memref<4x192x224xbf16, #tpu.memory_space<vmem>>, vector<1x192x224xbf16>
    %6 = vector.shape_cast %5 : vector<1x192x224xbf16> to vector<192x224xbf16>
    %cst_7 = arith.constant dense<0.000000e+00> : vector<112x224xf32>
    %7 = tpu.matmul %1, %6, %cst_7 {dimension_numbers = #tpu.dot_dimension_numbers<[1], [0], [0], [1], [0, 0, 1, 1], [], []>} : vector<112x192xbf16>, vector<192x224xbf16>, vector<112x224xf32> -> vector<112x224xf32>
    %8 = arith.maximumf %4, %7 : vector<112x224xf32>
    %c2 = arith.constant 2 : index
    %c0_8 = arith.constant 0 : index
    %c0_9 = arith.constant 0 : index
    %9 = vector.load %arg2[%c2, %c0_8, %c0_9] : memref<4x192x224xbf16, #tpu.memory_space<vmem>>, vector<1x192x224xbf16>
    %10 = vector.shape_cast %9 : vector<1x192x224xbf16> to vector<192x224xbf16>
    %cst_10 = arith.constant dense<0.000000e+00> : vector<112x224xf32>
    %11 = tpu.matmul %1, %10, %cst_10 {dimension_numbers = #tpu.dot_dimension_numbers<[1], [0], [0], [1], [0, 0, 1, 1], [], []>} : vector<112x192xbf16>, vector<192x224xbf16>, vector<112x224xf32> -> vector<112x224xf32>
    %12 = arith.maximumf %8, %11 : vector<112x224xf32>
    %c3 = arith.constant 3 : index
    %c0_11 = arith.constant 0 : index
    %c0_12 = arith.constant 0 : index
    %13 = vector.load %arg2[%c3, %c0_11, %c0_12] : memref<4x192x224xbf16, #tpu.memory_space<vmem>>, vector<1x192x224xbf16>
    %14 = vector.shape_cast %13 : vector<1x192x224xbf16> to vector<192x224xbf16>
    %cst_13 = arith.constant dense<0.000000e+00> : vector<112x224xf32>
    %15 = tpu.matmul %1, %14, %cst_13 {dimension_numbers = #tpu.dot_dimension_numbers<[1], [0], [0], [1], [0, 0, 1, 1], [], []>} : vector<112x192xbf16>, vector<192x224xbf16>, vector<112x224xf32> -> vector<112x224xf32>
    %16 = arith.maximumf %12, %15 : vector<112x224xf32>
    %c0_14 = arith.constant 0 : index
    %c0_15 = arith.constant 0 : index
    %17 = vector.load %arg3[%c0_14, %c0_15] : memref<1x224xf32, #tpu.memory_space<vmem>>, vector<1x224xf32>
    %18 = vector.broadcast %17 : vector<1x224xf32> to vector<112x224xf32>
    %19 = arith.addf %16, %18 : vector<112x224xf32>
    %cst_16 = arith.constant 0.000000e+00 : f32
    %20 = vector.broadcast %cst_16 : f32 to vector<112x224xf32>
    %21 = arith.maximumf %19, %20 : vector<112x224xf32>
    %22 = arith.truncf %21 : vector<112x224xf32> to vector<112x224xbf16>
    %cst_17 = arith.constant 0.000000e+00 : bf16
    %23 = vector.broadcast %cst_17 : bf16 to vector<7x8x1536xbf16>
    %c0_18 = arith.constant 0 : index
    %c0_19 = arith.constant 0 : index
    %c0_20 = arith.constant 0 : index
    %24 = vector.load %arg9[%c0_18, %c0_19, %c0_20] : memref<7x8x1536xbf16, #tpu.memory_space<vmem>>, vector<7x8x1536xbf16>
    tpu.vector_store %arg9[%c0_18, %c0_19, %c0_20], %23 {strides = array<i32>} : memref<7x8x1536xbf16, #tpu.memory_space<vmem>>, vector<7x8x1536xbf16>,
    %25 = vector.extract_strided_slice %22 {offsets = [0, 0], sizes = [8, 224], strides = [1, 1]} : vector<112x224xbf16> to vector<8x224xbf16>
    %c0_21 = arith.constant 0 : index
    %c0_22 = arith.constant 0 : index
    %c512 = arith.constant 512 : index
    %26 = vector.load %arg9[%c0_21, %c0_22, %c512] : memref<7x8x1536xbf16, #tpu.memory_space<vmem>>, vector<1x8x224xbf16>
    %27 = vector.shape_cast %26 : vector<1x8x224xbf16> to vector<8x224xbf16>
    %28 = vector.shape_cast %25 : vector<8x224xbf16> to vector<1x8x224xbf16>
    tpu.vector_store %arg9[%c0_21, %c0_22, %c512], %28 {strides = array<i32>} : memref<7x8x1536xbf16, #tpu.memory_space<vmem>>, vector<1x8x224xbf16>,
    %29 = vector.extract_strided_slice %22 {offsets = [8, 0], sizes = [8, 224], strides = [1, 1]} : vector<112x224xbf16> to vector<8x224xbf16>
    %c0_23 = arith.constant 0 : index
    %c0_24 = arith.constant 0 : index
    %c768 = arith.constant 768 : index
    %30 = vector.load %arg9[%c0_23, %c0_24, %c768] : memref<7x8x1536xbf16, #tpu.memory_space<vmem>>, vector<1x8x224xbf16>
    %31 = vector.shape_cast %30 : vector<1x8x224xbf16> to vector<8x224xbf16>
    %32 = vector.shape_cast %29 : vector<8x224xbf16> to vector<1x8x224xbf16>
    tpu.vector_store %arg9[%c0_23, %c0_24, %c768], %32 {strides = array<i32>} : memref<7x8x1536xbf16, #tpu.memory_space<vmem>>, vector<1x8x224xbf16>,
    %33 = vector.extract_strided_slice %22 {offsets = [16, 0], sizes = [8, 224], strides = [1, 1]} : vector<112x224xbf16> to vector<8x224xbf16>
    %c0_25 = arith.constant 0 : index
    %c0_26 = arith.constant 0 : index
    %c1024 = arith.constant 1024 : index
    %34 = vector.load %arg9[%c0_25, %c0_26, %c1024] : memref<7x8x1536xbf16, #tpu.memory_space<vmem>>, vector<1x8x224xbf16>
    %35 = vector.shape_cast %34 : vector<1x8x224xbf16> to vector<8x224xbf16>
    %36 = vector.shape_cast %33 : vector<8x224xbf16> to vector<1x8x224xbf16>
    tpu.vector_store %arg9[%c0_25, %c0_26, %c1024], %36 {strides = array<i32>} : memref<7x8x1536xbf16, #tpu.memory_space<vmem>>, vector<1x8x224xbf16>,
    %37 = vector.extract_strided_slice %22 {offsets = [24, 0], sizes = [8, 224], strides = [1, 1]} : vector<112x224xbf16> to vector<8x224xbf16>
    %c0_27 = arith.constant 0 : index
    %c0_28 = arith.constant 0 : index
    %c1280 = arith.constant 1280 : index
    %38 = vector.load %arg9[%c0_27, %c0_28, %c1280] : memref<7x8x1536xbf16, #tpu.memory_space<vmem>>, vector<1x8x224xbf16>
    %39 = vector.shape_cast %38 : vector<1x8x224xbf16> to vector<8x224xbf16>
    %40 = vector.shape_cast %37 : vector<8x224xbf16> to vector<1x8x224xbf16>
    tpu.vector_store %arg9[%c0_27, %c0_28, %c1280], %40 {strides = array<i32>} : memref<7x8x1536xbf16, #tpu.memory_space<vmem>>, vector<1x8x224xbf16>,
    %41 = vector.extract_strided_slice %22 {offsets = [0, 0], sizes = [8, 224], strides = [1, 1]} : vector<112x224xbf16> to vector<8x224xbf16>
    %c1_29 = arith.constant 1 : index
    %c0_30 = arith.constant 0 : index
    %c0_31 = arith.constant 0 : index
    %42 = vector.load %arg9[%c1_29, %c0_30, %c0_31] : memref<7x8x1536xbf16, #tpu.memory_space<vmem>>, vector<1x8x224xbf16>
    %43 = vector.shape_cast %42 : vector<1x8x224xbf16> to vector<8x224xbf16>
    %44 = vector.shape_cast %41 : vector<8x224xbf16> to vector<1x8x224xbf16>
    tpu.vector_store %arg9[%c1_29, %c0_30, %c0_31], %44 {strides = array<i32>} : memref<7x8x1536xbf16, #tpu.memory_space<vmem>>, vector<1x8x224xbf16>,
    %45 = vector.extract_strided_slice %22 {offsets = [8, 0], sizes = [8, 224], strides = [1, 1]} : vector<112x224xbf16> to vector<8x224xbf16>
    %c1_32 = arith.constant 1 : index
    %c0_33 = arith.constant 0 : index
    %c256 = arith.constant 256 : index
    %46 = vector.load %arg9[%c1_32, %c0_33, %c256] : memref<7x8x1536xbf16, #tpu.memory_space<vmem>>, vector<1x8x224xbf16>
    %47 = vector.shape_cast %46 : vector<1x8x224xbf16> to vector<8x224xbf16>
    %48 = vector.shape_cast %45 : vector<8x224xbf16> to vector<1x8x224xbf16>
    tpu.vector_store %arg9[%c1_32, %c0_33, %c256], %48 {strides = array<i32>} : memref<7x8x1536xbf16, #tpu.memory_space<vmem>>, vector<1x8x224xbf16>,
    %49 = vector.extract_strided_slice %22 {offsets = [16, 0], sizes = [8, 224], strides = [1, 1]} : vector<112x224xbf16> to vector<8x224xbf16>
    %c1_34 = arith.constant 1 : index
    %c0_35 = arith.constant 0 : index
    %c512_36 = arith.constant 512 : index
    %50 = vector.load %arg9[%c1_34, %c0_35, %c512_36] : memref<7x8x1536xbf16, #tpu.memory_space<vmem>>, vector<1x8x224xbf16>
    %51 = vector.shape_cast %50 : vector<1x8x224xbf16> to vector<8x224xbf16>
    %52 = vector.shape_cast %49 : vector<8x224xbf16> to vector<1x8x224xbf16>
    tpu.vector_store %arg9[%c1_34, %c0_35, %c512_36], %52 {strides = array<i32>} : memref<7x8x1536xbf16, #tpu.memory_space<vmem>>, vector<1x8x224xbf16>,
    %53 = vector.extract_strided_slice %22 {offsets = [24, 0], sizes = [8, 224], strides = [1, 1]} : vector<112x224xbf16> to vector<8x224xbf16>
    %c1_37 = arith.constant 1 : index
    %c0_38 = arith.constant 0 : index
    %c768_39 = arith.constant 768 : index
    %54 = vector.load %arg9[%c1_37, %c0_38, %c768_39] : memref<7x8x1536xbf16, #tpu.memory_space<vmem>>, vector<1x8x224xbf16>
    %55 = vector.shape_cast %54 : vector<1x8x224xbf16> to vector<8x224xbf16>
    %56 = vector.shape_cast %53 : vector<8x224xbf16> to vector<1x8x224xbf16>
    tpu.vector_store %arg9[%c1_37, %c0_38, %c768_39], %56 {strides = array<i32>} : memref<7x8x1536xbf16, #tpu.memory_space<vmem>>, vector<1x8x224xbf16>,
    %57 = vector.extract_strided_slice %22 {offsets = [32, 0], sizes = [8, 224], strides = [1, 1]} : vector<112x224xbf16> to vector<8x224xbf16>
    %c1_40 = arith.constant 1 : index
    %c0_41 = arith.constant 0 : index
    %c1024_42 = arith.constant 1024 : index
    %58 = vector.load %arg9[%c1_40, %c0_41, %c1024_42] : memref<7x8x1536xbf16, #tpu.memory_space<vmem>>, vector<1x8x224xbf16>
    %59 = vector.shape_cast %58 : vector<1x8x224xbf16> to vector<8x224xbf16>
    %60 = vector.shape_cast %57 : vector<8x224xbf16> to vector<1x8x224xbf16>
    tpu.vector_store %arg9[%c1_40, %c0_41, %c1024_42], %60 {strides = array<i32>} : memref<7x8x1536xbf16, #tpu.memory_space<vmem>>, vector<1x8x224xbf16>,
    %61 = vector.extract_strided_slice %22 {offsets = [40, 0], sizes = [8, 224], strides = [1, 1]} : vector<112x224xbf16> to vector<8x224xbf16>
    %c1_43 = arith.constant 1 : index
    %c0_44 = arith.constant 0 : index
    %c1280_45 = arith.constant 1280 : index
    %62 = vector.load %arg9[%c1_43, %c0_44, %c1280_45] : memref<7x8x1536xbf16, #tpu.memory_space<vmem>>, vector<1x8x224xbf16>
    %63 = vector.shape_cast %62 : vector<1x8x224xbf16> to vector<8x224xbf16>
    %64 = vector.shape_cast %61 : vector<8x224xbf16> to vector<1x8x224xbf16>
    tpu.vector_store %arg9[%c1_43, %c0_44, %c1280_45], %64 {strides = array<i32>} : memref<7x8x1536xbf16, #tpu.memory_space<vmem>>, vector<1x8x224xbf16>,
    %65 = vector.extract_strided_slice %22 {offsets = [16, 0], sizes = [8, 224], strides = [1, 1]} : vector<112x224xbf16> to vector<8x224xbf16>
    %c2_46 = arith.constant 2 : index
    %c0_47 = arith.constant 0 : index
    %c0_48 = arith.constant 0 : index
    %66 = vector.load %arg9[%c2_46, %c0_47, %c0_48] : memref<7x8x1536xbf16, #tpu.memory_space<vmem>>, vector<1x8x224xbf16>
    %67 = vector.shape_cast %66 : vector<1x8x224xbf16> to vector<8x224xbf16>
    %68 = vector.shape_cast %65 : vector<8x224xbf16> to vector<1x8x224xbf16>
    tpu.vector_store %arg9[%c2_46, %c0_47, %c0_48], %68 {strides = array<i32>} : memref<7x8x1536xbf16, #tpu.memory_space<vmem>>, vector<1x8x224xbf16>,
    %69 = vector.extract_strided_slice %22 {offsets = [24, 0], sizes = [8, 224], strides = [1, 1]} : vector<112x224xbf16> to vector<8x224xbf16>
    %c2_49 = arith.constant 2 : index
    %c0_50 = arith.constant 0 : index
    %c256_51 = arith.constant 256 : index
    %70 = vector.load %arg9[%c2_49, %c0_50, %c256_51] : memref<7x8x1536xbf16, #tpu.memory_space<vmem>>, vector<1x8x224xbf16>
    %71 = vector.shape_cast %70 : vector<1x8x224xbf16> to vector<8x224xbf16>
    %72 = vector.shape_cast %69 : vector<8x224xbf16> to vector<1x8x224xbf16>
    tpu.vector_store %arg9[%c2_49, %c0_50, %c256_51], %72 {strides = array<i32>} : memref<7x8x1536xbf16, #tpu.memory_space<vmem>>, vector<1x8x224xbf16>,
    %73 = vector.extract_strided_slice %22 {offsets = [32, 0], sizes = [8, 224], strides = [1, 1]} : vector<112x224xbf16> to vector<8x224xbf16>
    %c2_52 = arith.constant 2 : index
    %c0_53 = arith.constant 0 : index
    %c512_54 = arith.constant 512 : index
    %74 = vector.load %arg9[%c2_52, %c0_53, %c512_54] : memref<7x8x1536xbf16, #tpu.memory_space<vmem>>, vector<1x8x224xbf16>
    %75 = vector.shape_cast %74 : vector<1x8x224xbf16> to vector<8x224xbf16>
    %76 = vector.shape_cast %73 : vector<8x224xbf16> to vector<1x8x224xbf16>
    tpu.vector_store %arg9[%c2_52, %c0_53, %c512_54], %76 {strides = array<i32>} : memref<7x8x1536xbf16, #tpu.memory_space<vmem>>, vector<1x8x224xbf16>,
    %77 = vector.extract_strided_slice %22 {offsets = [40, 0], sizes = [8, 224], strides = [1, 1]} : vector<112x224xbf16> to vector<8x224xbf16>
    %c2_55 = arith.constant 2 : index
    %c0_56 = arith.constant 0 : index
    %c768_57 = arith.constant 768 : index
    %78 = vector.load %arg9[%c2_55, %c0_56, %c768_57] : memref<7x8x1536xbf16, #tpu.memory_space<vmem>>, vector<1x8x224xbf16>
    %79 = vector.shape_cast %78 : vector<1x8x224xbf16> to vector<8x224xbf16>
    %80 = vector.shape_cast %77 : vector<8x224xbf16> to vector<1x8x224xbf16>
    tpu.vector_store %arg9[%c2_55, %c0_56, %c768_57], %80 {strides = array<i32>} : memref<7x8x1536xbf16, #tpu.memory_space<vmem>>, vector<1x8x224xbf16>,
    %81 = vector.extract_strided_slice %22 {offsets = [48, 0], sizes = [8, 224], strides = [1, 1]} : vector<112x224xbf16> to vector<8x224xbf16>
    %c2_58 = arith.constant 2 : index
    %c0_59 = arith.constant 0 : index
    %c1024_60 = arith.constant 1024 : index
    %82 = vector.load %arg9[%c2_58, %c0_59, %c1024_60] : memref<7x8x1536xbf16, #tpu.memory_space<vmem>>, vector<1x8x224xbf16>
    %83 = vector.shape_cast %82 : vector<1x8x224xbf16> to vector<8x224xbf16>
    %84 = vector.shape_cast %81 : vector<8x224xbf16> to vector<1x8x224xbf16>
    tpu.vector_store %arg9[%c2_58, %c0_59, %c1024_60], %84 {strides = array<i32>} : memref<7x8x1536xbf16, #tpu.memory_space<vmem>>, vector<1x8x224xbf16>,
    %85 = vector.extract_strided_slice %22 {offsets = [56, 0], sizes = [8, 224], strides = [1, 1]} : vector<112x224xbf16> to vector<8x224xbf16>
    %c2_61 = arith.constant 2 : index
    %c0_62 = arith.constant 0 : index
    %c1280_63 = arith.constant 1280 : index
    %86 = vector.load %arg9[%c2_61, %c0_62, %c1280_63] : memref<7x8x1536xbf16, #tpu.memory_space<vmem>>, vector<1x8x224xbf16>
    %87 = vector.shape_cast %86 : vector<1x8x224xbf16> to vector<8x224xbf16>
    %88 = vector.shape_cast %85 : vector<8x224xbf16> to vector<1x8x224xbf16>
    tpu.vector_store %arg9[%c2_61, %c0_62, %c1280_63], %88 {strides = array<i32>} : memref<7x8x1536xbf16, #tpu.memory_space<vmem>>, vector<1x8x224xbf16>,
    %89 = vector.extract_strided_slice %22 {offsets = [32, 0], sizes = [8, 224], strides = [1, 1]} : vector<112x224xbf16> to vector<8x224xbf16>
    %c3_64 = arith.constant 3 : index
    %c0_65 = arith.constant 0 : index
    %c0_66 = arith.constant 0 : index
    %90 = vector.load %arg9[%c3_64, %c0_65, %c0_66] : memref<7x8x1536xbf16, #tpu.memory_space<vmem>>, vector<1x8x224xbf16>
    %91 = vector.shape_cast %90 : vector<1x8x224xbf16> to vector<8x224xbf16>
    %92 = vector.shape_cast %89 : vector<8x224xbf16> to vector<1x8x224xbf16>
    tpu.vector_store %arg9[%c3_64, %c0_65, %c0_66], %92 {strides = array<i32>} : memref<7x8x1536xbf16, #tpu.memory_space<vmem>>, vector<1x8x224xbf16>,
    %93 = vector.extract_strided_slice %22 {offsets = [40, 0], sizes = [8, 224], strides = [1, 1]} : vector<112x224xbf16> to vector<8x224xbf16>
    %c3_67 = arith.constant 3 : index
    %c0_68 = arith.constant 0 : index
    %c256_69 = arith.constant 256 : index
    %94 = vector.load %arg9[%c3_67, %c0_68, %c256_69] : memref<7x8x1536xbf16, #tpu.memory_space<vmem>>, vector<1x8x224xbf16>
    %95 = vector.shape_cast %94 : vector<1x8x224xbf16> to vector<8x224xbf16>
    %96 = vector.shape_cast %93 : vector<8x224xbf16> to vector<1x8x224xbf16>
    tpu.vector_store %arg9[%c3_67, %c0_68, %c256_69], %96 {strides = array<i32>} : memref<7x8x1536xbf16, #tpu.memory_space<vmem>>, vector<1x8x224xbf16>,
    %97 = vector.extract_strided_slice %22 {offsets = [48, 0], sizes = [8, 224], strides = [1, 1]} : vector<112x224xbf16> to vector<8x224xbf16>
    %c3_70 = arith.constant 3 : index
    %c0_71 = arith.constant 0 : index
    %c512_72 = arith.constant 512 : index
    %98 = vector.load %arg9[%c3_70, %c0_71, %c512_72] : memref<7x8x1536xbf16, #tpu.memory_space<vmem>>, vector<1x8x224xbf16>
    %99 = vector.shape_cast %98 : vector<1x8x224xbf16> to vector<8x224xbf16>
    %100 = vector.shape_cast %97 : vector<8x224xbf16> to vector<1x8x224xbf16>
    tpu.vector_store %arg9[%c3_70, %c0_71, %c512_72], %100 {strides = array<i32>} : memref<7x8x1536xbf16, #tpu.memory_space<vmem>>, vector<1x8x224xbf16>,
    %101 = vector.extract_strided_slice %22 {offsets = [56, 0], sizes = [8, 224], strides = [1, 1]} : vector<112x224xbf16> to vector<8x224xbf16>
    %c3_73 = arith.constant 3 : index
    %c0_74 = arith.constant 0 : index
    %c768_75 = arith.constant 768 : index
    %102 = vector.load %arg9[%c3_73, %c0_74, %c768_75] : memref<7x8x1536xbf16, #tpu.memory_space<vmem>>, vector<1x8x224xbf16>
    %103 = vector.shape_cast %102 : vector<1x8x224xbf16> to vector<8x224xbf16>
    %104 = vector.shape_cast %101 : vector<8x224xbf16> to vector<1x8x224xbf16>
    tpu.vector_store %arg9[%c3_73, %c0_74, %c768_75], %104 {strides = array<i32>} : memref<7x8x1536xbf16, #tpu.memory_space<vmem>>, vector<1x8x224xbf16>,
    %105 = vector.extract_strided_slice %22 {offsets = [64, 0], sizes = [8, 224], strides = [1, 1]} : vector<112x224xbf16> to vector<8x224xbf16>
    %c3_76 = arith.constant 3 : index
    %c0_77 = arith.constant 0 : index
    %c1024_78 = arith.constant 1024 : index
    %106 = vector.load %arg9[%c3_76, %c0_77, %c1024_78] : memref<7x8x1536xbf16, #tpu.memory_space<vmem>>, vector<1x8x224xbf16>
    %107 = vector.shape_cast %106 : vector<1x8x224xbf16> to vector<8x224xbf16>
    %108 = vector.shape_cast %105 : vector<8x224xbf16> to vector<1x8x224xbf16>
    tpu.vector_store %arg9[%c3_76, %c0_77, %c1024_78], %108 {strides = array<i32>} : memref<7x8x1536xbf16, #tpu.memory_space<vmem>>, vector<1x8x224xbf16>,
    %109 = vector.extract_strided_slice %22 {offsets = [72, 0], sizes = [8, 224], strides = [1, 1]} : vector<112x224xbf16> to vector<8x224xbf16>
    %c3_79 = arith.constant 3 : index
    %c0_80 = arith.constant 0 : index
    %c1280_81 = arith.constant 1280 : index
    %110 = vector.load %arg9[%c3_79, %c0_80, %c1280_81] : memref<7x8x1536xbf16, #tpu.memory_space<vmem>>, vector<1x8x224xbf16>
    %111 = vector.shape_cast %110 : vector<1x8x224xbf16> to vector<8x224xbf16>
    %112 = vector.shape_cast %109 : vector<8x224xbf16> to vector<1x8x224xbf16>
    tpu.vector_store %arg9[%c3_79, %c0_80, %c1280_81], %112 {strides = array<i32>} : memref<7x8x1536xbf16, #tpu.memory_space<vmem>>, vector<1x8x224xbf16>,
    %113 = vector.extract_strided_slice %22 {offsets = [48, 0], sizes = [8, 224], strides = [1, 1]} : vector<112x224xbf16> to vector<8x224xbf16>
    %c4 = arith.constant 4 : index
    %c0_82 = arith.constant 0 : index
    %c0_83 = arith.constant 0 : index
    %114 = vector.load %arg9[%c4, %c0_82, %c0_83] : memref<7x8x1536xbf16, #tpu.memory_space<vmem>>, vector<1x8x224xbf16>
    %115 = vector.shape_cast %114 : vector<1x8x224xbf16> to vector<8x224xbf16>
    %116 = vector.shape_cast %113 : vector<8x224xbf16> to vector<1x8x224xbf16>
    tpu.vector_store %arg9[%c4, %c0_82, %c0_83], %116 {strides = array<i32>} : memref<7x8x1536xbf16, #tpu.memory_space<vmem>>, vector<1x8x224xbf16>,
    %117 = vector.extract_strided_slice %22 {offsets = [56, 0], sizes = [8, 224], strides = [1, 1]} : vector<112x224xbf16> to vector<8x224xbf16>
    %c4_84 = arith.constant 4 : index
    %c0_85 = arith.constant 0 : index
    %c256_86 = arith.constant 256 : index
    %118 = vector.load %arg9[%c4_84, %c0_85, %c256_86] : memref<7x8x1536xbf16, #tpu.memory_space<vmem>>, vector<1x8x224xbf16>
    %119 = vector.shape_cast %118 : vector<1x8x224xbf16> to vector<8x224xbf16>
    %120 = vector.shape_cast %117 : vector<8x224xbf16> to vector<1x8x224xbf16>
    tpu.vector_store %arg9[%c4_84, %c0_85, %c256_86], %120 {strides = array<i32>} : memref<7x8x1536xbf16, #tpu.memory_space<vmem>>, vector<1x8x224xbf16>,
    %121 = vector.extract_strided_slice %22 {offsets = [64, 0], sizes = [8, 224], strides = [1, 1]} : vector<112x224xbf16> to vector<8x224xbf16>
    %c4_87 = arith.constant 4 : index
    %c0_88 = arith.constant 0 : index
    %c512_89 = arith.constant 512 : index
    %122 = vector.load %arg9[%c4_87, %c0_88, %c512_89] : memref<7x8x1536xbf16, #tpu.memory_space<vmem>>, vector<1x8x224xbf16>
    %123 = vector.shape_cast %122 : vector<1x8x224xbf16> to vector<8x224xbf16>
    %124 = vector.shape_cast %121 : vector<8x224xbf16> to vector<1x8x224xbf16>
    tpu.vector_store %arg9[%c4_87, %c0_88, %c512_89], %124 {strides = array<i32>} : memref<7x8x1536xbf16, #tpu.memory_space<vmem>>, vector<1x8x224xbf16>,
    %125 = vector.extract_strided_slice %22 {offsets = [72, 0], sizes = [8, 224], strides = [1, 1]} : vector<112x224xbf16> to vector<8x224xbf16>
    %c4_90 = arith.constant 4 : index
    %c0_91 = arith.constant 0 : index
    %c768_92 = arith.constant 768 : index
    %126 = vector.load %arg9[%c4_90, %c0_91, %c768_92] : memref<7x8x1536xbf16, #tpu.memory_space<vmem>>, vector<1x8x224xbf16>
    %127 = vector.shape_cast %126 : vector<1x8x224xbf16> to vector<8x224xbf16>
    %128 = vector.shape_cast %125 : vector<8x224xbf16> to vector<1x8x224xbf16>
    tpu.vector_store %arg9[%c4_90, %c0_91, %c768_92], %128 {strides = array<i32>} : memref<7x8x1536xbf16, #tpu.memory_space<vmem>>, vector<1x8x224xbf16>,
    %129 = vector.extract_strided_slice %22 {offsets = [80, 0], sizes = [8, 224], strides = [1, 1]} : vector<112x224xbf16> to vector<8x224xbf16>
    %c4_93 = arith.constant 4 : index
    %c0_94 = arith.constant 0 : index
    %c1024_95 = arith.constant 1024 : index
    %130 = vector.load %arg9[%c4_93, %c0_94, %c1024_95] : memref<7x8x1536xbf16, #tpu.memory_space<vmem>>, vector<1x8x224xbf16>
    %131 = vector.shape_cast %130 : vector<1x8x224xbf16> to vector<8x224xbf16>
    %132 = vector.shape_cast %129 : vector<8x224xbf16> to vector<1x8x224xbf16>
    tpu.vector_store %arg9[%c4_93, %c0_94, %c1024_95], %132 {strides = array<i32>} : memref<7x8x1536xbf16, #tpu.memory_space<vmem>>, vector<1x8x224xbf16>,
    %133 = vector.extract_strided_slice %22 {offsets = [88, 0], sizes = [8, 224], strides = [1, 1]} : vector<112x224xbf16> to vector<8x224xbf16>
    %c4_96 = arith.constant 4 : index
    %c0_97 = arith.constant 0 : index
    %c1280_98 = arith.constant 1280 : index
    %134 = vector.load %arg9[%c4_96, %c0_97, %c1280_98] : memref<7x8x1536xbf16, #tpu.memory_space<vmem>>, vector<1x8x224xbf16>
    %135 = vector.shape_cast %134 : vector<1x8x224xbf16> to vector<8x224xbf16>
    %136 = vector.shape_cast %133 : vector<8x224xbf16> to vector<1x8x224xbf16>
    tpu.vector_store %arg9[%c4_96, %c0_97, %c1280_98], %136 {strides = array<i32>} : memref<7x8x1536xbf16, #tpu.memory_space<vmem>>, vector<1x8x224xbf16>,
    %137 = vector.extract_strided_slice %22 {offsets = [64, 0], sizes = [8, 224], strides = [1, 1]} : vector<112x224xbf16> to vector<8x224xbf16>
    %c5 = arith.constant 5 : index
    %c0_99 = arith.constant 0 : index
    %c0_100 = arith.constant 0 : index
    %138 = vector.load %arg9[%c5, %c0_99, %c0_100] : memref<7x8x1536xbf16, #tpu.memory_space<vmem>>, vector<1x8x224xbf16>
    %139 = vector.shape_cast %138 : vector<1x8x224xbf16> to vector<8x224xbf16>
    %140 = vector.shape_cast %137 : vector<8x224xbf16> to vector<1x8x224xbf16>
    tpu.vector_store %arg9[%c5, %c0_99, %c0_100], %140 {strides = array<i32>} : memref<7x8x1536xbf16, #tpu.memory_space<vmem>>, vector<1x8x224xbf16>,
    %141 = vector.extract_strided_slice %22 {offsets = [72, 0], sizes = [8, 224], strides = [1, 1]} : vector<112x224xbf16> to vector<8x224xbf16>
    %c5_101 = arith.constant 5 : index
    %c0_102 = arith.constant 0 : index
    %c256_103 = arith.constant 256 : index
    %142 = vector.load %arg9[%c5_101, %c0_102, %c256_103] : memref<7x8x1536xbf16, #tpu.memory_space<vmem>>, vector<1x8x224xbf16>
    %143 = vector.shape_cast %142 : vector<1x8x224xbf16> to vector<8x224xbf16>
    %144 = vector.shape_cast %141 : vector<8x224xbf16> to vector<1x8x224xbf16>
    tpu.vector_store %arg9[%c5_101, %c0_102, %c256_103], %144 {strides = array<i32>} : memref<7x8x1536xbf16, #tpu.memory_space<vmem>>, vector<1x8x224xbf16>,
    %145 = vector.extract_strided_slice %22 {offsets = [80, 0], sizes = [8, 224], strides = [1, 1]} : vector<112x224xbf16> to vector<8x224xbf16>
    %c5_104 = arith.constant 5 : index
    %c0_105 = arith.constant 0 : index
    %c512_106 = arith.constant 512 : index
    %146 = vector.load %arg9[%c5_104, %c0_105, %c512_106] : memref<7x8x1536xbf16, #tpu.memory_space<vmem>>, vector<1x8x224xbf16>
    %147 = vector.shape_cast %146 : vector<1x8x224xbf16> to vector<8x224xbf16>
    %148 = vector.shape_cast %145 : vector<8x224xbf16> to vector<1x8x224xbf16>
    tpu.vector_store %arg9[%c5_104, %c0_105, %c512_106], %148 {strides = array<i32>} : memref<7x8x1536xbf16, #tpu.memory_space<vmem>>, vector<1x8x224xbf16>,
    %149 = vector.extract_strided_slice %22 {offsets = [88, 0], sizes = [8, 224], strides = [1, 1]} : vector<112x224xbf16> to vector<8x224xbf16>
    %c5_107 = arith.constant 5 : index
    %c0_108 = arith.constant 0 : index
    %c768_109 = arith.constant 768 : index
    %150 = vector.load %arg9[%c5_107, %c0_108, %c768_109] : memref<7x8x1536xbf16, #tpu.memory_space<vmem>>, vector<1x8x224xbf16>
    %151 = vector.shape_cast %150 : vector<1x8x224xbf16> to vector<8x224xbf16>
    %152 = vector.shape_cast %149 : vector<8x224xbf16> to vector<1x8x224xbf16>
    tpu.vector_store %arg9[%c5_107, %c0_108, %c768_109], %152 {strides = array<i32>} : memref<7x8x1536xbf16, #tpu.memory_space<vmem>>, vector<1x8x224xbf16>,
    %153 = vector.extract_strided_slice %22 {offsets = [96, 0], sizes = [8, 224], strides = [1, 1]} : vector<112x224xbf16> to vector<8x224xbf16>
    %c5_110 = arith.constant 5 : index
    %c0_111 = arith.constant 0 : index
    %c1024_112 = arith.constant 1024 : index
    %154 = vector.load %arg9[%c5_110, %c0_111, %c1024_112] : memref<7x8x1536xbf16, #tpu.memory_space<vmem>>, vector<1x8x224xbf16>
    %155 = vector.shape_cast %154 : vector<1x8x224xbf16> to vector<8x224xbf16>
    %156 = vector.shape_cast %153 : vector<8x224xbf16> to vector<1x8x224xbf16>
    tpu.vector_store %arg9[%c5_110, %c0_111, %c1024_112], %156 {strides = array<i32>} : memref<7x8x1536xbf16, #tpu.memory_space<vmem>>, vector<1x8x224xbf16>,
    %157 = vector.extract_strided_slice %22 {offsets = [104, 0], sizes = [8, 224], strides = [1, 1]} : vector<112x224xbf16> to vector<8x224xbf16>
    %c5_113 = arith.constant 5 : index
    %c0_114 = arith.constant 0 : index
    %c1280_115 = arith.constant 1280 : index
    %158 = vector.load %arg9[%c5_113, %c0_114, %c1280_115] : memref<7x8x1536xbf16, #tpu.memory_space<vmem>>, vector<1x8x224xbf16>
    %159 = vector.shape_cast %158 : vector<1x8x224xbf16> to vector<8x224xbf16>
    %160 = vector.shape_cast %157 : vector<8x224xbf16> to vector<1x8x224xbf16>
    tpu.vector_store %arg9[%c5_113, %c0_114, %c1280_115], %160 {strides = array<i32>} : memref<7x8x1536xbf16, #tpu.memory_space<vmem>>, vector<1x8x224xbf16>,
    %161 = vector.extract_strided_slice %22 {offsets = [80, 0], sizes = [8, 224], strides = [1, 1]} : vector<112x224xbf16> to vector<8x224xbf16>
    %c6 = arith.constant 6 : index
    %c0_116 = arith.constant 0 : index
    %c0_117 = arith.constant 0 : index
    %162 = vector.load %arg9[%c6, %c0_116, %c0_117] : memref<7x8x1536xbf16, #tpu.memory_space<vmem>>, vector<1x8x224xbf16>
    %163 = vector.shape_cast %162 : vector<1x8x224xbf16> to vector<8x224xbf16>
    %164 = vector.shape_cast %161 : vector<8x224xbf16> to vector<1x8x224xbf16>
    tpu.vector_store %arg9[%c6, %c0_116, %c0_117], %164 {strides = array<i32>} : memref<7x8x1536xbf16, #tpu.memory_space<vmem>>, vector<1x8x224xbf16>,
    %165 = vector.extract_strided_slice %22 {offsets = [88, 0], sizes = [8, 224], strides = [1, 1]} : vector<112x224xbf16> to vector<8x224xbf16>
    %c6_118 = arith.constant 6 : index
    %c0_119 = arith.constant 0 : index
    %c256_120 = arith.constant 256 : index
    %166 = vector.load %arg9[%c6_118, %c0_119, %c256_120] : memref<7x8x1536xbf16, #tpu.memory_space<vmem>>, vector<1x8x224xbf16>
    %167 = vector.shape_cast %166 : vector<1x8x224xbf16> to vector<8x224xbf16>
    %168 = vector.shape_cast %165 : vector<8x224xbf16> to vector<1x8x224xbf16>
    tpu.vector_store %arg9[%c6_118, %c0_119, %c256_120], %168 {strides = array<i32>} : memref<7x8x1536xbf16, #tpu.memory_space<vmem>>, vector<1x8x224xbf16>,
    %169 = vector.extract_strided_slice %22 {offsets = [96, 0], sizes = [8, 224], strides = [1, 1]} : vector<112x224xbf16> to vector<8x224xbf16>
    %c6_121 = arith.constant 6 : index
    %c0_122 = arith.constant 0 : index
    %c512_123 = arith.constant 512 : index
    %170 = vector.load %arg9[%c6_121, %c0_122, %c512_123] : memref<7x8x1536xbf16, #tpu.memory_space<vmem>>, vector<1x8x224xbf16>
    %171 = vector.shape_cast %170 : vector<1x8x224xbf16> to vector<8x224xbf16>
    %172 = vector.shape_cast %169 : vector<8x224xbf16> to vector<1x8x224xbf16>
    tpu.vector_store %arg9[%c6_121, %c0_122, %c512_123], %172 {strides = array<i32>} : memref<7x8x1536xbf16, #tpu.memory_space<vmem>>, vector<1x8x224xbf16>,
    %173 = vector.extract_strided_slice %22 {offsets = [104, 0], sizes = [8, 224], strides = [1, 1]} : vector<112x224xbf16> to vector<8x224xbf16>
    %c6_124 = arith.constant 6 : index
    %c0_125 = arith.constant 0 : index
    %c768_126 = arith.constant 768 : index
    %174 = vector.load %arg9[%c6_124, %c0_125, %c768_126] : memref<7x8x1536xbf16, #tpu.memory_space<vmem>>, vector<1x8x224xbf16>
    %175 = vector.shape_cast %174 : vector<1x8x224xbf16> to vector<8x224xbf16>
    %176 = vector.shape_cast %173 : vector<8x224xbf16> to vector<1x8x224xbf16>
    tpu.vector_store %arg9[%c6_124, %c0_125, %c768_126], %176 {strides = array<i32>} : memref<7x8x1536xbf16, #tpu.memory_space<vmem>>, vector<1x8x224xbf16>,
    %c0_127 = arith.constant 0 : index
    %c0_128 = arith.constant 0 : index
    %c0_129 = arith.constant 0 : index
    %177 = vector.load %arg9[%c0_127, %c0_128, %c0_129] : memref<7x8x1536xbf16, #tpu.memory_space<vmem>>, vector<7x8x1536xbf16>
    %178 = vector.shape_cast %177 : vector<7x8x1536xbf16> to vector<56x1536xbf16>
    %c0_130 = arith.constant 0 : index
    %c0_131 = arith.constant 0 : index
    %c0_132 = arith.constant 0 : index
    %179 = vector.load %arg4[%c0_130, %c0_131, %c0_132] : memref<4x1536x224xbf16, #tpu.memory_space<vmem>>, vector<1x1536x224xbf16>
    %180 = vector.shape_cast %179 : vector<1x1536x224xbf16> to vector<1536x224xbf16>
    %cst_133 = arith.constant dense<0.000000e+00> : vector<56x224xf32>
    %181 = tpu.matmul %178, %180, %cst_133 {dimension_numbers = #tpu.dot_dimension_numbers<[1], [0], [0], [1], [0, 0, 1, 1], [], []>} : vector<56x1536xbf16>, vector<1536x224xbf16>, vector<56x224xf32> -> vector<56x224xf32>
    %c1_134 = arith.constant 1 : index
    %c0_135 = arith.constant 0 : index
    %c0_136 = arith.constant 0 : index
    %182 = vector.load %arg4[%c1_134, %c0_135, %c0_136] : memref<4x1536x224xbf16, #tpu.memory_space<vmem>>, vector<1x1536x224xbf16>
    %183 = vector.shape_cast %182 : vector<1x1536x224xbf16> to vector<1536x224xbf16>
    %cst_137 = arith.constant dense<0.000000e+00> : vector<56x224xf32>
    %184 = tpu.matmul %178, %183, %cst_137 {dimension_numbers = #tpu.dot_dimension_numbers<[1], [0], [0], [1], [0, 0, 1, 1], [], []>} : vector<56x1536xbf16>, vector<1536x224xbf16>, vector<56x224xf32> -> vector<56x224xf32>
    %185 = arith.maximumf %181, %184 : vector<56x224xf32>
    %c2_138 = arith.constant 2 : index
    %c0_139 = arith.constant 0 : index
    %c0_140 = arith.constant 0 : index
    %186 = vector.load %arg4[%c2_138, %c0_139, %c0_140] : memref<4x1536x224xbf16, #tpu.memory_space<vmem>>, vector<1x1536x224xbf16>
    %187 = vector.shape_cast %186 : vector<1x1536x224xbf16> to vector<1536x224xbf16>
    %cst_141 = arith.constant dense<0.000000e+00> : vector<56x224xf32>
    %188 = tpu.matmul %178, %187, %cst_141 {dimension_numbers = #tpu.dot_dimension_numbers<[1], [0], [0], [1], [0, 0, 1, 1], [], []>} : vector<56x1536xbf16>, vector<1536x224xbf16>, vector<56x224xf32> -> vector<56x224xf32>
    %189 = arith.maximumf %185, %188 : vector<56x224xf32>
    %c3_142 = arith.constant 3 : index
    %c0_143 = arith.constant 0 : index
    %c0_144 = arith.constant 0 : index
    %190 = vector.load %arg4[%c3_142, %c0_143, %c0_144] : memref<4x1536x224xbf16, #tpu.memory_space<vmem>>, vector<1x1536x224xbf16>
    %191 = vector.shape_cast %190 : vector<1x1536x224xbf16> to vector<1536x224xbf16>
    %cst_145 = arith.constant dense<0.000000e+00> : vector<56x224xf32>
    %192 = tpu.matmul %178, %191, %cst_145 {dimension_numbers = #tpu.dot_dimension_numbers<[1], [0], [0], [1], [0, 0, 1, 1], [], []>} : vector<56x1536xbf16>, vector<1536x224xbf16>, vector<56x224xf32> -> vector<56x224xf32>
    %193 = arith.maximumf %189, %192 : vector<56x224xf32>
    %c0_146 = arith.constant 0 : index
    %c0_147 = arith.constant 0 : index
    %194 = vector.load %arg5[%c0_146, %c0_147] : memref<1x224xf32, #tpu.memory_space<vmem>>, vector<1x224xf32>
    %195 = vector.broadcast %194 : vector<1x224xf32> to vector<56x224xf32>
    %196 = arith.addf %193, %195 : vector<56x224xf32>
    %cst_148 = arith.constant 0.000000e+00 : f32
    %197 = vector.broadcast %cst_148 : f32 to vector<56x224xf32>
    %198 = arith.maximumf %196, %197 : vector<56x224xf32>
    %199 = arith.truncf %198 : vector<56x224xf32> to vector<56x224xbf16>
    %cst_149 = arith.constant 0.000000e+00 : f32
    %200 = vector.broadcast %cst_149 : f32 to vector<8x128xf32>
    %201 = vector.extract_strided_slice %199 {offsets = [0, 0], sizes = [8, 224], strides = [1, 1]} : vector<56x224xbf16> to vector<8x224xbf16>
    %c0_150 = arith.constant 0 : index
    %c0_151 = arith.constant 0 : index
    %c0_152 = arith.constant 0 : index
    %202 = vector.load %arg6[%c0_150, %c0_151, %c0_152] : memref<7x224x128xbf16, #tpu.memory_space<vmem>>, vector<1x224x128xbf16>
    %203 = vector.shape_cast %202 : vector<1x224x128xbf16> to vector<224x128xbf16>
    %cst_153 = arith.constant dense<0.000000e+00> : vector<8x128xf32>
    %204 = tpu.matmul %201, %203, %cst_153 {dimension_numbers = #tpu.dot_dimension_numbers<[1], [0], [0], [1], [0, 0, 1, 1], [], []>} : vector<8x224xbf16>, vector<224x128xbf16>, vector<8x128xf32> -> vector<8x128xf32>
    %205 = arith.addf %200, %204 : vector<8x128xf32>
    %206 = vector.extract_strided_slice %199 {offsets = [8, 0], sizes = [8, 224], strides = [1, 1]} : vector<56x224xbf16> to vector<8x224xbf16>
    %c1_154 = arith.constant 1 : index
    %c0_155 = arith.constant 0 : index
    %c0_156 = arith.constant 0 : index
    %207 = vector.load %arg6[%c1_154, %c0_155, %c0_156] : memref<7x224x128xbf16, #tpu.memory_space<vmem>>, vector<1x224x128xbf16>
    %208 = vector.shape_cast %207 : vector<1x224x128xbf16> to vector<224x128xbf16>
    %cst_157 = arith.constant dense<0.000000e+00> : vector<8x128xf32>
    %209 = tpu.matmul %206, %208, %cst_157 {dimension_numbers = #tpu.dot_dimension_numbers<[1], [0], [0], [1], [0, 0, 1, 1], [], []>} : vector<8x224xbf16>, vector<224x128xbf16>, vector<8x128xf32> -> vector<8x128xf32>
    %210 = arith.addf %205, %209 : vector<8x128xf32>
    %211 = vector.extract_strided_slice %199 {offsets = [16, 0], sizes = [8, 224], strides = [1, 1]} : vector<56x224xbf16> to vector<8x224xbf16>
    %c2_158 = arith.constant 2 : index
    %c0_159 = arith.constant 0 : index
    %c0_160 = arith.constant 0 : index
    %212 = vector.load %arg6[%c2_158, %c0_159, %c0_160] : memref<7x224x128xbf16, #tpu.memory_space<vmem>>, vector<1x224x128xbf16>
    %213 = vector.shape_cast %212 : vector<1x224x128xbf16> to vector<224x128xbf16>
    %cst_161 = arith.constant dense<0.000000e+00> : vector<8x128xf32>
    %214 = tpu.matmul %211, %213, %cst_161 {dimension_numbers = #tpu.dot_dimension_numbers<[1], [0], [0], [1], [0, 0, 1, 1], [], []>} : vector<8x224xbf16>, vector<224x128xbf16>, vector<8x128xf32> -> vector<8x128xf32>
    %215 = arith.addf %210, %214 : vector<8x128xf32>
    %216 = vector.extract_strided_slice %199 {offsets = [24, 0], sizes = [8, 224], strides = [1, 1]} : vector<56x224xbf16> to vector<8x224xbf16>
    %c3_162 = arith.constant 3 : index
    %c0_163 = arith.constant 0 : index
    %c0_164 = arith.constant 0 : index
    %217 = vector.load %arg6[%c3_162, %c0_163, %c0_164] : memref<7x224x128xbf16, #tpu.memory_space<vmem>>, vector<1x224x128xbf16>
    %218 = vector.shape_cast %217 : vector<1x224x128xbf16> to vector<224x128xbf16>
    %cst_165 = arith.constant dense<0.000000e+00> : vector<8x128xf32>
    %219 = tpu.matmul %216, %218, %cst_165 {dimension_numbers = #tpu.dot_dimension_numbers<[1], [0], [0], [1], [0, 0, 1, 1], [], []>} : vector<8x224xbf16>, vector<224x128xbf16>, vector<8x128xf32> -> vector<8x128xf32>
    %220 = arith.addf %215, %219 : vector<8x128xf32>
    %221 = vector.extract_strided_slice %199 {offsets = [32, 0], sizes = [8, 224], strides = [1, 1]} : vector<56x224xbf16> to vector<8x224xbf16>
    %c4_166 = arith.constant 4 : index
    %c0_167 = arith.constant 0 : index
    %c0_168 = arith.constant 0 : index
    %222 = vector.load %arg6[%c4_166, %c0_167, %c0_168] : memref<7x224x128xbf16, #tpu.memory_space<vmem>>, vector<1x224x128xbf16>
    %223 = vector.shape_cast %222 : vector<1x224x128xbf16> to vector<224x128xbf16>
    %cst_169 = arith.constant dense<0.000000e+00> : vector<8x128xf32>
    %224 = tpu.matmul %221, %223, %cst_169 {dimension_numbers = #tpu.dot_dimension_numbers<[1], [0], [0], [1], [0, 0, 1, 1], [], []>} : vector<8x224xbf16>, vector<224x128xbf16>, vector<8x128xf32> -> vector<8x128xf32>
    %225 = arith.addf %220, %224 : vector<8x128xf32>
    %226 = vector.extract_strided_slice %199 {offsets = [40, 0], sizes = [8, 224], strides = [1, 1]} : vector<56x224xbf16> to vector<8x224xbf16>
    %c5_170 = arith.constant 5 : index
    %c0_171 = arith.constant 0 : index
    %c0_172 = arith.constant 0 : index
    %227 = vector.load %arg6[%c5_170, %c0_171, %c0_172] : memref<7x224x128xbf16, #tpu.memory_space<vmem>>, vector<1x224x128xbf16>
    %228 = vector.shape_cast %227 : vector<1x224x128xbf16> to vector<224x128xbf16>
    %cst_173 = arith.constant dense<0.000000e+00> : vector<8x128xf32>
    %229 = tpu.matmul %226, %228, %cst_173 {dimension_numbers = #tpu.dot_dimension_numbers<[1], [0], [0], [1], [0, 0, 1, 1], [], []>} : vector<8x224xbf16>, vector<224x128xbf16>, vector<8x128xf32> -> vector<8x128xf32>
    %230 = arith.addf %225, %229 : vector<8x128xf32>
    %231 = vector.extract_strided_slice %199 {offsets = [48, 0], sizes = [8, 224], strides = [1, 1]} : vector<56x224xbf16> to vector<8x224xbf16>
    %c6_174 = arith.constant 6 : index
    %c0_175 = arith.constant 0 : index
    %c0_176 = arith.constant 0 : index
    %232 = vector.load %arg6[%c6_174, %c0_175, %c0_176] : memref<7x224x128xbf16, #tpu.memory_space<vmem>>, vector<1x224x128xbf16>
    %233 = vector.shape_cast %232 : vector<1x224x128xbf16> to vector<224x128xbf16>
    %cst_177 = arith.constant dense<0.000000e+00> : vector<8x128xf32>
    %234 = tpu.matmul %231, %233, %cst_177 {dimension_numbers = #tpu.dot_dimension_numbers<[1], [0], [0], [1], [0, 0, 1, 1], [], []>} : vector<8x224xbf16>, vector<224x128xbf16>, vector<8x128xf32> -> vector<8x128xf32>
    %235 = arith.addf %230, %234 : vector<8x128xf32>
    %c0_178 = arith.constant 0 : index
    %c0_179 = arith.constant 0 : index
    %236 = vector.load %arg7[%c0_178, %c0_179] : memref<1x128xf32, #tpu.memory_space<vmem>>, vector<1x128xf32>
    %237 = vector.broadcast %236 : vector<1x128xf32> to vector<8x128xf32>
    %238 = arith.addf %235, %237 : vector<8x128xf32>
    %c0_180 = arith.constant 0 : index
    %c0_181 = arith.constant 0 : index
    %239 = vector.load %arg8[%c0_180, %c0_181] : memref<8x128xf32, #tpu.memory_space<vmem>>, vector<8x128xf32>
    tpu.vector_store %arg8[%c0_180, %c0_181], %238 {strides = array<i32>} : memref<8x128xf32, #tpu.memory_space<vmem>>, vector<8x128xf32>,
    return
  }
  func.func @transform_0(%arg0: i32) -> (i32, i32, i32) {
    %c0_i32 = arith.constant 0 : i32
    %c0_i32_0 = arith.constant 0 : i32
    %c0_i32_1 = arith.constant 0 : i32
    return %c0_i32, %arg0, %c0_i32_0 : i32, i32, i32
  }
  func.func @transform_1(%arg0: i32) -> (i32, i32, i32) {
    %c0_i32 = arith.constant 0 : i32
    %c0_i32_0 = arith.constant 0 : i32
    %c0_i32_1 = arith.constant 0 : i32
    %c0_i32_2 = arith.constant 0 : i32
    return %c0_i32, %c0_i32_0, %c0_i32_1 : i32, i32, i32
  }
  func.func @transform_2(%arg0: i32) -> (i32, i32) {
    %c0_i32 = arith.constant 0 : i32
    %c0_i32_0 = arith.constant 0 : i32
    %c0_i32_1 = arith.constant 0 : i32
    return %c0_i32, %c0_i32_0 : i32, i32
  }
  func.func @transform_3(%arg0: i32) -> (i32, i32, i32) {
    %c0_i32 = arith.constant 0 : i32
    %c0_i32_0 = arith.constant 0 : i32
    %c0_i32_1 = arith.constant 0 : i32
    %c0_i32_2 = arith.constant 0 : i32
    return %c0_i32, %c0_i32_0, %c0_i32_1 : i32, i32, i32
  }
  func.func @transform_4(%arg0: i32) -> (i32, i32) {
    %c0_i32 = arith.constant 0 : i32
    %c0_i32_0 = arith.constant 0 : i32
    %c0_i32_1 = arith.constant 0 : i32
    return %c0_i32, %c0_i32_0 : i32, i32
  }
  func.func @transform_5(%arg0: i32) -> (i32, i32, i32) {
    %c0_i32 = arith.constant 0 : i32
    %c0_i32_0 = arith.constant 0 : i32
    %c0_i32_1 = arith.constant 0 : i32
    %c0_i32_2 = arith.constant 0 : i32
    return %c0_i32, %c0_i32_0, %c0_i32_1 : i32, i32, i32
  }
  func.func @transform_6(%arg0: i32) -> (i32, i32) {
    %c0_i32 = arith.constant 0 : i32
    %c0_i32_0 = arith.constant 0 : i32
    %c0_i32_1 = arith.constant 0 : i32
    return %c0_i32, %c0_i32_0 : i32, i32
  }
  func.func @transform_7(%arg0: i32) -> (i32, i32) {
    %c0_i32 = arith.constant 0 : i32
    %c0_i32_0 = arith.constant 0 : i32
    return %arg0, %c0_i32 : i32, i32
  }
}

</mosaic_0001>

<bundles_post_ra>
// kernel: cnn_forward.1
= control target key start
LH: loop header
LB: loop body
LE: loop exit
PB: predicated region body
PF: predicated region fallthrough
CT: control target
= control target key end

     0   :  { %vm248_vm0 = vcmask 523264   ;;  %vm1331_vm1 = vcmask 1043456   ;;  %vm1332_vm2 = vcmask 785412   ;;  %vm8257_vm4 = vcmask 785408   ;;  %s16707_s1 = inlined_call_operand.vmem [shape: bf16[4,192,224], index: 1, kind: input, shape index: {}]   ;;  %s16708_s0 = inlined_call_operand.vmem [shape: bf16[14,8,192], index: 0, kind: input, shape index: {}]   ;;  %s16709_s3 = inlined_call_operand.vmem [shape: bf16[4,1536,224], index: 3, kind: input, shape index: {}]   ;;  %s16710_s2 = inlined_call_operand.vmem [shape: f32[1,224], index: 2, kind: input, shape index: {}]   ;;  %s16711_s5 = inlined_call_operand.vmem [shape: bf16[7,224,128], index: 5, kind: input, shape index: {}]   ;;  %s16712_s4 = inlined_call_operand.vmem [shape: f32[1,224], index: 4, kind: input, shape index: {}]   ;;  %s16713_s6 = inlined_call_operand.vmem [shape: f32[1,128], index: 6, kind: input, shape index: {}]   ;;  %s16714_s7 = inlined_call_operand.vmem [shape: f32[8,128], index: 7, kind: output, shape index: {}]  }
   0x1   :  { %v11485_v0 = vld [vmem:[%s16707_s1 + $0x4] ss:$8 sps:$4 sm:$0xff]   ;;  %v11487_v1 = vld [vmem:[%s16707_s1] ss:$8 sps:$4 sm:$0xff]   ;;  %v11488_v2 = vld [vmem:[%s16707_s1 + $0x14] ss:$8 sps:$4 sm:$0xff]  }
   0x2   :  { %11140 = vmatprep.subr.bf16.mxu1 %v11485_v0  ;;  %270 = vmatprep.subr.bf16.mxu0 %v11485_v0  ;;  %v11490_v3 = vld [vmem:[%s16707_s1 + $0x10] ss:$8 sps:$4 sm:$0xff]   ;;  %v11491_v4 = vld [vmem:[%s16707_s1 + $0x24] ss:$8 sps:$4 sm:$0xff]   ;;  %v11493_v5 = vld [vmem:[%s16707_s1 + $0x20] ss:$8 sps:$4 sm:$0xff]  }
   0x3   :  { %11152 = vmatpush1.bf16.msra.mxu1 %v11487_v1  ;;  %271 = vmatpush1.bf16.msra.mxu0 %v11487_v1  ;;  %v11494_v6 = vld [vmem:[%s16707_s1 + $0x34] ss:$8 sps:$4 sm:$0xff]   ;;  %v11496_v7 = vld [vmem:[%s16707_s1 + $0x30] ss:$8 sps:$4 sm:$0xff]   ;;  %v11497_v8 = vld [vmem:[%s16707_s1 + $0x44] ss:$8 sps:$4 sm:$0xff]  }
   0x4   :  { %11141 = vmatprep.subr.bf16.mxu1 %v11488_v2  ;;  %272 = vmatprep.subr.bf16.mxu0 %v11488_v2  ;;  %v11499_v9 = vld [vmem:[%s16707_s1 + $0x40] ss:$8 sps:$4 sm:$0xff]   ;;  %v11500_v10 = vld [vmem:[%s16707_s1 + $0x54] ss:$8 sps:$4 sm:$0xff]   ;;  %v13068_v11 = vld [vmem:[%s16708_s0 + $0x64] ss:$8 sps:$4 sm:$0xff]  }
   0x5   :  { %9280 = vmatprep.mubr.msk.bf16.mxu1 %vm248_vm0, %v13068_v11  ;;  %v11502_v12 = vld [vmem:[%s16707_s1 + $0x50] ss:$8 sps:$4 sm:$0xff]   ;;  %v13078_v13 = vld [vmem:[%s16708_s0 + $0x4] ss:$8 sps:$4 sm:$0xff]   ;;  %v11505_v15 = vld [vmem:[%s16707_s1 + $0x60] ss:$8 sps:$4 sm:$0xff]  }
   0x6   :  { %v11503_v14 = vld [vmem:[%s16707_s1 + $0x64] ss:$8 sps:$4 sm:$0xff]   ;;  %9274 = vmatprep.mubr.msk.bf16.mxu0 %vm248_vm0, %v13078_v13  ;;  %v11506_v16 = vld [vmem:[%s16707_s1 + $0x74] ss:$8 sps:$4 sm:$0xff]   ;;  %v11508_v17 = vld [vmem:[%s16707_s1 + $0x70] ss:$8 sps:$4 sm:$0xff]  }
   0x7   :  { %11153 = vmatpush1.bf16.msra.mxu1 %v11490_v3  ;;  %273 = vmatpush1.bf16.msra.mxu0 %v11490_v3  ;;  %v11509_v18 = vld [vmem:[%s16707_s1 + $0x84] ss:$8 sps:$4 sm:$0xff]   ;;  %v11511_v19 = vld [vmem:[%s16707_s1 + $0x80] ss:$8 sps:$4 sm:$0xff]   ;;  %v11512_v20 = vld [vmem:[%s16707_s1 + $0x94] ss:$8 sps:$4 sm:$0xff]  }
   0x8   :  { %11142 = vmatprep.subr.bf16.mxu1 %v11491_v4  ;;  %274 = vmatprep.subr.bf16.mxu0 %v11491_v4  ;;  %v11514_v21 = vld [vmem:[%s16707_s1 + $0x90] ss:$8 sps:$4 sm:$0xff]   ;;  %v11515_v22 = vld [vmem:[%s16707_s1 + $0xa4] ss:$8 sps:$4 sm:$0xff]   ;;  %v11517_v23 = vld [vmem:[%s16707_s1 + $0xa0] ss:$8 sps:$4 sm:$0xff]  }
   0x9   :  { %v11518_v24 = vld [vmem:[%s16707_s1 + $0xb4] ss:$8 sps:$4 sm:$0xff]   ;;  %v11520_v25 = vld [vmem:[%s16707_s1 + $0xb0] ss:$8 sps:$4 sm:$0xff]   ;;  %v11526_v26 = vld [vmem:[%s16707_s1 + $0xc4] ss:$8 sps:$4 sm:$0xff]  }
   0xa   :  { %v11532_v27 = vld [vmem:[%s16707_s1 + $0x184] ss:$8 sps:$4 sm:$0xff]   ;;  %v13127_v28 = vld [vmem:[%s16708_s0 + $0x60] ss:$8 sps:$4 sm:$0xff]   ;;  %v11535_v32 = vld [vmem:[%s16707_s1 + $0xd4] ss:$8 sps:$4 sm:$0xff]  }
   0xb   :  { %11154 = vmatpush1.bf16.msra.mxu1 %v11493_v5  ;;  %275 = vmatpush1.bf16.msra.mxu0 %v11493_v5  ;;  %v11524_v29 = vld [vmem:[%s16707_s1 + $0xc0] ss:$8 sps:$4 sm:$0xff]   ;;  %v11538_v33 = vld [vmem:[%s16707_s1 + $0x194] ss:$8 sps:$4 sm:$0xff]   ;;  %v11533_v35 = vld [vmem:[%s16707_s1 + $0xd0] ss:$8 sps:$4 sm:$0xff]  }
   0xc   :  { %11143 = vmatprep.subr.bf16.mxu1 %v11494_v6  ;;  %276 = vmatprep.subr.bf16.mxu0 %v11494_v6  ;;  %v13135_v30 = vld [vmem:[%s16708_s0] ss:$8 sps:$4 sm:$0xff]   ;;  %v13149_v34 = vld [vmem:[%s16708_s0 + $0x14] ss:$8 sps:$4 sm:$0xff]   ;;  %v11536_v36 = vld [vmem:[%s16707_s1 + $0x190] ss:$8 sps:$4 sm:$0xff]  }
   0xd   :  { %v11530_v31 = vld [vmem:[%s16707_s1 + $0x180] ss:$8 sps:$4 sm:$0xff]   ;;  %v11541_v37 = vld [vmem:[%s16707_s1 + $0xe4] ss:$8 sps:$4 sm:$0xff]   ;;  %v13175_v40 = vld [vmem:[%s16708_s0 + $0x10] ss:$8 sps:$4 sm:$0xff]  }
   0xe   :  { %v11547_v38 = vld [vmem:[%s16707_s1 + $0x1a4] ss:$8 sps:$4 sm:$0xff]   ;;  %v11539_v39 = vld [vmem:[%s16707_s1 + $0xe0] ss:$8 sps:$4 sm:$0xff]   ;;  %v11550_v42 = vld [vmem:[%s16707_s1 + $0xf4] ss:$8 sps:$4 sm:$0xff]  }
   0xf   :  { %11155 = vmatpush1.bf16.msra.mxu1 %v11496_v7  ;;  %277 = vmatpush1.bf16.msra.mxu0 %v11496_v7  ;;  %v11545_v41 = vld [vmem:[%s16707_s1 + $0x1a0] ss:$8 sps:$4 sm:$0xff]   ;;  %v11553_v43 = vld [vmem:[%s16707_s1 + $0x1b4] ss:$8 sps:$4 sm:$0xff]   ;;  %v13189_v44 = vld [vmem:[%s16708_s0 + $0x24] ss:$8 sps:$4 sm:$0xff]  }
  0x10   :  { %11144 = vmatprep.subr.bf16.mxu1 %v11497_v8  ;;  %278 = vmatprep.subr.bf16.mxu0 %v11497_v8  ;;  %v11548_v45 = vld [vmem:[%s16707_s1 + $0xf0] ss:$8 sps:$4 sm:$0xff]   ;;  %v11556_v47 = vld [vmem:[%s16707_s1 + $0x104] ss:$8 sps:$4 sm:$0xff]   ;;  %v11554_v49 = vld [vmem:[%s16707_s1 + $0x100] ss:$8 sps:$4 sm:$0xff]  }
  0x11   :  { %v11551_v46 = vld [vmem:[%s16707_s1 + $0x1b0] ss:$8 sps:$4 sm:$0xff]   ;;  %v11562_v48 = vld [vmem:[%s16707_s1 + $0x1c4] ss:$8 sps:$4 sm:$0xff]   ;;  %v13212_v50 = vld [vmem:[%s16708_s0 + $0x20] ss:$8 sps:$4 sm:$0xff]  }
  0x12   :  { %v11560_v51 = vld [vmem:[%s16707_s1 + $0x1c0] ss:$8 sps:$4 sm:$0xff]   ;;  %v11565_v52 = vld [vmem:[%s16707_s1 + $0x114] ss:$8 sps:$4 sm:$0xff]   ;;  %v11563_v55 = vld [vmem:[%s16707_s1 + $0x110] ss:$8 sps:$4 sm:$0xff]  }
  0x13   :  { %11156 = vmatpush1.bf16.msra.mxu1 %v11499_v9  ;;  %279 = vmatpush1.bf16.msra.mxu0 %v11499_v9  ;;  %v11568_v53 = vld [vmem:[%s16707_s1 + $0x1d4] ss:$8 sps:$4 sm:$0xff]   ;;  %v11566_v56 = vld [vmem:[%s16707_s1 + $0x1d0] ss:$8 sps:$4 sm:$0xff]   ;;  %v11571_v57 = vld [vmem:[%s16707_s1 + $0x124] ss:$8 sps:$4 sm:$0xff]  }
  0x14   :  { %11145 = vmatprep.subr.bf16.mxu1 %v11500_v10  ;;  %280 = vmatprep.subr.bf16.mxu0 %v11500_v10  ;;  %v13226_v54 = vld [vmem:[%s16708_s0 + $0x34] ss:$8 sps:$4 sm:$0xff]   ;;  %v11577_v58 = vld [vmem:[%s16707_s1 + $0x1e4] ss:$8 sps:$4 sm:$0xff]   ;;  %v11569_v59 = vld [vmem:[%s16707_s1 + $0x120] ss:$8 sps:$4 sm:$0xff]  }
  0x15   :  { %v13249_v60 = vld [vmem:[%s16708_s0 + $0x30] ss:$8 sps:$4 sm:$0xff]   ;;  %v11575_v61 = vld [vmem:[%s16707_s1 + $0x1e0] ss:$8 sps:$4 sm:$0xff]   ;;  %v11580_v62 = vld [vmem:[%s16707_s1 + $0x134] ss:$8 sps:$4 sm:$0xff]  }
  0x16   :  { %v11583_v63 = vld [vmem:[%s16707_s1 + $0x1f4] ss:$8 sps:$4 sm:$0xff]   ;;  %v13263_v0 = vld [vmem:[%s16708_s0 + $0x44] ss:$8 sps:$4 sm:$0xff]   ;;  %v11578_v1 = vld [vmem:[%s16707_s1 + $0x130] ss:$8 sps:$4 sm:$0xff]  }
  0x17   :  { %11157 = vmatpush1.bf16.msra.mxu1 %v11502_v12  ;;  %281 = vmatpush1.bf16.msra.mxu0 %v11502_v12  ;;  %v11581_v2 = vld [vmem:[%s16707_s1 + $0x1f0] ss:$8 sps:$4 sm:$0xff]   ;;  %v11586_v3 = vld [vmem:[%s16707_s1 + $0x144] ss:$8 sps:$4 sm:$0xff]   ;;  %v13283_v5 = vld [vmem:[%s16708_s0 + $0x40] ss:$8 sps:$4 sm:$0xff]  }
  0x18   :  { %11146 = vmatprep.subr.bf16.mxu1 %v11503_v14  ;;  %282 = vmatprep.subr.bf16.mxu0 %v11503_v14  ;;  %v11592_v4 = vld [vmem:[%s16707_s1 + $0x204] ss:$8 sps:$4 sm:$0xff]   ;;  %v11584_v6 = vld [vmem:[%s16707_s1 + $0x140] ss:$8 sps:$4 sm:$0xff]   ;;  %v11595_v8 = vld [vmem:[%s16707_s1 + $0x154] ss:$8 sps:$4 sm:$0xff]  }
  0x19   :  { %v11590_v7 = vld [vmem:[%s16707_s1 + $0x200] ss:$8 sps:$4 sm:$0xff]   ;;  %v11598_v9 = vld [vmem:[%s16707_s1 + $0x214] ss:$8 sps:$4 sm:$0xff]   ;;  %v11593_v12 = vld [vmem:[%s16707_s1 + $0x150] ss:$8 sps:$4 sm:$0xff]  }
  0x1a   :  { %v13300_v10 = vld [vmem:[%s16708_s0 + $0x54] ss:$8 sps:$4 sm:$0xff]   ;;  %v11596_v14 = vld [vmem:[%s16707_s1 + $0x210] ss:$8 sps:$4 sm:$0xff]   ;;  %vm13799_vm3 = vmor %vm1332_vm2, %vm1331_vm1 }
  0x1b   :  { %11158 = vmatpush1.bf16.msra.mxu1 %v11505_v15  ;;  %283 = vmatpush1.bf16.msra.mxu0 %v11505_v15  ;;  %v11601_v15 = vld [vmem:[%s16707_s1 + $0x164] ss:$8 sps:$4 sm:$0xff]  }
  0x1c   :  { %11147 = vmatprep.subr.bf16.mxu1 %v11506_v16  ;;  %284 = vmatprep.subr.bf16.mxu0 %v11506_v16  ;;  %v11607_v16 = vld [vmem:[%s16707_s1 + $0x224] ss:$8 sps:$4 sm:$0xff]  }
  0x1f   :  { %11159 = vmatpush1.bf16.msra.mxu1 %v11508_v17  ;;  %285 = vmatpush1.bf16.msra.mxu0 %v11508_v17  ;;  %v13320_v17 = vld [vmem:[%s16708_s0 + $0x50] ss:$8 sps:$4 sm:$0xff]  }
  0x20   :  { %11148 = vmatprep.subr.bf16.mxu1 %v11509_v18  ;;  %286 = vmatprep.subr.bf16.mxu0 %v11509_v18  ;;  %v11599_v18 = vld [vmem:[%s16707_s1 + $0x160] ss:$8 sps:$4 sm:$0xff]  }
  0x23   :  { %11160 = vmatpush1.bf16.msra.mxu1 %v11511_v19  ;;  %287 = vmatpush1.bf16.msra.mxu0 %v11511_v19  ;;  %v11605_v19 = vld [vmem:[%s16707_s1 + $0x220] ss:$8 sps:$4 sm:$0xff]  }
  0x24   :  { %11149 = vmatprep.subr.bf16.mxu1 %v11512_v20  ;;  %288 = vmatprep.subr.bf16.mxu0 %v11512_v20  ;;  %v11610_v20 = vld [vmem:[%s16707_s1 + $0x174] ss:$8 sps:$4 sm:$0xff]  }
  0x27   :  { %11161 = vmatpush1.bf16.msra.mxu1 %v11514_v21  ;;  %289 = vmatpush1.bf16.msra.mxu0 %v11514_v21  ;;  %v11613_v21 = vld [vmem:[%s16707_s1 + $0x234] ss:$8 sps:$4 sm:$0xff]  }
  0x28   :  { %11150 = vmatprep.subr.bf16.mxu1 %v11515_v22  ;;  %290 = vmatprep.subr.bf16.mxu0 %v11515_v22  ;;  %v11608_v22 = vld [vmem:[%s16707_s1 + $0x170] ss:$8 sps:$4 sm:$0xff]  }
  0x2b   :  { %11162 = vmatpush1.bf16.msra.mxu1 %v11517_v23  ;;  %291 = vmatpush1.bf16.msra.mxu0 %v11517_v23  ;;  %v11611_v23 = vld [vmem:[%s16707_s1 + $0x230] ss:$8 sps:$4 sm:$0xff]  }
  0x2c   :  { %11151 = vmatprep.subr.bf16.mxu1 %v11518_v24  ;;  %292 = vmatprep.subr.bf16.mxu0 %v11518_v24  ;;  %v11616_v24 = vld [vmem:[%s16707_s1 + $0x244] ss:$8 sps:$4 sm:$0xff]  }
  0x2f   :  { %11163 = vmatpush1.bf16.msra.mxu1 %v11520_v25  ;;  %293 = vmatpush1.bf16.msra.mxu0 %v11520_v25  ;;  %v11614_v25 = vld [vmem:[%s16707_s1 + $0x240] ss:$8 sps:$4 sm:$0xff]  }
  0x30   :  { %518 = vmatprep.subr.bf16.mxu1 %v11526_v26  ;;  %794 = vmatprep.subr.bf16.mxu0 %v11532_v27  ;;  %v11619_v26 = vld [vmem:[%s16707_s1 + $0x254] ss:$8 sps:$4 sm:$0xff]   ;;  %v11617_v27 = vld [vmem:[%s16707_s1 + $0x250] ss:$8 sps:$4 sm:$0xff]  }
  0x32   :  { %363 = vmatmul.mubr.bf16.vlgmr.msra.gmra.mrb[0].mxu1 %v13127_v28  ;;  %303 = vmatmul.mubr.bf16.vlgmr.msra.gmra.mrb[0].mxu0 %v13135_v30 }
  0x33   :  { %519 = vmatpush1.bf16.msra.mxu1 %v11524_v29  ;;  %795 = vmatpush1.bf16.msra.mxu0 %v11530_v31  ;;  %v11622_v29 = vld [vmem:[%s16707_s1 + $0x264] ss:$8 sps:$4 sm:$0xff]   ;;  %v11620_v31 = vld [vmem:[%s16707_s1 + $0x260] ss:$8 sps:$4 sm:$0xff]  }
  0x34   :  { %520 = vmatprep.subr.bf16.mxu1 %v11535_v32  ;;  %796 = vmatprep.subr.bf16.mxu0 %v11538_v33  ;;  %v11625_v32 = vld [vmem:[%s16707_s1 + $0x274] ss:$8 sps:$4 sm:$0xff]   ;;  %v11623_v33 = vld [vmem:[%s16707_s1 + $0x270] ss:$8 sps:$4 sm:$0xff]  }
  0x35   :  { %9275 = vmatprep.mubr.msk.bf16.mxu0 %vm248_vm0, %v13149_v34  ;;  %9329 = vmatprep.mubr.msk.bf16.mxu1 %vm248_vm0, %v13078_v13 }
  0x37   :  { %521 = vmatpush1.bf16.msra.mxu1 %v11533_v35  ;;  %797 = vmatpush1.bf16.msra.mxu0 %v11536_v36  ;;  %v11628_v35 = vld [vmem:[%s16707_s1 + $0x284] ss:$8 sps:$4 sm:$0xff]   ;;  %v11626_v36 = vld [vmem:[%s16707_s1 + $0x280] ss:$8 sps:$4 sm:$0xff]  }
  0x38   :  { %522 = vmatprep.subr.bf16.mxu1 %v11541_v37  ;;  %798 = vmatprep.subr.bf16.mxu0 %v11547_v38  ;;  %v11631_v37 = vld [vmem:[%s16707_s1 + $0x294] ss:$8 sps:$4 sm:$0xff]   ;;  %v11629_v38 = vld [vmem:[%s16707_s1 + $0x290] ss:$8 sps:$4 sm:$0xff]  }
  0x3a   :  { %313 = vmatmul.mubr.bf16.gmra.mrb[4].mxu0 %v13175_v40 }
  0x3b   :  { %523 = vmatpush1.bf16.msra.mxu1 %v11539_v39  ;;  %799 = vmatpush1.bf16.msra.mxu0 %v11545_v41  ;;  %v11634_v39 = vld [vmem:[%s16707_s1 + $0x2a4] ss:$8 sps:$4 sm:$0xff]   ;;  %v11632_v41 = vld [vmem:[%s16707_s1 + $0x2a0] ss:$8 sps:$4 sm:$0xff]  }
  0x3c   :  { %524 = vmatprep.subr.bf16.mxu1 %v11550_v42  ;;  %800 = vmatprep.subr.bf16.mxu0 %v11553_v43  ;;  %v11637_v42 = vld [vmem:[%s16707_s1 + $0x2b4] ss:$8 sps:$4 sm:$0xff]   ;;  %v11635_v43 = vld [vmem:[%s16707_s1 + $0x2b0] ss:$8 sps:$4 sm:$0xff]  }
  0x3d   :  { %9276 = vmatprep.mubr.msk.bf16.mxu0 %vm248_vm0, %v13189_v44 }
  0x3f   :  { %525 = vmatpush1.bf16.msra.mxu1 %v11548_v45  ;;  %801 = vmatpush1.bf16.msra.mxu0 %v11551_v46  ;;  %v11640_v45 = vld [vmem:[%s16707_s1 + $0x2c4] ss:$8 sps:$4 sm:$0xff]   ;;  %v11638_v46 = vld [vmem:[%s16707_s1 + $0x2c0] ss:$8 sps:$4 sm:$0xff]  }
  0x40   :  { %526 = vmatprep.subr.bf16.mxu1 %v11556_v47  ;;  %802 = vmatprep.subr.bf16.mxu0 %v11562_v48  ;;  %v11643_v47 = vld [vmem:[%s16707_s1 + $0x2d4] ss:$8 sps:$4 sm:$0xff]   ;;  %v11641_v48 = vld [vmem:[%s16707_s1 + $0x2d0] ss:$8 sps:$4 sm:$0xff]  }
  0x42   :  { %323 = vmatmul.mubr.bf16.gmra.mrb[8].mxu0 %v13212_v50 }
  0x43   :  { %527 = vmatpush1.bf16.msra.mxu1 %v11554_v49  ;;  %803 = vmatpush1.bf16.msra.mxu0 %v11560_v51  ;;  %v11646_v49 = vld [vmem:[%s16707_s1 + $0x2e4] ss:$8 sps:$4 sm:$0xff]   ;;  %v11644_v51 = vld [vmem:[%s16707_s1 + $0x2e0] ss:$8 sps:$4 sm:$0xff]  }
  0x44   :  { %528 = vmatprep.subr.bf16.mxu1 %v11565_v52  ;;  %804 = vmatprep.subr.bf16.mxu0 %v11568_v53  ;;  %v11649_v52 = vld [vmem:[%s16707_s1 + $0x2f4] ss:$8 sps:$4 sm:$0xff]   ;;  %v11647_v53 = vld [vmem:[%s16707_s1 + $0x2f0] ss:$8 sps:$4 sm:$0xff]  }
  0x45   :  { %9277 = vmatprep.mubr.msk.bf16.mxu0 %vm248_vm0, %v13226_v54 }
  0x47   :  { %529 = vmatpush1.bf16.msra.mxu1 %v11563_v55  ;;  %805 = vmatpush1.bf16.msra.mxu0 %v11566_v56  ;;  %v11659_v55 = vld [vmem:[%s16709_s3 + $0x610] ss:$8 sps:$4 sm:$0xff]   ;;  %v11667_v56 = vld [vmem:[%s16709_s3 + $0x624] ss:$8 sps:$4 sm:$0xff]  }
  0x48   :  { %530 = vmatprep.subr.bf16.mxu1 %v11571_v57  ;;  %806 = vmatprep.subr.bf16.mxu0 %v11577_v58  ;;  %v11662_v57 = vld [vmem:[%s16709_s3 + $0x20] ss:$8 sps:$4 sm:$0xff]  }
  0x49   :  { %v11665_v58 = vld [vmem:[%s16709_s3 + $0x620] ss:$8 sps:$4 sm:$0xff]  }
  0x4a   :  { %333 = vmatmul.mubr.bf16.gmra.mrb[12].mxu0 %v13249_v60 }
  0x4b   :  { %531 = vmatpush1.bf16.msra.mxu1 %v11569_v59  ;;  %807 = vmatpush1.bf16.msra.mxu0 %v11575_v61  ;;  %v11670_v59 = vld [vmem:[%s16709_s3 + $0x34] ss:$8 sps:$4 sm:$0xff]   ;;  %v11668_v61 = vld [vmem:[%s16709_s3 + $0x30] ss:$8 sps:$4 sm:$0xff]  }
  0x4c   :  { %532 = vmatprep.subr.bf16.mxu1 %v11580_v62  ;;  %808 = vmatprep.subr.bf16.mxu0 %v11583_v63  ;;  %v11671_v62 = vld [vmem:[%s16709_s3 + $0x630] ss:$8 sps:$4 sm:$0xff]   ;;  %v11679_v63 = vld [vmem:[%s16709_s3 + $0x644] ss:$8 sps:$4 sm:$0xff]  }
  0x4d   :  { %9278 = vmatprep.mubr.msk.bf16.mxu0 %vm248_vm0, %v13263_v0 }
  0x4f   :  { %533 = vmatpush1.bf16.msra.mxu1 %v11578_v1  ;;  %809 = vmatpush1.bf16.msra.mxu0 %v11581_v2  ;;  %v11677_v1 = vld [vmem:[%s16709_s3 + $0x640] ss:$8 sps:$4 sm:$0xff]   ;;  %v11682_v2 = vld [vmem:[%s16709_s3 + $0x54] ss:$8 sps:$4 sm:$0xff]  }
  0x50   :  { %534 = vmatprep.subr.bf16.mxu1 %v11586_v3  ;;  %810 = vmatprep.subr.bf16.mxu0 %v11592_v4  ;;  %v11685_v3 = vld [vmem:[%s16709_s3 + $0x654] ss:$8 sps:$4 sm:$0xff]   ;;  %v11680_v4 = vld [vmem:[%s16709_s3 + $0x50] ss:$8 sps:$4 sm:$0xff]  }
  0x52   :  { %343 = vmatmul.mubr.bf16.gmra.mrb[16].mxu0 %v13283_v5 }
  0x53   :  { %535 = vmatpush1.bf16.msra.mxu1 %v11584_v6  ;;  %811 = vmatpush1.bf16.msra.mxu0 %v11590_v7  ;;  %v11688_v6 = vld [vmem:[%s16709_s3 + $0x64] ss:$8 sps:$4 sm:$0xff]  }
  0x54   :  { %536 = vmatprep.subr.bf16.mxu1 %v11595_v8  ;;  %812 = vmatprep.subr.bf16.mxu0 %v11598_v9  ;;  %v11691_v7 = vld [vmem:[%s16709_s3 + $0x664] ss:$8 sps:$4 sm:$0xff]   ;;  %v11686_v8 = vld [vmem:[%s16709_s3 + $0x60] ss:$8 sps:$4 sm:$0xff]  }
  0x55   :  { %9279 = vmatprep.mubr.msk.bf16.mxu0 %vm248_vm0, %v13300_v10  ;;  %v11689_v9 = vld [vmem:[%s16709_s3 + $0x660] ss:$8 sps:$4 sm:$0xff]  }
  0x57   :  { %537 = vmatpush1.bf16.msra.mxu1 %v11593_v12  ;;  %813 = vmatpush1.bf16.msra.mxu0 %v11596_v14  ;;  %v11697_v12 = vld [vmem:[%s16709_s3 + $0x674] ss:$8 sps:$4 sm:$0xff]   ;;  %v11692_v14 = vld [vmem:[%s16709_s3 + $0x70] ss:$8 sps:$4 sm:$0xff]  }
  0x58   :  { %538 = vmatprep.subr.bf16.mxu1 %v11601_v15  ;;  %814 = vmatprep.subr.bf16.mxu0 %v11607_v16  ;;  %v11695_v15 = vld [vmem:[%s16709_s3 + $0x670] ss:$8 sps:$4 sm:$0xff]   ;;  %v11700_v16 = vld [vmem:[%s16709_s3 + $0x84] ss:$8 sps:$4 sm:$0xff]  }
  0x5a   :  { %353 = vmatmul.mubr.bf16.gmra.mrb[20].mxu0 %v13320_v17 }
  0x5b   :  { %539 = vmatpush1.bf16.msra.mxu1 %v11599_v18  ;;  %815 = vmatpush1.bf16.msra.mxu0 %v11605_v19  ;;  %v11698_v18 = vld [vmem:[%s16709_s3 + $0x80] ss:$8 sps:$4 sm:$0xff]  }
  0x5c   :  { %540 = vmatprep.subr.bf16.mxu1 %v11610_v20  ;;  %816 = vmatprep.subr.bf16.mxu0 %v11613_v21  ;;  %v11701_v19 = vld [vmem:[%s16709_s3 + $0x680] ss:$8 sps:$4 sm:$0xff]   ;;  %v11706_v20 = vld [vmem:[%s16709_s3 + $0x94] ss:$8 sps:$4 sm:$0xff]  }
  0x5d   :  { %9384 = vmatprep.mubr.msk.bf16.mxu0 %vm248_vm0, %v13078_v13  ;;  %v11709_v21 = vld [vmem:[%s16709_s3 + $0x694] ss:$8 sps:$4 sm:$0xff]  }
  0x5f   :  { %541 = vmatpush1.bf16.msra.mxu1 %v11608_v22  ;;  %817 = vmatpush1.bf16.msra.mxu0 %v11611_v23  ;;  %v11704_v22 = vld [vmem:[%s16709_s3 + $0x90] ss:$8 sps:$4 sm:$0xff]  }
  0x60   :  { %1070 = vmatprep.subr.bf16.mxu1 %v11616_v24  ;;  %v11707_v23 = vld [vmem:[%s16709_s3 + $0x690] ss:$8 sps:$4 sm:$0xff]   ;;  %v11712_v24 = vld [vmem:[%s16709_s3 + $0xa4] ss:$8 sps:$4 sm:$0xff]  }
  0x62   :  { %551 = vmatmul.mubr.bf16.vlgmr.msra.gmra.mrb[4].mxu1 %v13135_v30  ;;  %827 = vmatmul.mubr.bf16.vlgmr.msra.gmra.mrb[24].mxu0 %v13135_v30 }
  0x63   :  { %1071 = vmatpush1.bf16.msra.mxu1 %v11614_v25  ;;  %9330 = vmatprep.mubr.msk.bf16.mxu1 %vm248_vm0, %v13149_v34  ;;  %v11715_v25 = vld [vmem:[%s16709_s3 + $0x6a4] ss:$8 sps:$4 sm:$0xff]  }
  0x64   :  { %1072 = vmatprep.subr.bf16.mxu1 %v11619_v26  ;;  %9385 = vmatprep.mubr.msk.bf16.mxu0 %vm248_vm0, %v13149_v34  ;;  %v11710_v26 = vld [vmem:[%s16709_s3 + $0xa0] ss:$8 sps:$4 sm:$0xff]  }
  0x67   :  { %1073 = vmatpush1.bf16.msra.mxu1 %v11617_v27  ;;  %v11713_v27 = vld [vmem:[%s16709_s3 + $0x6a0] ss:$8 sps:$4 sm:$0xff]  }
  0x68   :  { %1074 = vmatprep.subr.bf16.mxu1 %v11622_v29  ;;  %v11718_v29 = vld [vmem:[%s16709_s3 + $0xb4] ss:$8 sps:$4 sm:$0xff]  }
  0x6a   :  { %561 = vmatmul.mubr.bf16.gmra.mrb[8].mxu1 %v13175_v40  ;;  %837 = vmatmul.mubr.bf16.gmra.mrb[28].mxu0 %v13175_v40 }
  0x6b   :  { %1075 = vmatpush1.bf16.msra.mxu1 %v11620_v31  ;;  %9331 = vmatprep.mubr.msk.bf16.mxu1 %vm248_vm0, %v13189_v44  ;;  %v11721_v31 = vld [vmem:[%s16709_s3 + $0x6b4] ss:$8 sps:$4 sm:$0xff]  }
  0x6c   :  { %1076 = vmatprep.subr.bf16.mxu1 %v11625_v32  ;;  %9386 = vmatprep.mubr.msk.bf16.mxu0 %vm248_vm0, %v13189_v44  ;;  %v11716_v32 = vld [vmem:[%s16709_s3 + $0xb0] ss:$8 sps:$4 sm:$0xff]  }
  0x6f   :  { %1077 = vmatpush1.bf16.msra.mxu1 %v11623_v33  ;;  %v11719_v33 = vld [vmem:[%s16709_s3 + $0x6b0] ss:$8 sps:$4 sm:$0xff]  }
  0x70   :  { %1078 = vmatprep.subr.bf16.mxu1 %v11628_v35  ;;  %v11724_v35 = vld [vmem:[%s16709_s3 + $0xc4] ss:$8 sps:$4 sm:$0xff]  }
  0x72   :  { %571 = vmatmul.mubr.bf16.gmra.mrb[12].mxu1 %v13212_v50  ;;  %847 = vmatmul.mubr.bf16.gmra.mrb[32].mxu0 %v13212_v50 }
  0x73   :  { %1079 = vmatpush1.bf16.msra.mxu1 %v11626_v36  ;;  %9332 = vmatprep.mubr.msk.bf16.mxu1 %vm248_vm0, %v13226_v54  ;;  %v11727_v36 = vld [vmem:[%s16709_s3 + $0x6c4] ss:$8 sps:$4 sm:$0xff]  }
  0x74   :  { %1080 = vmatprep.subr.bf16.mxu1 %v11631_v37  ;;  %9387 = vmatprep.mubr.msk.bf16.mxu0 %vm248_vm0, %v13226_v54  ;;  %v11722_v37 = vld [vmem:[%s16709_s3 + $0xc0] ss:$8 sps:$4 sm:$0xff]  }
  0x77   :  { %1081 = vmatpush1.bf16.msra.mxu1 %v11629_v38  ;;  %v11725_v38 = vld [vmem:[%s16709_s3 + $0x6c0] ss:$8 sps:$4 sm:$0xff]  }
  0x78   :  { %1082 = vmatprep.subr.bf16.mxu1 %v11634_v39  ;;  %v11730_v39 = vld [vmem:[%s16709_s3 + $0xd4] ss:$8 sps:$4 sm:$0xff]  }
  0x7a   :  { %581 = vmatmul.mubr.bf16.gmra.mrb[16].mxu1 %v13249_v60  ;;  %857 = vmatmul.mubr.bf16.gmra.mrb[36].mxu0 %v13249_v60 }
  0x7b   :  { %1083 = vmatpush1.bf16.msra.mxu1 %v11632_v41  ;;  %9333 = vmatprep.mubr.msk.bf16.mxu1 %vm248_vm0, %v13263_v0  ;;  %v11733_v41 = vld [vmem:[%s16709_s3 + $0x6d4] ss:$8 sps:$4 sm:$0xff]  }
  0x7c   :  { %9388 = vmatprep.mubr.msk.bf16.mxu0 %vm248_vm0, %v13263_v0  ;;  %1084 = vmatprep.subr.bf16.mxu1 %v11637_v42  ;;  %v12991_v42 = vmov 0  }
  0x7d   :  { %1285 = vst [vmem:[#allocation2 + $0x10] sm:$0xff] %v12991_v42  ;;  %1289 = vst [vmem:[#allocation2 + $0x30] sm:$0xff] %v12991_v42 }
  0x7e   :  { %1283 = vst [vmem:[#allocation2] sm:$0xff] %v12991_v42  ;;  %1286 = vst [vmem:[#allocation2 + $0x18] sm:$0xff] %v12991_v42 }
  0x7f   :  { %1085 = vmatpush1.bf16.msra.mxu1 %v11635_v43  ;;  %1287 = vst [vmem:[#allocation2 + $0x20] sm:$0xff] %v12991_v42  ;;  %1288 = vst [vmem:[#allocation2 + $0x28] sm:$0xff] %v12991_v42  ;;  %v11728_v43 = vld [vmem:[%s16709_s3 + $0xd0] ss:$8 sps:$4 sm:$0xff]  }
  0x80   :  { %1086 = vmatprep.subr.bf16.mxu1 %v11640_v45  ;;  %1290 = vst [vmem:[#allocation2 + $0x38] sm:$0xff] %v12991_v42  ;;  %1291 = vst [vmem:[#allocation2 + $0x40] sm:$0xff] %v12991_v42  ;;  %v11731_v45 = vld [vmem:[%s16709_s3 + $0x6d0] ss:$8 sps:$4 sm:$0xff]  }
  0x81   :  { %1292 = vst [vmem:[#allocation2 + $0x48] sm:$0xff] %v12991_v42  ;;  %1293 = vst [vmem:[#allocation2 + $0x50] sm:$0xff] %v12991_v42 }
  0x82   :  { %591 = vmatmul.mubr.bf16.gmra.mrb[20].mxu1 %v13283_v5  ;;  %867 = vmatmul.mubr.bf16.gmra.mrb[40].mxu0 %v13283_v5  ;;  %1294 = vst [vmem:[#allocation2 + $0x58] sm:$0xff] %v12991_v42  ;;  %1295 = vst [vmem:[#allocation2 + $0x60] sm:$0xff] %v12991_v42 }
  0x83   :  { %9334 = vmatprep.mubr.msk.bf16.mxu1 %vm248_vm0, %v13300_v10  ;;  %1087 = vmatpush1.bf16.msra.mxu1 %v11638_v46  ;;  %1296 = vst [vmem:[#allocation2 + $0x68] sm:$0xff] %v12991_v42  ;;  %1297 = vst [vmem:[#allocation2 + $0x70] sm:$0xff] %v12991_v42  ;;  %v11736_v46 = vld [vmem:[%s16709_s3 + $0xe4] ss:$8 sps:$4 sm:$0xff]  }
  0x84   :  { %9389 = vmatprep.mubr.msk.bf16.mxu0 %vm248_vm0, %v13300_v10  ;;  %1088 = vmatprep.subr.bf16.mxu1 %v11643_v47  ;;  %1298 = vst [vmem:[#allocation2 + $0x78] sm:$0xff] %v12991_v42  ;;  %1299 = vst [vmem:[#allocation2 + $0x80] sm:$0xff] %v12991_v42  ;;  %v11739_v47 = vld [vmem:[%s16709_s3 + $0x6e4] ss:$8 sps:$4 sm:$0xff]  }
  0x85   :  { %1300 = vst [vmem:[#allocation2 + $0x88] sm:$0xff] %v12991_v42  ;;  %1301 = vst [vmem:[#allocation2 + $0x90] sm:$0xff] %v12991_v42 }
  0x86   :  { %1302 = vst [vmem:[#allocation2 + $0x98] sm:$0xff] %v12991_v42  ;;  %1303 = vst [vmem:[#allocation2 + $0xa0] sm:$0xff] %v12991_v42 }
  0x87   :  { %1089 = vmatpush1.bf16.msra.mxu1 %v11641_v48  ;;  %1304 = vst [vmem:[#allocation2 + $0xa8] sm:$0xff] %v12991_v42  ;;  %1305 = vst [vmem:[#allocation2 + $0xb0] sm:$0xff] %v12991_v42  ;;  %v11734_v48 = vld [vmem:[%s16709_s3 + $0xe0] ss:$8 sps:$4 sm:$0xff]  }
  0x88   :  { %1090 = vmatprep.subr.bf16.mxu1 %v11646_v49  ;;  %1306 = vst [vmem:[#allocation2 + $0xb8] sm:$0xff] %v12991_v42  ;;  %1307 = vst [vmem:[#allocation2 + $0xc0] sm:$0xff] %v12991_v42  ;;  %v11737_v49 = vld [vmem:[%s16709_s3 + $0x6e0] ss:$8 sps:$4 sm:$0xff]  }
  0x89   :  { %1308 = vst [vmem:[#allocation2 + $0xc8] sm:$0xff] %v12991_v42  ;;  %1309 = vst [vmem:[#allocation2 + $0xd0] sm:$0xff] %v12991_v42 }
  0x8a   :  { %601 = vmatmul.mubr.bf16.gmra.mrb[24].mxu1 %v13320_v17  ;;  %877 = vmatmul.mubr.bf16.gmra.mrb[44].mxu0 %v13320_v17  ;;  %1310 = vst [vmem:[#allocation2 + $0xd8] sm:$0xff] %v12991_v42  ;;  %1311 = vst [vmem:[#allocation2 + $0xe0] sm:$0xff] %v12991_v42 }
  0x8b   :  { %9335 = vmatprep.mubr.msk.bf16.mxu1 %vm248_vm0, %v13068_v11  ;;  %1091 = vmatpush1.bf16.msra.mxu1 %v11644_v51  ;;  %1312 = vst [vmem:[#allocation2 + $0xe8] sm:$0xff] %v12991_v42  ;;  %1313 = vst [vmem:[#allocation2 + $0xf0] sm:$0xff] %v12991_v42  ;;  %v11742_v51 = vld [vmem:[%s16709_s3 + $0xf4] ss:$8 sps:$4 sm:$0xff]  }
  0x8c   :  { %9390 = vmatprep.mubr.msk.bf16.mxu0 %vm248_vm0, %v13068_v11  ;;  %1092 = vmatprep.subr.bf16.mxu1 %v11649_v52  ;;  %1314 = vst [vmem:[#allocation2 + $0xf8] sm:$0xff] %v12991_v42  ;;  %1315 = vst [vmem:[#allocation2 + $0x100] sm:$0xff] %v12991_v42  ;;  %v11745_v52 = vld [vmem:[%s16709_s3 + $0x6f4] ss:$8 sps:$4 sm:$0xff]  }
  0x8d   :  { %1316 = vst [vmem:[#allocation2 + $0x108] sm:$0xff] %v12991_v42  ;;  %1317 = vst [vmem:[#allocation2 + $0x110] sm:$0xff] %v12991_v42 }
  0x8e   :  { %1318 = vst [vmem:[#allocation2 + $0x118] sm:$0xff] %v12991_v42  ;;  %1319 = vst [vmem:[#allocation2 + $0x120] sm:$0xff] %v12991_v42 }
  0x8f   :  { %1093 = vmatpush1.bf16.msra.mxu1 %v11647_v53  ;;  %1320 = vst [vmem:[#allocation2 + $0x128] sm:$0xff] %v12991_v42  ;;  %1321 = vst [vmem:[#allocation2 + $0x130] sm:$0xff] %v12991_v42  ;;  %v11740_v53 = vld [vmem:[%s16709_s3 + $0xf0] ss:$8 sps:$4 sm:$0xff]  }
  0x90   :  { %1322 = vst [vmem:[#allocation2 + $0x138] sm:$0xff] %v12991_v42 }
  0x92   :  { %611 = vmatmul.mubr.bf16.gmra.mrb[28].mxu1 %v13127_v28  ;;  %887 = vmatmul.mubr.bf16.gmra.mrb[48].mxu0 %v13127_v28 }
  0x93   :  { %9439 = vmatprep.mubr.msk.bf16.mxu1 %vm248_vm0, %v13078_v13  ;;  %v11652_v13 = vld [vmem:[%s16709_s3 + $0x4] ss:$8 sps:$4 sm:$0xff]  }
  0x94   :  { %2858 = vmatprep.subr.bf16.mxu0 %v11652_v13  ;;  %v11743_v13 = vld [vmem:[%s16709_s3 + $0x6f0] ss:$8 sps:$4 sm:$0xff]  }
  0x9a   :  { %1103 = vmatmul.mubr.bf16.vlgmr.msra.gmra.mrb[32].mxu1 %v13135_v30  ;;  %v11650_v30 = vld [vmem:[%s16709_s3] ss:$8 sps:$4 sm:$0xff]  }
  0x9b   :  { %9440 = vmatprep.mubr.msk.bf16.mxu1 %vm248_vm0, %v13149_v34  ;;  %v11653_v34 = vld [vmem:[%s16709_s3 + $0x600] ss:$8 sps:$4 sm:$0xff]   ;;  %2859 = vmatpush1.bf16.msra.mxu0 %v11650_v30  ;;  %v11748_v30 = vld [vmem:[%s16709_s3 + $0x104] ss:$8 sps:$4 sm:$0xff]  }
  0xa2   :  { %1113 = vmatmul.mubr.bf16.gmra.mrb[36].mxu1 %v13175_v40  ;;  %v11655_v40 = vld [vmem:[%s16709_s3 + $0x604] ss:$8 sps:$4 sm:$0xff]  }
  0xa3   :  { %9441 = vmatprep.mubr.msk.bf16.mxu1 %vm248_vm0, %v13189_v44  ;;  %4437 = vmatprep.subr.bf16.mxu1 %v11655_v40  ;;  %v11658_v44 = vld [vmem:[%s16709_s3 + $0x14] ss:$8 sps:$4 sm:$0xff]  }
  0xa4   :  { %4438 = vmatpush1.bf16.msra.mxu1 %v11653_v34  ;;  %2860 = vmatprep.subr.bf16.mxu0 %v11658_v44  ;;  %v11751_v34 = vld [vmem:[%s16709_s3 + $0x704] ss:$8 sps:$4 sm:$0xff]  }
  0xaa   :  { %1123 = vmatmul.mubr.bf16.gmra.mrb[40].mxu1 %v13212_v50  ;;  %v11661_v50 = vld [vmem:[%s16709_s3 + $0x614] ss:$8 sps:$4 sm:$0xff]  }
  0xab   :  { %9442 = vmatprep.mubr.msk.bf16.mxu1 %vm248_vm0, %v13226_v54  ;;  %v11656_v54 = vld [vmem:[%s16709_s3 + $0x10] ss:$8 sps:$4 sm:$0xff]   ;;  %4439 = vmatprep.subr.bf16.mxu1 %v11661_v50 }
  0xac   :  { %2861 = vmatpush1.bf16.msra.mxu0 %v11656_v54  ;;  %4440 = vmatpush1.bf16.msra.mxu1 %v11659_v55 }
  0xad   :  { %4441 = vmatprep.subr.bf16.mxu1 %v11667_v56 }
  0xb0   :  { %4442 = vmatpush1.bf16.msra.mxu1 %v11665_v58 }
  0xb2   :  { %1133 = vmatmul.mubr.bf16.gmra.mrb[44].mxu1 %v13249_v60  ;;  %v11673_v60 = vld [vmem:[%s16709_s3 + $0x634] ss:$8 sps:$4 sm:$0xff]  }
  0xb3   :  { %9443 = vmatprep.mubr.msk.bf16.mxu1 %vm248_vm0, %v13263_v0  ;;  %4443 = vmatprep.subr.bf16.mxu1 %v11673_v60  ;;  %v11674_v0 = vld [vmem:[%s16709_s3 + $0x40] ss:$8 sps:$4 sm:$0xff]  }
  0xb4   :  { %4444 = vmatpush1.bf16.msra.mxu1 %v11671_v62 }
  0xb5   :  { %4445 = vmatprep.subr.bf16.mxu1 %v11679_v63 }
  0xb8   :  { %4446 = vmatpush1.bf16.msra.mxu1 %v11677_v1 }
  0xb9   :  { %4447 = vmatprep.subr.bf16.mxu1 %v11685_v3 }
  0xba   :  { %1143 = vmatmul.mubr.bf16.gmra.mrb[48].mxu1 %v13283_v5  ;;  %v11683_v5 = vld [vmem:[%s16709_s3 + $0x650] ss:$8 sps:$4 sm:$0xff]  }
  0xbb   :  { %9444 = vmatprep.mubr.msk.bf16.mxu1 %vm248_vm0, %v13300_v10  ;;  %v11694_v10 = vld [vmem:[%s16709_s3 + $0x74] ss:$8 sps:$4 sm:$0xff]  }
  0xbc   :  { %4448 = vmatpush1.bf16.msra.mxu1 %v11683_v5 }
  0xbd   :  { %4449 = vmatprep.subr.bf16.mxu1 %v11691_v7 }
  0xc0   :  { %4450 = vmatpush1.bf16.msra.mxu1 %v11689_v9 }
  0xc1   :  { %4451 = vmatprep.subr.bf16.mxu1 %v11697_v12 }
  0xc2   :  { %1153 = vmatmul.mubr.bf16.gmra.mrb[52].mxu1 %v13320_v17  ;;  %v11703_v17 = vld [vmem:[%s16709_s3 + $0x684] ss:$8 sps:$4 sm:$0xff]  }
  0xc3   :  { %9445 = vmatprep.mubr.msk.bf16.mxu1 %vm248_vm0, %v13068_v11  ;;  %v11664_v11 = vld [vmem:[%s16709_s3 + $0x24] ss:$8 sps:$4 sm:$0xff]  }
  0xc4   :  { %2862 = vmatprep.subr.bf16.mxu0 %v11664_v11  ;;  %4452 = vmatpush1.bf16.msra.mxu1 %v11695_v15 }
  0xc5   :  { %2863 = vmatpush1.bf16.msra.mxu0 %v11662_v57  ;;  %4453 = vmatprep.subr.bf16.mxu1 %v11703_v17 }
  0xc6   :  { %2864 = vmatprep.subr.bf16.mxu0 %v11670_v59 }
  0xc8   :  { %4454 = vmatpush1.bf16.msra.mxu1 %v11701_v19 }
  0xc9   :  { %2865 = vmatpush1.bf16.msra.mxu0 %v11668_v61  ;;  %4455 = vmatprep.subr.bf16.mxu1 %v11709_v21 }
  0xca   :  { %1163 = vmatmul.mubr.bf16.gmra.mrb[56].mxu1 %v13127_v28  ;;  %v11676_v28 = vld [vmem:[%s16709_s3 + $0x44] ss:$8 sps:$4 sm:$0xff]  }
  0xcb   :  { %2866 = vmatprep.subr.bf16.mxu0 %v11676_v28 }
  0xcc   :  { %4456 = vmatpush1.bf16.msra.mxu1 %v11707_v23 }
  0xcd   :  { %2867 = vmatpush1.bf16.msra.mxu0 %v11674_v0  ;;  %4457 = vmatprep.subr.bf16.mxu1 %v11715_v25 }
  0xce   :  { %2868 = vmatprep.subr.bf16.mxu0 %v11682_v2 }
  0xd0   :  { %4458 = vmatpush1.bf16.msra.mxu1 %v11713_v27 }
  0xd1   :  { %2869 = vmatpush1.bf16.msra.mxu0 %v11680_v4  ;;  %4459 = vmatprep.subr.bf16.mxu1 %v11721_v31 }
  0xd2   :  { %2870 = vmatprep.subr.bf16.mxu0 %v11688_v6 }
  0xd4   :  { %4460 = vmatpush1.bf16.msra.mxu1 %v11719_v33 }
  0xd5   :  { %2871 = vmatpush1.bf16.msra.mxu0 %v11686_v8  ;;  %4461 = vmatprep.subr.bf16.mxu1 %v11727_v36 }
  0xd6   :  { %2872 = vmatprep.subr.bf16.mxu0 %v11694_v10 }
  0xd8   :  { %4462 = vmatpush1.bf16.msra.mxu1 %v11725_v38 }
  0xd9   :  { %2873 = vmatpush1.bf16.msra.mxu0 %v11692_v14  ;;  %4463 = vmatprep.subr.bf16.mxu1 %v11733_v41 }
  0xda   :  { %2874 = vmatprep.subr.bf16.mxu0 %v11700_v16 }
  0xdc   :  { %4464 = vmatpush1.bf16.msra.mxu1 %v11731_v45 }
  0xdd   :  { %2875 = vmatpush1.bf16.msra.mxu0 %v11698_v18  ;;  %4465 = vmatprep.subr.bf16.mxu1 %v11739_v47 }
  0xde   :  { %2876 = vmatprep.subr.bf16.mxu0 %v11706_v20 }
  0xe0   :  { %4466 = vmatpush1.bf16.msra.mxu1 %v11737_v49 }
  0xe1   :  { %2877 = vmatpush1.bf16.msra.mxu0 %v11704_v22  ;;  %4467 = vmatprep.subr.bf16.mxu1 %v11745_v52 }
  0xe2   :  { %2878 = vmatprep.subr.bf16.mxu0 %v11712_v24 }
  0xe4   :  { %4468 = vmatpush1.bf16.msra.mxu1 %v11743_v13 }
  0xe5   :  { %2879 = vmatpush1.bf16.msra.mxu0 %v11710_v26  ;;  %4508 = vmatprep.subr.bf16.mxu1 %v11751_v34 }
  0xe6   :  { %2880 = vmatprep.subr.bf16.mxu0 %v11718_v29 }
  0xe9   :  { %2881 = vmatpush1.bf16.msra.mxu0 %v11716_v32 }
  0xea   :  { %2882 = vmatprep.subr.bf16.mxu0 %v11724_v35 }
  0xed   :  { %2883 = vmatpush1.bf16.msra.mxu0 %v11722_v37 }
  0xee   :  { %2884 = vmatprep.subr.bf16.mxu0 %v11730_v39 }
  0xf1   :  { %2885 = vmatpush1.bf16.msra.mxu0 %v11728_v43 }
  0xf2   :  { %2886 = vmatprep.subr.bf16.mxu0 %v11736_v46 }
  0xf5   :  { %2887 = vmatpush1.bf16.msra.mxu0 %v11734_v48 }
  0xf6   :  { %2888 = vmatprep.subr.bf16.mxu0 %v11742_v51 }
  0xf9   :  { %2889 = vmatpush1.bf16.msra.mxu0 %v11740_v53 }
  0xfa   :  { %2929 = vmatprep.subr.bf16.mxu0 %v11748_v30 }
 0x105   :  { %v13672_v40 = vpop.f32.mrb[0].mxu1  ;;  %v304_v44 = vpop.f32.mrb[0].mxu0 }
 0x106   :  { %v13674_v50 = vpop.f32.mrb[1].mxu1  ;;  %v306_v54 = vpop.f32.mrb[1].mxu0 }
 0x107   :  { %v13676_v55 = vpop.f32.mrb[2].mxu1  ;;  %v308_v11 = vpop.f32.mrb[2].mxu0 }
 0x108   :  { %v13678_v56 = vpop.f32.mrb[3].mxu1  ;;  %v310_v57 = vpop.f32.mrb[3].mxu0 }
 0x10d   :  { %v314_v58 = vpop.f32.mrb[4].mxu0 }
 0x10e   :  { %v316_v59 = vpop.f32.mrb[5].mxu0 }
 0x10f   :  { %v318_v60 = vpop.f32.mrb[6].mxu0 }
 0x110   :  { %v320_v61 = vpop.f32.mrb[7].mxu0 }
 0x115   :  { %v324_v62 = vpop.f32.mrb[8].mxu0 }
 0x116   :  { %v326_v28 = vpop.f32.mrb[9].mxu0 }
 0x117   :  { %v328_v63 = vpop.f32.mrb[10].mxu0 }
 0x118   :  { %v330_v0 = vpop.f32.mrb[11].mxu0 }
 0x11d   :  { %v13680_v1 = vpop.f32.mrb[12].mxu0 }
 0x11e   :  { %v13682_v2 = vpop.f32.mrb[13].mxu0 }
 0x11f   :  { %v13684_v3 = vpop.f32.mrb[14].mxu0 }
 0x120   :  { %v13686_v4 = vpop.f32.mrb[15].mxu0 }
 0x125   :  { %v13688_v5 = vpop.f32.mrb[16].mxu0 }
 0x126   :  { %v13690_v6 = vpop.f32.mrb[17].mxu0 }
 0x127   :  { %v13692_v7 = vpop.f32.mrb[18].mxu0 }
 0x128   :  { %v13694_v8 = vpop.f32.mrb[19].mxu0 }
 0x12d   :  { %v13696_v9 = vpop.f32.mrb[20].mxu0 }
 0x12e   :  { %v13698_v10 = vpop.f32.mrb[21].mxu0 }
 0x12f   :  { %v13700_v12 = vpop.f32.mrb[22].mxu0 }
 0x130   :  { %v13702_v14 = vpop.f32.mrb[23].mxu0 }
 0x135   :  { %v552_v15 = vpop.f32.mrb[4].mxu1  ;;  %v828_v16 = vpop.f32.mrb[24].mxu0 }
 0x136   :  { %v621_v17 = vmax.f32 %v304_v44, %v552_v15  ;;  %v554_v18 = vpop.f32.mrb[5].mxu1  ;;  %v830_v19 = vpop.f32.mrb[25].mxu0 }
 0x137   :  { %v622_v20 = vmax.f32 %v306_v54, %v554_v18  ;;  %v556_v21 = vpop.f32.mrb[6].mxu1  ;;  %v832_v22 = vpop.f32.mrb[26].mxu0 }
 0x138   :  { %v623_v23 = vmax.f32 %v308_v11, %v556_v21  ;;  %v13704_v24 = vmax.f32 %v621_v17, %v828_v16  ;;  %v558_v25 = vpop.f32.mrb[7].mxu1  ;;  %v834_v26 = vpop.f32.mrb[27].mxu0 }
 0x139   :  { %v624_v27 = vmax.f32 %v310_v57, %v558_v25  ;;  %v13706_v29 = vmax.f32 %v622_v20, %v830_v19 }
 0x13a   :  { %v13708_v31 = vmax.f32 %v623_v23, %v832_v22 }
 0x13b   :  { %v13710_v32 = vmax.f32 %v624_v27, %v834_v26 }
 0x13d   :  { %v562_v33 = vpop.f32.mrb[8].mxu1  ;;  %v838_v35 = vpop.f32.mrb[28].mxu0 }
 0x13e   :  { %v625_v36 = vmax.f32 %v314_v58, %v562_v33  ;;  %v564_v37 = vpop.f32.mrb[9].mxu1  ;;  %v840_v38 = vpop.f32.mrb[29].mxu0 }
 0x13f   :  { %v626_v39 = vmax.f32 %v316_v59, %v564_v37  ;;  %v566_v41 = vpop.f32.mrb[10].mxu1  ;;  %v842_v42 = vpop.f32.mrb[30].mxu0 }
 0x140   :  { %v627_v43 = vmax.f32 %v318_v60, %v566_v41  ;;  %v13712_v45 = vmax.f32 %v625_v36, %v838_v35  ;;  %v568_v46 = vpop.f32.mrb[11].mxu1  ;;  %v844_v47 = vpop.f32.mrb[31].mxu0 }
 0x141   :  { %v628_v48 = vmax.f32 %v320_v61, %v568_v46  ;;  %v13714_v49 = vmax.f32 %v626_v39, %v840_v38 }
 0x142   :  { %v13716_v51 = vmax.f32 %v627_v43, %v842_v42 }
 0x143   :  { %v13718_v52 = vmax.f32 %v628_v48, %v844_v47 }
 0x145   :  { %v572_v53 = vpop.f32.mrb[12].mxu1  ;;  %v848_v13 = vpop.f32.mrb[32].mxu0 }
 0x146   :  { %v629_v30 = vmax.f32 %v324_v62, %v572_v53  ;;  %v574_v34 = vpop.f32.mrb[13].mxu1  ;;  %v850_v44 = vpop.f32.mrb[33].mxu0 }
 0x147   :  { %v630_v54 = vmax.f32 %v326_v28, %v574_v34  ;;  %v576_v11 = vpop.f32.mrb[14].mxu1  ;;  %v852_v57 = vpop.f32.mrb[34].mxu0 }
 0x148   :  { %v631_v58 = vmax.f32 %v328_v63, %v576_v11  ;;  %v13720_v59 = vmax.f32 %v629_v30, %v848_v13  ;;  %v578_v60 = vpop.f32.mrb[15].mxu1  ;;  %v854_v15 = vpop.f32.mrb[35].mxu0 }
 0x149   :  { %v632_v61 = vmax.f32 %v330_v0, %v578_v60  ;;  %v13722_v16 = vmax.f32 %v630_v54, %v850_v44 }
 0x14a   :  { %v13724_v17 = vmax.f32 %v631_v58, %v852_v57 }
 0x14b   :  { %v13726_v18 = vmax.f32 %v632_v61, %v854_v15 }
 0x14d   :  { %v582_v19 = vpop.f32.mrb[16].mxu1  ;;  %v858_v20 = vpop.f32.mrb[36].mxu0 }
 0x14e   :  { %v633_v62 = vmax.f32 %v13680_v1, %v582_v19  ;;  %v584_v21 = vpop.f32.mrb[17].mxu1  ;;  %v860_v28 = vpop.f32.mrb[37].mxu0  ;;  %v1203_v19 = vlaneseq }
 0x14f   :  { %v634_v22 = vmax.f32 %v13682_v2, %v584_v21  ;;  %v586_v63 = vpop.f32.mrb[18].mxu1  ;;  %v862_v23 = vpop.f32.mrb[38].mxu0 }
 0x150   :  { %v635_v25 = vmax.f32 %v13684_v3, %v586_v63  ;;  %v13731_v26 = vmax.f32 %v633_v62, %v858_v20  ;;  %v588_v0 = vpop.f32.mrb[19].mxu1  ;;  %v864_v27 = vpop.f32.mrb[39].mxu0 }
 0x151   :  { %v636_v33 = vmax.f32 %v13686_v4, %v588_v0  ;;  %v13734_v35 = vmax.f32 %v634_v22, %v860_v28  ;;  %v13764_v28 = vshrl.u32 %v1203_v19, 7 }
 0x152   :  { %v13736_v36 = vmax.f32 %v635_v25, %v862_v23 }
 0x153   :  { %v13738_v37 = vmax.f32 %v636_v33, %v864_v27 }
 0x155   :  { %v592_v1 = vpop.f32.mrb[20].mxu1  ;;  %v868_v38 = vpop.f32.mrb[40].mxu0 }
 0x156   :  { %v637_v2 = vmax.f32 %v13688_v5, %v592_v1  ;;  %v594_v39 = vpop.f32.mrb[21].mxu1  ;;  %v870_v41 = vpop.f32.mrb[41].mxu0 }
 0x157   :  { %v638_v3 = vmax.f32 %v13690_v6, %v594_v39  ;;  %v596_v42 = vpop.f32.mrb[22].mxu1  ;;  %v872_v43 = vpop.f32.mrb[42].mxu0 }
 0x158   :  { %v639_v46 = vmax.f32 %v13692_v7, %v596_v42  ;;  %v13743_v47 = vmax.f32 %v637_v2, %v868_v38  ;;  %v598_v4 = vpop.f32.mrb[23].mxu1  ;;  %v874_v48 = vpop.f32.mrb[43].mxu0  ;;  %v1205_v2 = vsub.s32 0, %v13764_v28 }
 0x159   :  { %v640_v53 = vmax.f32 %v13694_v8, %v598_v4  ;;  %v13746_v13 = vmax.f32 %v638_v3, %v870_v41 }
 0x15a   :  { %v13748_v30 = vmax.f32 %v639_v46, %v872_v43 }
 0x15b   :  { %v13750_v34 = vmax.f32 %v640_v53, %v874_v48 }
 0x15d   :  { %v602_v5 = vpop.f32.mrb[24].mxu1  ;;  %v878_v44 = vpop.f32.mrb[44].mxu0 }
 0x15e   :  { %v641_v6 = vmax.f32 %v13696_v9, %v602_v5  ;;  %v604_v54 = vpop.f32.mrb[25].mxu1  ;;  %v880_v11 = vpop.f32.mrb[45].mxu0 }
 0x15f   :  { %v642_v7 = vmax.f32 %v13698_v10, %v604_v54  ;;  %v606_v57 = vpop.f32.mrb[26].mxu1  ;;  %v882_v58 = vpop.f32.mrb[46].mxu0 }
 0x160   :  { %v643_v60 = vmax.f32 %v13700_v12, %v606_v57  ;;  %v13755_v15 = vmax.f32 %v641_v6, %v878_v44  ;;  %v608_v8 = vpop.f32.mrb[27].mxu1  ;;  %v884_v61 = vpop.f32.mrb[47].mxu0 }
 0x161   :  { %v644_v20 = vmax.f32 %v13702_v14, %v608_v8  ;;  %v13758_v62 = vmax.f32 %v642_v7, %v880_v11 }
 0x162   :  { %v13760_v21 = vmax.f32 %v643_v60, %v882_v58 }
 0x163   :  { %v13762_v9 = vmax.f32 %v644_v20, %v884_v61 }
 0x165   :  { %v612_v10 = vpop.f32.mrb[28].mxu1  ;;  %v888_v22 = vpop.f32.mrb[48].mxu0 }
 0x166   :  { %v645_v63 = vmax.f32 %v13672_v40, %v612_v10  ;;  %v614_v12 = vpop.f32.mrb[29].mxu1  ;;  %v890_v23 = vpop.f32.mrb[49].mxu0  ;;  %v1201_v40 = vld [vmem:[%s16710_s2] sm:$0x3] }
 0x167   :  { %v646_v25 = vmax.f32 %v13674_v50, %v614_v12  ;;  %v616_v0 = vpop.f32.mrb[30].mxu1  ;;  %v892_v27 = vpop.f32.mrb[50].mxu0  ;;  %v1209_v50 = vsub.s32 1, %v13764_v28 }
 0x168   :  { %v647_v14 = vmax.f32 %v13676_v55, %v616_v0  ;;  %v13769_v33 = vmax.f32 %v645_v63, %v888_v22  ;;  %v618_v1 = vpop.f32.mrb[31].mxu1  ;;  %v894_v38 = vpop.f32.mrb[51].mxu0  ;;  %v13785_v55 = vrot.slane %v1201_v40, %v1205_v2 }
 0x169   :  { %v648_v39 = vmax.f32 %v13678_v56, %v618_v1  ;;  %v13773_v41 = vmax.f32 %v646_v25, %v890_v23  ;;  %v13789_v56 = vrot.slane %v1201_v40, %v1209_v50  ;;  %v11746_v40 = vld [vmem:[%s16709_s3 + $0x100] ss:$8 sps:$4 sm:$0xff]  }
 0x16a   :  { %v13779_v3 = vmax.f32 %v647_v14, %v892_v27 }
 0x16b   :  { %v13781_v42 = vmax.f32 %v648_v39, %v894_v38 }
 0x16d   :  { %v1104_v43 = vpop.f32.mrb[32].mxu1 }
 0x16e   :  { %v1173_v46 = vmax.f32 %v13704_v24, %v1104_v43  ;;  %v1106_v4 = vpop.f32.mrb[33].mxu1  ;;  %v11749_v43 = vld [vmem:[%s16709_s3 + $0x700] ss:$8 sps:$4 sm:$0xff]  }
 0x16f   :  { %v1174_v48 = vmax.f32 %v13706_v29, %v1106_v4  ;;  %v1108_v53 = vpop.f32.mrb[34].mxu1 }
 0x170   :  { %v1213_v5 = vadd.f32 %v13785_v55, %v1173_v46  ;;  %v1175_v44 = vmax.f32 %v13708_v31, %v1108_v53  ;;  %v1110_v6 = vpop.f32.mrb[35].mxu1 }
 0x171   :  { %v1214_v54 = vadd.f32 %v13789_v56, %v1174_v48  ;;  %v1176_v11 = vmax.f32 %v13710_v32, %v1110_v6  ;;  %v11754_v48 = vld [vmem:[%s16709_s3 + $0x114] ss:$8 sps:$4 sm:$0xff]  }
 0x172   :  { %v1241_v7 = vmax.f32 %v1213_v5, 0.0  ;;  %v1215_v57 = vadd.f32 %v13785_v55, %v1175_v44 }
 0x173   :  { %v1242_v58 = vmax.f32 %v1214_v54, 0.0  ;;  %v1216_v24 = vadd.f32 %v13789_v56, %v1176_v11 }
 0x174   :  { %v1243_v60 = vmax.f32 %v1215_v57, 0.0 }
 0x175   :  { %v11126_v8 = vpack.c.bf16 %v1242_v58, %v1241_v7  ;;  %v1244_v31 = vmax.f32 %v1216_v24, 0.0  ;;  %v1114_v61 = vpop.f32.mrb[36].mxu1  ;;  %v11757_v58 = vld [vmem:[%s16709_s3 + $0x714] ss:$8 sps:$4 sm:$0xff]  }
 0x176   :  { %v1177_v19 = vmax.f32 %v13712_v45, %v1114_v61  ;;  %v1116_v20 = vpop.f32.mrb[37].mxu1  ;;  %v11763_v61 = vld [vmem:[%s16709_s3 + $0x724] ss:$8 sps:$4 sm:$0xff]  }
 0x177   :  { %1334 = vst.msk [vmem:[#allocation2 + $0x10] sm:$0xff] %vm13799_vm3, %v11126_v8  ;;  %1353 = vst.msk [vmem:[#allocation2 + $0x30] sm:$0xff] %vm13799_vm3, %v11126_v8  ;;  %v11127_v32 = vpack.c.bf16 %v1244_v31, %v1243_v60  ;;  %v1178_v10 = vmax.f32 %v13714_v49, %v1116_v20  ;;  %v1118_v22 = vpop.f32.mrb[38].mxu1  ;;  %v11755_v60 = vld [vmem:[%s16709_s3 + $0x710] ss:$8 sps:$4 sm:$0xff]  }
 0x178   :  { %v1217_v63 = vadd.f32 %v13785_v55, %v1177_v19  ;;  %v1179_v12 = vmax.f32 %v13716_v51, %v1118_v22  ;;  %v1120_v23 = vpop.f32.mrb[39].mxu1 }
 0x179   :  { %1339 = vst.msk [vmem:[#allocation2 + $0x18] sm:$0xff] %vm13799_vm3, %v11127_v32  ;;  %1354 = vst.msk [vmem:[#allocation2 + $0x38] sm:$0xff] %vm13799_vm3, %v11127_v32  ;;  %v1218_v45 = vadd.f32 %v13789_v56, %v1178_v10  ;;  %v1180_v25 = vmax.f32 %v13718_v52, %v1120_v23 }
 0x17a   :  { %v1245_v0 = vmax.f32 %v1217_v63, 0.0  ;;  %v1219_v27 = vadd.f32 %v13785_v55, %v1179_v12 }
 0x17b   :  { %v1246_v49 = vmax.f32 %v1218_v45, 0.0  ;;  %v1220_v14 = vadd.f32 %v13789_v56, %v1180_v25  ;;  %v11758_v45 = vld [vmem:[%s16709_s3 + $0x120] ss:$8 sps:$4 sm:$0xff]  }
 0x17c   :  { %v1247_v1 = vmax.f32 %v1219_v27, 0.0  ;;  %v11761_v27 = vld [vmem:[%s16709_s3 + $0x720] ss:$8 sps:$4 sm:$0xff]  }
 0x17d   :  { %v11128_v38 = vpack.c.bf16 %v1246_v49, %v1245_v0  ;;  %v1248_v51 = vmax.f32 %v1220_v14, 0.0  ;;  %v1124_v39 = vpop.f32.mrb[40].mxu1  ;;  %v11766_v49 = vld [vmem:[%s16709_s3 + $0x134] ss:$8 sps:$4 sm:$0xff]  }
 0x17e   :  { %v1181_v52 = vmax.f32 %v13720_v59, %v1124_v39  ;;  %v1126_v46 = vpop.f32.mrb[41].mxu1  ;;  %v1448_v4 = vld [vmem:[#allocation2 + $0x30] sm:$0xff]  ;;  %v13836_v59 = vld [vmem:[#allocation2] sm:$0xff] }
 0x17f   :  { %1346 = vst.msk [vmem:[#allocation2 + $0x20] sm:$0xff] %vm13799_vm3, %v11128_v38  ;;  %1355 = vst.msk [vmem:[#allocation2 + $0x40] sm:$0xff] %vm13799_vm3, %v11128_v38  ;;  %v11129_v53 = vpack.c.bf16 %v1248_v51, %v1247_v1  ;;  %v1182_v5 = vmax.f32 %v13722_v16, %v1126_v46  ;;  %v1128_v44 = vpop.f32.mrb[42].mxu1  ;;  %v13839_v6 = vcombine.low %v13836_v59, %v1448_v4 }
 0x180   :  { %1370 = vst.msk [vmem:[#allocation2 + $0x60] sm:$0xff] %vm13799_vm3, %v11128_v38  ;;  %v13842_v54 = vcombine.high %v13836_v59, %v1448_v4  ;;  %v1221_v11 = vadd.f32 %v13785_v55, %v1181_v52  ;;  %v1183_v7 = vmax.f32 %v13724_v17, %v1128_v44  ;;  %v1130_v57 = vpop.f32.mrb[43].mxu1  ;;  %v11752_v17 = vld [vmem:[%s16709_s3 + $0x110] ss:$8 sps:$4 sm:$0xff]  }
 0x181   :  { %1351 = vst.msk [vmem:[#allocation2 + $0x28] sm:$0xff] %vm13799_vm3, %v11129_v53  ;;  %1356 = vst.msk [vmem:[#allocation2 + $0x48] sm:$0xff] %vm13799_vm3, %v11129_v53  ;;  %v1222_v16 = vadd.f32 %v13789_v56, %v1182_v5  ;;  %v1184_v24 = vmax.f32 %v13726_v18, %v1130_v57  ;;  %v11760_v18 = vld [vmem:[%s16709_s3 + $0x124] ss:$8 sps:$4 sm:$0xff]   ;;  %v11767_v4 = vld [vmem:[%s16709_s3 + $0x730] ss:$8 sps:$4 sm:$0xff]  }
 0x182   :  { %1371 = vst.msk [vmem:[#allocation2 + $0x68] sm:$0xff] %vm13799_vm3, %v11129_v53  ;;  %2890 = vmatprep.mubr.bf16.mxu0 %v13842_v54  ;;  %4469 = vmatprep.mubr.bf16.mxu1 %v13842_v54  ;;  %v1249_v8 = vmax.f32 %v1221_v11, 0.0  ;;  %v1223_v31 = vadd.f32 %v13785_v55, %v1183_v7  ;;  %v11777_v11 = vld [vmem:[%s16709_s3 + $0x744] ss:$8 sps:$4 sm:$0xff]  }
 0x183   :  { %2891 = vmatmul.mubr.bf16.vlgmr.msra.gmra.mrb[52].mxu0 %v13839_v6  ;;  %4470 = vmatmul.mubr.bf16.vlgmr.msra.gmra.mrb[60].mxu1 %v13839_v6  ;;  %v1250_v19 = vmax.f32 %v1222_v16, 0.0  ;;  %v1224_v20 = vadd.f32 %v13789_v56, %v1184_v24 }
 0x184   :  { %2930 = vmatpush1.bf16.msra.mxu0 %v11746_v40  ;;  %4509 = vmatpush1.bf16.msra.mxu1 %v11749_v43  ;;  %v1251_v32 = vmax.f32 %v1223_v31, 0.0  ;;  %v11764_v43 = vld [vmem:[%s16709_s3 + $0x130] ss:$8 sps:$4 sm:$0xff]  }
 0x185   :  { %2931 = vmatprep.subr.bf16.mxu0 %v11754_v48  ;;  %4510 = vmatprep.subr.bf16.mxu1 %v11757_v58  ;;  %v11130_v10 = vpack.c.bf16 %v1250_v19, %v1249_v8  ;;  %v1252_v22 = vmax.f32 %v1224_v20, 0.0  ;;  %v1134_v63 = vpop.f32.mrb[44].mxu1  ;;  %v11775_v8 = vld [vmem:[%s16709_s3 + $0x740] ss:$8 sps:$4 sm:$0xff]   ;;  %v11784_v19 = vld [vmem:[%s16709_s3 + $0x754] ss:$8 sps:$4 sm:$0xff]  }
 0x186   :  { %v1185_v12 = vmax.f32 %v13731_v26, %v1134_v63  ;;  %v1136_v23 = vpop.f32.mrb[45].mxu1 }
 0x187   :  { %1363 = vst.msk [vmem:[#allocation2 + $0x50] sm:$0xff] %vm13799_vm3, %v11130_v10  ;;  %1372 = vst.msk [vmem:[#allocation2 + $0x70] sm:$0xff] %vm13799_vm3, %v11130_v10  ;;  %v11131_v25 = vpack.c.bf16 %v1252_v22, %v1251_v32  ;;  %v1186_v0 = vmax.f32 %v13734_v35, %v1136_v23  ;;  %v1138_v26 = vpop.f32.mrb[46].mxu1  ;;  %v11769_v35 = vld [vmem:[%s16709_s3 + $0x734] ss:$8 sps:$4 sm:$0xff]  }
 0x188   :  { %1387 = vst.msk [vmem:[#allocation2 + $0x90] sm:$0xff] %vm13799_vm3, %v11130_v10  ;;  %2932 = vmatpush1.bf16.msra.mxu0 %v11752_v17  ;;  %4511 = vmatpush1.bf16.msra.mxu1 %v11755_v60  ;;  %v1225_v14 = vadd.f32 %v13785_v55, %v1185_v12  ;;  %v1187_v1 = vmax.f32 %v13736_v36, %v1138_v26  ;;  %v1140_v38 = vpop.f32.mrb[47].mxu1  ;;  %v11779_v12 = vld [vmem:[%s16709_s3 + $0x150] ss:$8 sps:$4 sm:$0xff]  }
 0x189   :  { %2933 = vmatprep.subr.bf16.mxu0 %v11760_v18  ;;  %4512 = vmatprep.subr.bf16.mxu1 %v11763_v61  ;;  %1368 = vst.msk [vmem:[#allocation2 + $0x58] sm:$0xff] %vm13799_vm3, %v11131_v25  ;;  %1373 = vst.msk [vmem:[#allocation2 + $0x78] sm:$0xff] %vm13799_vm3, %v11131_v25  ;;  %v1226_v51 = vadd.f32 %v13789_v56, %v1186_v0  ;;  %v1188_v36 = vmax.f32 %v13738_v37, %v1140_v38  ;;  %v11774_v37 = vld [vmem:[%s16709_s3 + $0x144] ss:$8 sps:$4 sm:$0xff]  }
 0x18a   :  { %1388 = vst.msk [vmem:[#allocation2 + $0x98] sm:$0xff] %vm13799_vm3, %v11131_v25  ;;  %v1253_v39 = vmax.f32 %v1225_v14, 0.0  ;;  %v1227_v40 = vadd.f32 %v13785_v55, %v1187_v1  ;;  %v11790_v25 = vld [vmem:[%s16709_s3 + $0x764] ss:$8 sps:$4 sm:$0xff]   ;;  %v11785_v1 = vld [vmem:[%s16709_s3 + $0x160] ss:$8 sps:$4 sm:$0xff]  }
 0x18b   :  { %v1254_v52 = vmax.f32 %v1226_v51, 0.0  ;;  %v1228_v46 = vadd.f32 %v13789_v56, %v1188_v36  ;;  %v11788_v51 = vld [vmem:[%s16709_s3 + $0x760] ss:$8 sps:$4 sm:$0xff]   ;;  %v11793_v36 = vld [vmem:[%s16709_s3 + $0x174] ss:$8 sps:$4 sm:$0xff]  }
 0x18c   :  { %2934 = vmatpush1.bf16.msra.mxu0 %v11758_v45  ;;  %4513 = vmatpush1.bf16.msra.mxu1 %v11761_v27  ;;  %v1255_v48 = vmax.f32 %v1227_v40, 0.0  ;;  %v11787_v45 = vld [vmem:[%s16709_s3 + $0x164] ss:$8 sps:$4 sm:$0xff]  }
 0x18d   :  { %2935 = vmatprep.subr.bf16.mxu0 %v11766_v49  ;;  %4514 = vmatprep.subr.bf16.mxu1 %v11769_v35  ;;  %v11132_v53 = vpack.c.bf16 %v1254_v52, %v1253_v39  ;;  %v1256_v5 = vmax.f32 %v1228_v46, 0.0  ;;  %v1144_v44 = vpop.f32.mrb[48].mxu1 }
 0x18e   :  { %v1189_v7 = vmax.f32 %v13743_v47, %v1144_v44  ;;  %v1146_v57 = vpop.f32.mrb[49].mxu1  ;;  %v11772_v47 = vld [vmem:[%s16709_s3 + $0x140] ss:$8 sps:$4 sm:$0xff]  }
 0x18f   :  { %v11770_v58 = vld [vmem:[#allocation2 + $0x64] ss:$48 sps:$4 sm:$0xff]   ;;  %v11778_v16 = vld [vmem:[#allocation2 + $0x60] ss:$48 sps:$4 sm:$0xff]   ;;  %1380 = vst.msk [vmem:[#allocation2 + $0x80] sm:$0xff] %vm13799_vm3, %v11132_v53  ;;  %1389 = vst.msk [vmem:[#allocation2 + $0xa0] sm:$0xff] %vm13799_vm3, %v11132_v53  ;;  %v11133_v24 = vpack.c.bf16 %v1256_v5, %v1255_v48  ;;  %v1190_v17 = vmax.f32 %v13746_v13, %v1146_v57 }
 0x190   :  { %1404 = vst.msk [vmem:[#allocation2 + $0xc0] sm:$0xff] %vm13799_vm3, %v11132_v53  ;;  %2936 = vmatpush1.bf16.msra.mxu0 %v11764_v43  ;;  %4515 = vmatpush1.bf16.msra.mxu1 %v11767_v4  ;;  %v1148_v60 = vpop.f32.mrb[50].mxu1  ;;  %v1229_v31 = vadd.f32 %v13785_v55, %v1189_v7  ;;  %v11781_v13 = vld [vmem:[%s16709_s3 + $0x154] ss:$8 sps:$4 sm:$0xff]   ;;  %v11794_v5 = vld [vmem:[%s16709_s3 + $0x770] ss:$8 sps:$4 sm:$0xff]  }
 0x191   :  { %v1191_v18 = vmax.f32 %v13748_v30, %v1148_v60  ;;  %v1150_v61 = vpop.f32.mrb[51].mxu1  ;;  %2900 = vmatprep.mubr.bf16.mxu0 %v11770_v58  ;;  %2937 = vmatprep.subr.bf16.mxu0 %v11774_v37  ;;  %1385 = vst.msk [vmem:[#allocation2 + $0x88] sm:$0xff] %vm13799_vm3, %v11133_v24  ;;  %1390 = vst.msk [vmem:[#allocation2 + $0xa8] sm:$0xff] %vm13799_vm3, %v11133_v24  ;;  %v1230_v30 = vadd.f32 %v13789_v56, %v1190_v17  ;;  %v11791_v37 = vld [vmem:[%s16709_s3 + $0x170] ss:$8 sps:$4 sm:$0xff]  }
 0x192   :  { %1405 = vst.msk [vmem:[#allocation2 + $0xc8] sm:$0xff] %vm13799_vm3, %v11133_v24  ;;  %v1192_v20 = vmax.f32 %v13750_v34, %v1150_v61  ;;  %4479 = vmatprep.mubr.bf16.mxu1 %v11770_v58  ;;  %4516 = vmatprep.subr.bf16.mxu1 %v11777_v11  ;;  %v1257_v32 = vmax.f32 %v1229_v31, 0.0  ;;  %v11782_v34 = vld [vmem:[%s16709_s3 + $0x750] ss:$8 sps:$4 sm:$0xff]   ;;  %v11804_v58 = vld [vmem:[%s16709_s3 + $0x784] ss:$8 sps:$4 sm:$0xff]  }
 0x193   :  { %v1231_v10 = vadd.f32 %v13785_v55, %v1191_v18  ;;  %2901 = vmatmul.mubr.bf16.gmra.mrb[56].mxu0 %v11778_v16  ;;  %4480 = vmatmul.mubr.bf16.gmra.mrb[64].mxu1 %v11778_v16  ;;  %v1258_v22 = vmax.f32 %v1230_v30, 0.0  ;;  %v11802_v18 = vld [vmem:[%s16709_s3 + $0x780] ss:$8 sps:$4 sm:$0xff]   ;;  %v11811_v30 = vld [vmem:[%s16709_s3 + $0x794] ss:$8 sps:$4 sm:$0xff]  }
 0x194   :  { %v1232_v63 = vadd.f32 %v13789_v56, %v1192_v20  ;;  %2938 = vmatpush1.bf16.msra.mxu0 %v11772_v47  ;;  %4517 = vmatpush1.bf16.msra.mxu1 %v11775_v8 }
 0x195   :  { %v1259_v23 = vmax.f32 %v1231_v10, 0.0  ;;  %2939 = vmatprep.subr.bf16.mxu0 %v11781_v13  ;;  %4518 = vmatprep.subr.bf16.mxu1 %v11784_v19  ;;  %v11134_v0 = vpack.c.bf16 %v1258_v22, %v1257_v32  ;;  %v1154_v27 = vpop.f32.mrb[52].mxu1  ;;  %v11806_v22 = vld [vmem:[%s16709_s3 + $0x190] ss:$8 sps:$4 sm:$0xff]  }
 0x196   :  { %v1260_v26 = vmax.f32 %v1232_v63, 0.0  ;;  %v1193_v49 = vmax.f32 %v13755_v15, %v1154_v27  ;;  %v1156_v14 = vpop.f32.mrb[53].mxu1  ;;  %v11813_v27 = vld [vmem:[%s16709_s3 + $0x1a0] ss:$8 sps:$4 sm:$0xff]  }
 0x197   :  { %1397 = vst.msk [vmem:[#allocation2 + $0xb0] sm:$0xff] %vm13799_vm3, %v11134_v0  ;;  %1406 = vst.msk [vmem:[#allocation2 + $0xd0] sm:$0xff] %vm13799_vm3, %v11134_v0  ;;  %v1194_v35 = vmax.f32 %v13758_v62, %v1156_v14  ;;  %v1158_v15 = vpop.f32.mrb[54].mxu1  ;;  %v11796_v62 = vld [vmem:[%s16709_s3 + $0x774] ss:$8 sps:$4 sm:$0xff]  }
 0x198   :  { %1421 = vst.msk [vmem:[#allocation2 + $0xf0] sm:$0xff] %vm13799_vm3, %v11134_v0  ;;  %v11135_v38 = vpack.c.bf16 %v1260_v26, %v1259_v23  ;;  %2940 = vmatpush1.bf16.msra.mxu0 %v11779_v12  ;;  %4519 = vmatpush1.bf16.msra.mxu1 %v11782_v34  ;;  %v1233_v39 = vadd.f32 %v13785_v55, %v1193_v49  ;;  %v1160_v43 = vpop.f32.mrb[55].mxu1  ;;  %v11815_v34 = vld [vmem:[%s16709_s3 + $0x1a4] ss:$8 sps:$4 sm:$0xff]   ;;  %v11816_v49 = vld [vmem:[%s16709_s3 + $0x7a0] ss:$8 sps:$4 sm:$0xff]  }
 0x199   :  { %v1195_v40 = vmax.f32 %v13760_v21, %v1158_v15  ;;  %2941 = vmatprep.subr.bf16.mxu0 %v11787_v45  ;;  %4520 = vmatprep.subr.bf16.mxu1 %v11790_v25  ;;  %v1234_v52 = vadd.f32 %v13789_v56, %v1194_v35  ;;  %v1196_v21 = vmax.f32 %v13762_v9, %v1160_v43  ;;  %v11801_v9 = vld [vmem:[%s16709_s3 + $0x184] ss:$8 sps:$4 sm:$0xff]   ;;  %v11822_v35 = vld [vmem:[%s16709_s3 + $0x1b4] ss:$8 sps:$4 sm:$0xff]   ;;  %v11829_v43 = vld [vmem:[%s16709_s3 + $0x7c0] ss:$8 sps:$4 sm:$0xff]  }
 0x19a   :  { %1402 = vst.msk [vmem:[#allocation2 + $0xb8] sm:$0xff] %vm13799_vm3, %v11135_v38  ;;  %1407 = vst.msk [vmem:[#allocation2 + $0xd8] sm:$0xff] %vm13799_vm3, %v11135_v38  ;;  %v1261_v46 = vmax.f32 %v1233_v39, 0.0  ;;  %v11818_v23 = vld [vmem:[%s16709_s3 + $0x7a4] ss:$8 sps:$4 sm:$0xff]  }
 0x19b   :  { %1422 = vst.msk [vmem:[#allocation2 + $0xf8] sm:$0xff] %vm13799_vm3, %v11135_v38  ;;  %v1235_v4 = vadd.f32 %v13785_v55, %v1195_v40  ;;  %v1262_v48 = vmax.f32 %v1234_v52, 0.0  ;;  %v1236_v53 = vadd.f32 %v13789_v56, %v1196_v21  ;;  %v11820_v38 = vld [vmem:[%s16709_s3 + $0x1b0] ss:$8 sps:$4 sm:$0xff]   ;;  %v11825_v15 = vld [vmem:[%s16709_s3 + $0x7b4] ss:$8 sps:$4 sm:$0xff]  }
 0x19c   :  { %2942 = vmatpush1.bf16.msra.mxu0 %v11785_v1  ;;  %4521 = vmatpush1.bf16.msra.mxu1 %v11788_v51  ;;  %v1449_v1 = vld [vmem:[#allocation2 + $0x38] sm:$0xff]  ;;  %v11831_v39 = vld [vmem:[%s16709_s3 + $0x7c4] ss:$8 sps:$4 sm:$0xff]   ;;  %v11826_v40 = vld [vmem:[%s16709_s3 + $0x1c0] ss:$8 sps:$4 sm:$0xff]  }
 0x19d   :  { %v1263_v44 = vmax.f32 %v1235_v4, 0.0  ;;  %2943 = vmatprep.subr.bf16.mxu0 %v11793_v36  ;;  %4522 = vmatprep.subr.bf16.mxu1 %v11796_v62  ;;  %v11136_v11 = vpack.c.bf16 %v1262_v48, %v1261_v46  ;;  %v1264_v7 = vmax.f32 %v1236_v53, 0.0  ;;  %v1164_v57 = vpop.f32.mrb[56].mxu1  ;;  %v14083_v29 = vcombine.high %v13836_v59, %v1449_v1  ;;  %v11823_v51 = vld [vmem:[%s16709_s3 + $0x7b0] ss:$8 sps:$4 sm:$0xff]  }
 0x19e   :  { %v1197_v16 = vmax.f32 %v13769_v33, %v1164_v57  ;;  %v1166_v24 = vpop.f32.mrb[57].mxu1  ;;  %v11799_v33 = vld [vmem:[%s16709_s3 + $0x180] ss:$8 sps:$4 sm:$0xff]   ;;  %v11828_v36 = vld [vmem:[%s16709_s3 + $0x1c4] ss:$8 sps:$4 sm:$0xff]  }
 0x19f   :  { %v11797_v17 = vld [vmem:[#allocation2 + $0xc4] ss:$48 sps:$4 sm:$0xff]   ;;  %v11805_v60 = vld [vmem:[#allocation2 + $0xc0] ss:$48 sps:$4 sm:$0xff]   ;;  %1414 = vst.msk [vmem:[#allocation2 + $0xe0] sm:$0xff] %vm13799_vm3, %v11136_v11  ;;  %1423 = vst.msk [vmem:[#allocation2 + $0x100] sm:$0xff] %vm13799_vm3, %v11136_v11  ;;  %v11137_v47 = vpack.c.bf16 %v1264_v7, %v1263_v44  ;;  %v1198_v8 = vmax.f32 %v13773_v41, %v1166_v24 }
 0x1a0   :  { %1438 = vst.msk [vmem:[#allocation2 + $0x120] sm:$0xff] %vm13799_vm3, %v11136_v11  ;;  %2944 = vmatpush1.bf16.msra.mxu0 %v11791_v37  ;;  %4523 = vmatpush1.bf16.msra.mxu1 %v11794_v5  ;;  %v1168_v31 = vpop.f32.mrb[58].mxu1  ;;  %v1237_v61 = vadd.f32 %v13785_v55, %v1197_v16  ;;  %v11808_v41 = vld [vmem:[%s16709_s3 + $0x194] ss:$8 sps:$4 sm:$0xff]   ;;  %v11832_v21 = vld [vmem:[%s16709_s3 + $0x1d0] ss:$8 sps:$4 sm:$0xff]  }
 0x1a1   :  { %v1199_v13 = vmax.f32 %v13779_v3, %v1168_v31  ;;  %v1170_v19 = vpop.f32.mrb[59].mxu1  ;;  %2910 = vmatprep.mubr.bf16.mxu0 %v11797_v17  ;;  %2945 = vmatprep.subr.bf16.mxu0 %v11801_v9  ;;  %1419 = vst.msk [vmem:[#allocation2 + $0xe8] sm:$0xff] %vm13799_vm3, %v11137_v47  ;;  %1424 = vst.msk [vmem:[#allocation2 + $0x108] sm:$0xff] %vm13799_vm3, %v11137_v47  ;;  %v1238_v3 = vadd.f32 %v13789_v56, %v1198_v8  ;;  %v11834_v62 = vld [vmem:[%s16709_s3 + $0x1d4] ss:$8 sps:$4 sm:$0xff]  }
 0x1a2   :  { %1439 = vst.msk [vmem:[#allocation2 + $0x128] sm:$0xff] %vm13799_vm3, %v11137_v47  ;;  %v1200_v20 = vmax.f32 %v13781_v42, %v1170_v19  ;;  %4489 = vmatprep.mubr.bf16.mxu1 %v11797_v17  ;;  %4524 = vmatprep.subr.bf16.mxu1 %v11804_v58  ;;  %v1265_v32 = vmax.f32 %v1237_v61, 0.0  ;;  %v11809_v42 = vld [vmem:[%s16709_s3 + $0x790] ss:$8 sps:$4 sm:$0xff]   ;;  %v11837_v52 = vld [vmem:[%s16709_s3 + $0x7d4] ss:$8 sps:$4 sm:$0xff]   ;;  %v14157_v47 = vcombine.low %v13836_v59, %v1449_v1 }
 0x1a3   :  { %v1239_v10 = vadd.f32 %v13785_v55, %v1199_v13  ;;  %2911 = vmatmul.mubr.bf16.gmra.mrb[60].mxu0 %v11805_v60  ;;  %4490 = vmatmul.mubr.bf16.gmra.mrb[68].mxu1 %v11805_v60  ;;  %v1266_v63 = vmax.f32 %v1238_v3, 0.0  ;;  %v11835_v46 = vld [vmem:[%s16709_s3 + $0x7d0] ss:$8 sps:$4 sm:$0xff]   ;;  %v11840_v4 = vld [vmem:[%s16709_s3 + $0x1e4] ss:$8 sps:$4 sm:$0xff]  }
 0x1a4   :  { %v1240_v12 = vadd.f32 %v13789_v56, %v1200_v20  ;;  %2946 = vmatpush1.bf16.msra.mxu0 %v11799_v33  ;;  %4525 = vmatpush1.bf16.msra.mxu1 %v11802_v18  ;;  %v11843_v37 = vld [vmem:[%s16709_s3 + $0x7e4] ss:$8 sps:$4 sm:$0xff]   ;;  %v11838_v48 = vld [vmem:[%s16709_s3 + $0x1e0] ss:$8 sps:$4 sm:$0xff]   ;;  %v11846_v5 = vld [vmem:[%s16709_s3 + $0x1f4] ss:$8 sps:$4 sm:$0xff]  }
 0x1a5   :  { %v1267_v55 = vmax.f32 %v1239_v10, 0.0  ;;  %2947 = vmatprep.subr.bf16.mxu0 %v11808_v41  ;;  %4526 = vmatprep.subr.bf16.mxu1 %v11811_v30  ;;  %v11138_v45 = vpack.c.bf16 %v1266_v63, %v1265_v32  ;;  %v11841_v53 = vld [vmem:[%s16709_s3 + $0x7e0] ss:$8 sps:$4 sm:$0xff]   ;;  %v11849_v9 = vld [vmem:[%s16709_s3 + $0x7f4] ss:$8 sps:$4 sm:$0xff]  }
 0x1a6   :  { %v1268_v25 = vmax.f32 %v1240_v12, 0.0  ;;  %v11844_v44 = vld [vmem:[%s16709_s3 + $0x1f0] ss:$8 sps:$4 sm:$0xff]   ;;  %v11852_v7 = vld [vmem:[%s16709_s3 + $0x204] ss:$8 sps:$4 sm:$0xff]  }
 0x1a7   :  { %v1478_v56 = vld [vmem:[#allocation2 + $0x120] sm:$0xff]  ;;  %1431 = vst.msk [vmem:[#allocation2 + $0x110] sm:$0xff] %vm13799_vm3, %v11138_v45  ;;  %1440 = vst.msk [vmem:[#allocation2 + $0x130] sm:$0xff] %vm13799_vm3, %v11138_v45  ;;  %v11847_v11 = vld [vmem:[%s16709_s3 + $0x7f0] ss:$8 sps:$4 sm:$0xff]  }
 0x1a8   :  { %v11139_v0 = vpack.c.bf16 %v1268_v25, %v1267_v55  ;;  %2948 = vmatpush1.bf16.msra.mxu0 %v11806_v22  ;;  %4527 = vmatpush1.bf16.msra.mxu1 %v11809_v42  ;;  %v14055_v26 = vcombine.high %v1478_v56, %v1478_v56  ;;  %v14063_v14 = vcombine.low %v1478_v56, %v1478_v56  ;;  %v11855_v57 = vld [vmem:[%s16709_s3 + $0x804] ss:$8 sps:$4 sm:$0xff]   ;;  %v11850_v58 = vld [vmem:[%s16709_s3 + $0x200] ss:$8 sps:$4 sm:$0xff]   ;;  %v11860_v17 = vld [vmem:[%s16709_s3 + $0x214] ss:$8 sps:$4 sm:$0xff]  }
 0x1a9   :  { %2949 = vmatprep.subr.bf16.mxu0 %v11815_v34  ;;  %4528 = vmatprep.subr.bf16.mxu1 %v11818_v23  ;;  %v11853_v16 = vld [vmem:[%s16709_s3 + $0x800] ss:$8 sps:$4 sm:$0xff]   ;;  %v11856_v24 = vld [vmem:[#allocation2 + $0x6c] ss:$48 sps:$4 sm:$0xff]   ;;  %v11858_v8 = vld [vmem:[%s16709_s3 + $0x210] ss:$8 sps:$4 sm:$0xff]  }
 0x1aa   :  { %1436 = vst.msk [vmem:[#allocation2 + $0x118] sm:$0xff] %vm13799_vm3, %v11139_v0  ;;  %1441 = vst.msk [vmem:[#allocation2 + $0x138] sm:$0xff] %vm13799_vm3, %v11139_v0  ;;  %2920 = vmatprep.mubr.bf16.mxu0 %v14055_v26  ;;  %4499 = vmatprep.mubr.bf16.mxu1 %v14055_v26  ;;  %v11863_v60 = vld [vmem:[%s16709_s3 + $0x814] ss:$8 sps:$4 sm:$0xff]   ;;  %v11861_v31 = vld [vmem:[%s16709_s3 + $0x810] ss:$8 sps:$4 sm:$0xff]  }
 0x1ab   :  { %2921 = vmatmul.mubr.bf16.gmra.mrb[64].mxu0 %v14063_v14  ;;  %4500 = vmatmul.mubr.bf16.gmra.mrb[72].mxu1 %v14063_v14  ;;  %v11867_v59 = vld [vmem:[%s16709_s3 + $0x224] ss:$8 sps:$4 sm:$0xff]   ;;  %v11864_v18 = vld [vmem:[#allocation2 + $0x68] ss:$48 sps:$4 sm:$0xff]   ;;  %v11875_v41 = vld [vmem:[%s16709_s3 + $0x234] ss:$8 sps:$4 sm:$0xff]  }
 0x1ac   :  { %2950 = vmatpush1.bf16.msra.mxu0 %v11813_v27  ;;  %4529 = vmatpush1.bf16.msra.mxu1 %v11816_v49  ;;  %v11870_v33 = vld [vmem:[%s16709_s3 + $0x824] ss:$8 sps:$4 sm:$0xff]   ;;  %v11865_v61 = vld [vmem:[%s16709_s3 + $0x220] ss:$8 sps:$4 sm:$0xff]   ;;  %v11878_v30 = vld [vmem:[%s16709_s3 + $0x834] ss:$8 sps:$4 sm:$0xff]  }
 0x1ad   :  { %2961 = vmatprep.mubr.bf16.mxu0 %v14083_v29  ;;  %4540 = vmatprep.mubr.bf16.mxu1 %v14083_v29  ;;  %v11868_v13 = vld [vmem:[%s16709_s3 + $0x820] ss:$8 sps:$4 sm:$0xff]   ;;  %v11871_v19 = vld [vmem:[#allocation2 + $0xcc] ss:$48 sps:$4 sm:$0xff]   ;;  %v11873_v3 = vld [vmem:[%s16709_s3 + $0x230] ss:$8 sps:$4 sm:$0xff]  }
 0x1ae   :  { %2951 = vmatprep.subr.bf16.mxu0 %v11822_v35  ;;  %4530 = vmatprep.subr.bf16.mxu1 %v11825_v15  ;;  %v11876_v20 = vld [vmem:[%s16709_s3 + $0x830] ss:$8 sps:$4 sm:$0xff]   ;;  %v11882_v32 = vld [vmem:[%s16709_s3 + $0x244] ss:$8 sps:$4 sm:$0xff]   ;;  %v11880_v22 = vld [vmem:[%s16709_s3 + $0x240] ss:$8 sps:$4 sm:$0xff]  }
 0x1af   :  { %v11885_v10 = vld [vmem:[%s16709_s3 + $0x844] ss:$8 sps:$4 sm:$0xff]   ;;  %v11883_v63 = vld [vmem:[%s16709_s3 + $0x840] ss:$8 sps:$4 sm:$0xff]   ;;  %v11889_v34 = vld [vmem:[%s16709_s3 + $0x254] ss:$8 sps:$4 sm:$0xff]  }
 0x1b0   :  { %2952 = vmatpush1.bf16.msra.mxu0 %v11820_v38  ;;  %4531 = vmatpush1.bf16.msra.mxu1 %v11823_v51  ;;  %v1479_v12 = vld [vmem:[#allocation2 + $0x128] sm:$0xff]  ;;  %v11892_v55 = vld [vmem:[%s16709_s3 + $0x854] ss:$8 sps:$4 sm:$0xff]   ;;  %v11887_v45 = vld [vmem:[%s16709_s3 + $0x250] ss:$8 sps:$4 sm:$0xff]  }
 0x1b1   :  { %2953 = vmatprep.subr.bf16.mxu0 %v11828_v36  ;;  %4532 = vmatprep.subr.bf16.mxu1 %v11831_v39  ;;  %v11879_v42 = vld [vmem:[#allocation2 + $0xc8] ss:$48 sps:$4 sm:$0xff]   ;;  %v14209_v23 = vcombine.high %v1479_v12, %v1479_v12  ;;  %v11896_v56 = vld [vmem:[%s16709_s3 + $0x264] ss:$8 sps:$4 sm:$0xff]   ;;  %v11905_v38 = vld [vmem:[%s16709_s3 + $0x274] ss:$8 sps:$4 sm:$0xff]   ;;  %v14237_v15 = vcombine.low %v1479_v12, %v1479_v12 }
 0x1b2   :  { %v11890_v25 = vld [vmem:[%s16709_s3 + $0x850] ss:$8 sps:$4 sm:$0xff]   ;;  %v11899_v0 = vld [vmem:[%s16709_s3 + $0x864] ss:$8 sps:$4 sm:$0xff]   ;;  %v11894_v27 = vld [vmem:[%s16709_s3 + $0x260] ss:$8 sps:$4 sm:$0xff]  }
 0x1b3   :  { %v11897_v49 = vld [vmem:[%s16709_s3 + $0x860] ss:$8 sps:$4 sm:$0xff]   ;;  %v11902_v1 = vld [vmem:[#allocation2 + $0x14] ss:$48 sps:$4 sm:$0xff]   ;;  %v11903_v51 = vld [vmem:[%s16709_s3 + $0x270] ss:$8 sps:$4 sm:$0xff]  }
 0x1b4   :  { %2954 = vmatpush1.bf16.msra.mxu0 %v11826_v40  ;;  %4533 = vmatpush1.bf16.msra.mxu1 %v11829_v43  ;;  %v11908_v35 = vld [vmem:[%s16709_s3 + $0x874] ss:$8 sps:$4 sm:$0xff]   ;;  %v11906_v36 = vld [vmem:[%s16709_s3 + $0x870] ss:$8 sps:$4 sm:$0xff]   ;;  %v11911_v39 = vld [vmem:[%s16709_s3 + $0x284] ss:$8 sps:$4 sm:$0xff]  }
 0x1b5   :  { %2955 = vmatprep.subr.bf16.mxu0 %v11834_v62  ;;  %4534 = vmatprep.subr.bf16.mxu1 %v11837_v52  ;;  %v11914_v40 = vld [vmem:[%s16709_s3 + $0x884] ss:$8 sps:$4 sm:$0xff]   ;;  %v11909_v43 = vld [vmem:[%s16709_s3 + $0x280] ss:$8 sps:$4 sm:$0xff]   ;;  %v11917_v52 = vld [vmem:[%s16709_s3 + $0x294] ss:$8 sps:$4 sm:$0xff]  }
 0x1b6   :  { %v11912_v62 = vld [vmem:[%s16709_s3 + $0x880] ss:$8 sps:$4 sm:$0xff]   ;;  %v11967_v12 = vld [vmem:[%s16709_s3 + $0x314] ss:$8 sps:$4 sm:$0xff]  }
 0x1b8   :  { %2956 = vmatpush1.bf16.msra.mxu0 %v11832_v21  ;;  %4535 = vmatpush1.bf16.msra.mxu1 %v11835_v46  ;;  %v11920_v21 = vld [vmem:[%s16709_s3 + $0x894] ss:$8 sps:$4 sm:$0xff]   ;;  %v11915_v46 = vld [vmem:[%s16709_s3 + $0x290] ss:$8 sps:$4 sm:$0xff]  }
 0x1b9   :  { %2957 = vmatprep.subr.bf16.mxu0 %v11840_v4  ;;  %4536 = vmatprep.subr.bf16.mxu1 %v11843_v37  ;;  %v11918_v4 = vld [vmem:[%s16709_s3 + $0x890] ss:$8 sps:$4 sm:$0xff]   ;;  %v11923_v37 = vld [vmem:[%s16709_s3 + $0x2a4] ss:$8 sps:$4 sm:$0xff]  }
 0x1bc   :  { %2958 = vmatpush1.bf16.msra.mxu0 %v11838_v48  ;;  %4537 = vmatpush1.bf16.msra.mxu1 %v11841_v53  ;;  %v11926_v48 = vld [vmem:[%s16709_s3 + $0x8a4] ss:$8 sps:$4 sm:$0xff]   ;;  %v11921_v53 = vld [vmem:[%s16709_s3 + $0x2a0] ss:$8 sps:$4 sm:$0xff]  }
 0x1bd   :  { %2959 = vmatprep.subr.bf16.mxu0 %v11846_v5  ;;  %4538 = vmatprep.subr.bf16.mxu1 %v11849_v9  ;;  %v11924_v5 = vld [vmem:[%s16709_s3 + $0x8a0] ss:$8 sps:$4 sm:$0xff]   ;;  %v11929_v9 = vld [vmem:[%s16709_s3 + $0x2b4] ss:$8 sps:$4 sm:$0xff]  }
 0x1c0   :  { %2960 = vmatpush1.bf16.msra.mxu0 %v11844_v44  ;;  %4539 = vmatpush1.bf16.msra.mxu1 %v11847_v11  ;;  %v11932_v44 = vld [vmem:[%s16709_s3 + $0x8b4] ss:$8 sps:$4 sm:$0xff]   ;;  %v11927_v11 = vld [vmem:[%s16709_s3 + $0x2b0] ss:$8 sps:$4 sm:$0xff]  }
 0x1c1   :  { %3000 = vmatprep.subr.bf16.mxu0 %v11852_v7  ;;  %4579 = vmatprep.subr.bf16.mxu1 %v11855_v57  ;;  %v11930_v7 = vld [vmem:[%s16709_s3 + $0x8b0] ss:$8 sps:$4 sm:$0xff]   ;;  %v11935_v57 = vld [vmem:[%s16709_s3 + $0x2c4] ss:$8 sps:$4 sm:$0xff]  }
 0x1c3   :  { %2962 = vmatmul.mubr.bf16.vlgmr.msra.gmra.mrb[52].mxu0 %v14157_v47  ;;  %4541 = vmatmul.mubr.bf16.vlgmr.msra.gmra.mrb[60].mxu1 %v14157_v47 }
 0x1c4   :  { %2971 = vmatprep.mubr.bf16.mxu0 %v11856_v24  ;;  %3001 = vmatpush1.bf16.msra.mxu0 %v11850_v58  ;;  %v11938_v58 = vld [vmem:[%s16709_s3 + $0x8c4] ss:$8 sps:$4 sm:$0xff]  }
 0x1c5   :  { %4550 = vmatprep.mubr.bf16.mxu1 %v11856_v24  ;;  %4580 = vmatpush1.bf16.msra.mxu1 %v11853_v16  ;;  %v11933_v16 = vld [vmem:[%s16709_s3 + $0x2c0] ss:$8 sps:$4 sm:$0xff]  }
 0x1c6   :  { %3002 = vmatprep.subr.bf16.mxu0 %v11860_v17  ;;  %4581 = vmatprep.subr.bf16.mxu1 %v11863_v60  ;;  %v11936_v24 = vld [vmem:[%s16709_s3 + $0x8c0] ss:$8 sps:$4 sm:$0xff]   ;;  %v11941_v17 = vld [vmem:[%s16709_s3 + $0x2d4] ss:$8 sps:$4 sm:$0xff]  }
 0x1c7   :  { %v11944_v60 = vld [vmem:[%s16709_s3 + $0x8d4] ss:$8 sps:$4 sm:$0xff]  }
 0x1c8   :  { %3003 = vmatpush1.bf16.msra.mxu0 %v11858_v8  ;;  %v11939_v8 = vld [vmem:[%s16709_s3 + $0x2d0] ss:$8 sps:$4 sm:$0xff]  }
 0x1c9   :  { %4582 = vmatpush1.bf16.msra.mxu1 %v11861_v31  ;;  %3004 = vmatprep.subr.bf16.mxu0 %v11867_v59  ;;  %v11942_v31 = vld [vmem:[%s16709_s3 + $0x8d0] ss:$8 sps:$4 sm:$0xff]   ;;  %v11947_v59 = vld [vmem:[%s16709_s3 + $0x2e4] ss:$8 sps:$4 sm:$0xff]  }
 0x1ca   :  { %4583 = vmatprep.subr.bf16.mxu1 %v11870_v33  ;;  %v11950_v33 = vld [vmem:[%s16709_s3 + $0x8e4] ss:$8 sps:$4 sm:$0xff]  }
 0x1cb   :  { %2972 = vmatmul.mubr.bf16.gmra.mrb[56].mxu0 %v11864_v18  ;;  %4551 = vmatmul.mubr.bf16.gmra.mrb[64].mxu1 %v11864_v18  ;;  %v11945_v18 = vld [vmem:[%s16709_s3 + $0x2e0] ss:$8 sps:$4 sm:$0xff]  }
 0x1cc   :  { %2981 = vmatprep.mubr.bf16.mxu0 %v11871_v19  ;;  %3005 = vmatpush1.bf16.msra.mxu0 %v11865_v61  ;;  %v11948_v61 = vld [vmem:[%s16709_s3 + $0x8e0] ss:$8 sps:$4 sm:$0xff]  }
 0x1cd   :  { %4560 = vmatprep.mubr.bf16.mxu1 %v11871_v19  ;;  %4584 = vmatpush1.bf16.msra.mxu1 %v11868_v13  ;;  %v11953_v13 = vld [vmem:[%s16709_s3 + $0x2f4] ss:$8 sps:$4 sm:$0xff]  }
 0x1ce   :  { %3006 = vmatprep.subr.bf16.mxu0 %v11875_v41  ;;  %4585 = vmatprep.subr.bf16.mxu1 %v11878_v30  ;;  %v11956_v19 = vld [vmem:[%s16709_s3 + $0x8f4] ss:$8 sps:$4 sm:$0xff]   ;;  %v11951_v41 = vld [vmem:[%s16709_s3 + $0x2f0] ss:$8 sps:$4 sm:$0xff]  }
 0x1cf   :  { %v11954_v30 = vld [vmem:[%s16709_s3 + $0x8f0] ss:$8 sps:$4 sm:$0xff]  }
 0x1d0   :  { %3007 = vmatpush1.bf16.msra.mxu0 %v11873_v3  ;;  %v11959_v3 = vld [vmem:[%s16709_s3 + $0x304] ss:$8 sps:$4 sm:$0xff]  }
 0x1d1   :  { %4586 = vmatpush1.bf16.msra.mxu1 %v11876_v20  ;;  %3008 = vmatprep.subr.bf16.mxu0 %v11882_v32  ;;  %v11962_v20 = vld [vmem:[%s16709_s3 + $0x904] ss:$8 sps:$4 sm:$0xff]   ;;  %v11900_v32 = vld [vmem:[#allocation2 + $0x10] ss:$48 sps:$4 sm:$0xff]  }
 0x1d2   :  { %4587 = vmatprep.subr.bf16.mxu1 %v11885_v10  ;;  %v11957_v10 = vld [vmem:[%s16709_s3 + $0x300] ss:$8 sps:$4 sm:$0xff]  }
 0x1d3   :  { %2982 = vmatmul.mubr.bf16.gmra.mrb[60].mxu0 %v11879_v42  ;;  %4561 = vmatmul.mubr.bf16.gmra.mrb[68].mxu1 %v11879_v42  ;;  %v11970_v42 = vld [vmem:[%s16709_s3 + $0x914] ss:$8 sps:$4 sm:$0xff]  }
 0x1d4   :  { %2991 = vmatprep.mubr.bf16.mxu0 %v14209_v23  ;;  %3009 = vmatpush1.bf16.msra.mxu0 %v11880_v22  ;;  %v11960_v22 = vld [vmem:[%s16709_s3 + $0x900] ss:$8 sps:$4 sm:$0xff]  }
 0x1d5   :  { %4570 = vmatprep.mubr.bf16.mxu1 %v14209_v23  ;;  %4588 = vmatpush1.bf16.msra.mxu1 %v11883_v63  ;;  %v11963_v63 = vld [vmem:[#allocation2 + $0x74] ss:$48 sps:$4 sm:$0xff]  }
 0x1d6   :  { %3010 = vmatprep.subr.bf16.mxu0 %v11889_v34  ;;  %4589 = vmatprep.subr.bf16.mxu1 %v11892_v55  ;;  %v11965_v34 = vld [vmem:[%s16709_s3 + $0x310] ss:$8 sps:$4 sm:$0xff]  }
 0x1d7   :  { %v11968_v55 = vld [vmem:[%s16709_s3 + $0x910] ss:$8 sps:$4 sm:$0xff]  }
 0x1d8   :  { %3011 = vmatpush1.bf16.msra.mxu0 %v11887_v45  ;;  %v11974_v45 = vld [vmem:[%s16709_s3 + $0x324] ss:$8 sps:$4 sm:$0xff]  }
 0x1d9   :  { %4590 = vmatpush1.bf16.msra.mxu1 %v11890_v25  ;;  %3012 = vmatprep.subr.bf16.mxu0 %v11896_v56  ;;  %v11977_v25 = vld [vmem:[%s16709_s3 + $0x924] ss:$8 sps:$4 sm:$0xff]   ;;  %v11972_v56 = vld [vmem:[%s16709_s3 + $0x320] ss:$8 sps:$4 sm:$0xff]  }
 0x1da   :  { %4591 = vmatprep.subr.bf16.mxu1 %v11899_v0  ;;  %v11971_v0 = vld [vmem:[#allocation2 + $0x70] ss:$48 sps:$4 sm:$0xff]  }
 0x1db   :  { %2992 = vmatmul.mubr.bf16.gmra.mrb[64].mxu0 %v14237_v15  ;;  %4571 = vmatmul.mubr.bf16.gmra.mrb[72].mxu1 %v14237_v15 }
 0x1dc   :  { %3013 = vmatpush1.bf16.msra.mxu0 %v11894_v27  ;;  %3032 = vmatprep.mubr.bf16.mxu0 %v11902_v1  ;;  %v11975_v27 = vld [vmem:[%s16709_s3 + $0x920] ss:$8 sps:$4 sm:$0xff]  }
 0x1dd   :  { %4592 = vmatpush1.bf16.msra.mxu1 %v11897_v49  ;;  %4611 = vmatprep.mubr.bf16.mxu1 %v11902_v1  ;;  %v11982_v49 = vld [vmem:[%s16709_s3 + $0x334] ss:$8 sps:$4 sm:$0xff]  }
 0x1de   :  { %3014 = vmatprep.subr.bf16.mxu0 %v11905_v38  ;;  %4593 = vmatprep.subr.bf16.mxu1 %v11908_v35  ;;  %v11978_v1 = vld [vmem:[#allocation2 + $0xd4] ss:$48 sps:$4 sm:$0xff]   ;;  %v11980_v35 = vld [vmem:[%s16709_s3 + $0x330] ss:$8 sps:$4 sm:$0xff]  }
 0x1df   :  { %v11985_v38 = vld [vmem:[%s16709_s3 + $0x934] ss:$8 sps:$4 sm:$0xff]  }
 0x1e0   :  { %3015 = vmatpush1.bf16.msra.mxu0 %v11903_v51  ;;  %v11983_v51 = vld [vmem:[%s16709_s3 + $0x930] ss:$8 sps:$4 sm:$0xff]  }
 0x1e1   :  { %4594 = vmatpush1.bf16.msra.mxu1 %v11906_v36  ;;  %3016 = vmatprep.subr.bf16.mxu0 %v11911_v39  ;;  %v11989_v36 = vld [vmem:[%s16709_s3 + $0x344] ss:$8 sps:$4 sm:$0xff]  }
 0x1e2   :  { %4595 = vmatprep.subr.bf16.mxu1 %v11914_v40  ;;  %v11992_v39 = vld [vmem:[%s16709_s3 + $0x944] ss:$8 sps:$4 sm:$0xff]   ;;  %v1480_v40 = vld [vmem:[#allocation2 + $0x130] sm:$0xff] }
 0x1e4   :  { %3017 = vmatpush1.bf16.msra.mxu0 %v11909_v43  ;;  %v11987_v43 = vld [vmem:[%s16709_s3 + $0x340] ss:$8 sps:$4 sm:$0xff]  }
 0x1e5   :  { %4596 = vmatpush1.bf16.msra.mxu1 %v11912_v62  ;;  %3018 = vmatprep.subr.bf16.mxu0 %v11917_v52  ;;  %v11990_v62 = vld [vmem:[%s16709_s3 + $0x940] ss:$8 sps:$4 sm:$0xff]   ;;  %v11996_v52 = vld [vmem:[%s16709_s3 + $0x354] ss:$8 sps:$4 sm:$0xff]  }
 0x1e6   :  { %4597 = vmatprep.subr.bf16.mxu1 %v11920_v21  ;;  %v11986_v21 = vld [vmem:[#allocation2 + $0xd0] ss:$48 sps:$4 sm:$0xff]  }
 0x1e8   :  { %3019 = vmatpush1.bf16.msra.mxu0 %v11915_v46  ;;  %v11999_v46 = vld [vmem:[%s16709_s3 + $0x954] ss:$8 sps:$4 sm:$0xff]  }
 0x1e9   :  { %4598 = vmatpush1.bf16.msra.mxu1 %v11918_v4  ;;  %3020 = vmatprep.subr.bf16.mxu0 %v11923_v37  ;;  %v14409_v4 = vcombine.high %v1480_v40, %v1480_v40  ;;  %v11994_v37 = vld [vmem:[%s16709_s3 + $0x350] ss:$8 sps:$4 sm:$0xff]  }
 0x1ea   :  { %4599 = vmatprep.subr.bf16.mxu1 %v11926_v48  ;;  %v11997_v48 = vld [vmem:[%s16709_s3 + $0x950] ss:$8 sps:$4 sm:$0xff]  }
 0x1ec   :  { %3021 = vmatpush1.bf16.msra.mxu0 %v11921_v53  ;;  %v12003_v53 = vld [vmem:[%s16709_s3 + $0x364] ss:$8 sps:$4 sm:$0xff]  }
 0x1ed   :  { %4600 = vmatpush1.bf16.msra.mxu1 %v11924_v5  ;;  %3022 = vmatprep.subr.bf16.mxu0 %v11929_v9  ;;  %v12006_v5 = vld [vmem:[%s16709_s3 + $0x964] ss:$8 sps:$4 sm:$0xff]   ;;  %v12001_v9 = vld [vmem:[%s16709_s3 + $0x360] ss:$8 sps:$4 sm:$0xff]  }
 0x1ee   :  { %4601 = vmatprep.subr.bf16.mxu1 %v11932_v44  ;;  %v12004_v44 = vld [vmem:[%s16709_s3 + $0x960] ss:$8 sps:$4 sm:$0xff]  }
 0x1f0   :  { %3023 = vmatpush1.bf16.msra.mxu0 %v11927_v11  ;;  %v12009_v11 = vld [vmem:[#allocation2 + $0x1c] ss:$48 sps:$4 sm:$0xff]  }
 0x1f1   :  { %4602 = vmatpush1.bf16.msra.mxu1 %v11930_v7  ;;  %3024 = vmatprep.subr.bf16.mxu0 %v11935_v57  ;;  %v12012_v7 = vld [vmem:[%s16709_s3 + $0x374] ss:$8 sps:$4 sm:$0xff]   ;;  %v14434_v57 = vcombine.low %v1480_v40, %v1480_v40  ;;  %v12007_v40 = vld [vmem:[#allocation2 + $0x18] ss:$48 sps:$4 sm:$0xff]  }
 0x1f2   :  { %4603 = vmatprep.subr.bf16.mxu1 %v11938_v58  ;;  %v12015_v58 = vld [vmem:[%s16709_s3 + $0x974] ss:$8 sps:$4 sm:$0xff]  }
 0x1f4   :  { %3025 = vmatpush1.bf16.msra.mxu0 %v11933_v16  ;;  %v12010_v16 = vld [vmem:[%s16709_s3 + $0x370] ss:$8 sps:$4 sm:$0xff]  }
 0x1f5   :  { %4604 = vmatpush1.bf16.msra.mxu1 %v11936_v24  ;;  %3026 = vmatprep.subr.bf16.mxu0 %v11941_v17  ;;  %v12013_v24 = vld [vmem:[%s16709_s3 + $0x970] ss:$8 sps:$4 sm:$0xff]   ;;  %v12018_v17 = vld [vmem:[%s16709_s3 + $0x384] ss:$8 sps:$4 sm:$0xff]  }
 0x1f6   :  { %4605 = vmatprep.subr.bf16.mxu1 %v11944_v60  ;;  %v12021_v60 = vld [vmem:[%s16709_s3 + $0x984] ss:$8 sps:$4 sm:$0xff]  }
 0x1f8   :  { %3027 = vmatpush1.bf16.msra.mxu0 %v11939_v8  ;;  %v12016_v8 = vld [vmem:[%s16709_s3 + $0x380] ss:$8 sps:$4 sm:$0xff]  }
 0x1f9   :  { %4606 = vmatpush1.bf16.msra.mxu1 %v11942_v31  ;;  %3028 = vmatprep.subr.bf16.mxu0 %v11947_v59  ;;  %v12019_v31 = vld [vmem:[%s16709_s3 + $0x980] ss:$8 sps:$4 sm:$0xff]   ;;  %v12024_v59 = vld [vmem:[%s16709_s3 + $0x394] ss:$8 sps:$4 sm:$0xff]  }
 0x1fa   :  { %4607 = vmatprep.subr.bf16.mxu1 %v11950_v33  ;;  %v12027_v33 = vld [vmem:[%s16709_s3 + $0x994] ss:$8 sps:$4 sm:$0xff]  }
 0x1fc   :  { %3029 = vmatpush1.bf16.msra.mxu0 %v11945_v18  ;;  %v12022_v18 = vld [vmem:[%s16709_s3 + $0x390] ss:$8 sps:$4 sm:$0xff]  }
 0x1fd   :  { %4608 = vmatpush1.bf16.msra.mxu1 %v11948_v61  ;;  %3030 = vmatprep.subr.bf16.mxu0 %v11953_v13  ;;  %v12025_v61 = vld [vmem:[%s16709_s3 + $0x990] ss:$8 sps:$4 sm:$0xff]   ;;  %v12030_v13 = vld [vmem:[%s16709_s3 + $0x3a4] ss:$8 sps:$4 sm:$0xff]  }
 0x1fe   :  { %4609 = vmatprep.subr.bf16.mxu1 %v11956_v19  ;;  %v12033_v19 = vld [vmem:[%s16709_s3 + $0x9a4] ss:$8 sps:$4 sm:$0xff]  }
 0x200   :  { %3031 = vmatpush1.bf16.msra.mxu0 %v11951_v41  ;;  %v12028_v41 = vld [vmem:[%s16709_s3 + $0x3a0] ss:$8 sps:$4 sm:$0xff]  }
 0x201   :  { %4610 = vmatpush1.bf16.msra.mxu1 %v11954_v30  ;;  %3071 = vmatprep.subr.bf16.mxu0 %v11959_v3  ;;  %v12031_v30 = vld [vmem:[%s16709_s3 + $0x9a0] ss:$8 sps:$4 sm:$0xff]   ;;  %v12036_v3 = vld [vmem:[%s16709_s3 + $0x3b4] ss:$8 sps:$4 sm:$0xff]  }
 0x202   :  { %4650 = vmatprep.subr.bf16.mxu1 %v11962_v20  ;;  %v12039_v20 = vld [vmem:[%s16709_s3 + $0x9b4] ss:$8 sps:$4 sm:$0xff]  }
 0x203   :  { %3033 = vmatmul.mubr.bf16.vlgmr.msra.gmra.mrb[52].mxu0 %v11900_v32 }
 0x204   :  { %4612 = vmatmul.mubr.bf16.vlgmr.msra.gmra.mrb[60].mxu1 %v11900_v32  ;;  %3042 = vmatprep.mubr.bf16.mxu0 %v11963_v63  ;;  %v12034_v32 = vld [vmem:[%s16709_s3 + $0x3b0] ss:$8 sps:$4 sm:$0xff]  }
 0x205   :  { %3072 = vmatpush1.bf16.msra.mxu0 %v11957_v10  ;;  %4621 = vmatprep.mubr.bf16.mxu1 %v11963_v63  ;;  %v12037_v10 = vld [vmem:[%s16709_s3 + $0x9b0] ss:$8 sps:$4 sm:$0xff]   ;;  %v12045_v63 = vld [vmem:[%s16709_s3 + $0x9c4] ss:$8 sps:$4 sm:$0xff]  }
 0x206   :  { %4651 = vmatpush1.bf16.msra.mxu1 %v11960_v22  ;;  %3073 = vmatprep.subr.bf16.mxu0 %v11967_v12  ;;  %v12042_v22 = vld [vmem:[%s16709_s3 + $0x3c4] ss:$8 sps:$4 sm:$0xff]   ;;  %v12040_v12 = vld [vmem:[%s16709_s3 + $0x3c0] ss:$8 sps:$4 sm:$0xff]  }
 0x207   :  { %4652 = vmatprep.subr.bf16.mxu1 %v11970_v42  ;;  %v12043_v42 = vld [vmem:[%s16709_s3 + $0x9c0] ss:$8 sps:$4 sm:$0xff]  }
 0x209   :  { %3074 = vmatpush1.bf16.msra.mxu0 %v11965_v34  ;;  %v12048_v34 = vld [vmem:[%s16709_s3 + $0x3d4] ss:$8 sps:$4 sm:$0xff]  }
 0x20a   :  { %4653 = vmatpush1.bf16.msra.mxu1 %v11968_v55  ;;  %3075 = vmatprep.subr.bf16.mxu0 %v11974_v45  ;;  %v12051_v55 = vld [vmem:[%s16709_s3 + $0x9d4] ss:$8 sps:$4 sm:$0xff]   ;;  %v12046_v45 = vld [vmem:[%s16709_s3 + $0x3d0] ss:$8 sps:$4 sm:$0xff]  }
 0x20b   :  { %3043 = vmatmul.mubr.bf16.gmra.mrb[56].mxu0 %v11971_v0  ;;  %4654 = vmatprep.subr.bf16.mxu1 %v11977_v25  ;;  %v12049_v25 = vld [vmem:[%s16709_s3 + $0x9d0] ss:$8 sps:$4 sm:$0xff]  }
 0x20c   :  { %4622 = vmatmul.mubr.bf16.gmra.mrb[64].mxu1 %v11971_v0  ;;  %3052 = vmatprep.mubr.bf16.mxu0 %v11978_v1  ;;  %v12057_v0 = vld [vmem:[%s16709_s3 + $0x9e4] ss:$8 sps:$4 sm:$0xff]  }
 0x20d   :  { %3076 = vmatpush1.bf16.msra.mxu0 %v11972_v56  ;;  %4631 = vmatprep.mubr.bf16.mxu1 %v11978_v1  ;;  %v12054_v56 = vld [vmem:[%s16709_s3 + $0x3e4] ss:$8 sps:$4 sm:$0xff]   ;;  %v12060_v1 = vld [vmem:[%s16709_s3 + $0x3f4] ss:$8 sps:$4 sm:$0xff]  }
 0x20e   :  { %4655 = vmatpush1.bf16.msra.mxu1 %v11975_v27  ;;  %3077 = vmatprep.subr.bf16.mxu0 %v11982_v49  ;;  %v12052_v27 = vld [vmem:[%s16709_s3 + $0x3e0] ss:$8 sps:$4 sm:$0xff]  }
 0x20f   :  { %4656 = vmatprep.subr.bf16.mxu1 %v11985_v38  ;;  %v12055_v49 = vld [vmem:[%s16709_s3 + $0x9e0] ss:$8 sps:$4 sm:$0xff]   ;;  %v12063_v38 = vld [vmem:[%s16709_s3 + $0x9f4] ss:$8 sps:$4 sm:$0xff]  }
 0x211   :  { %3078 = vmatpush1.bf16.msra.mxu0 %v11980_v35  ;;  %v12058_v35 = vld [vmem:[%s16709_s3 + $0x3f0] ss:$8 sps:$4 sm:$0xff]  }
 0x212   :  { %4657 = vmatpush1.bf16.msra.mxu1 %v11983_v51  ;;  %3079 = vmatprep.subr.bf16.mxu0 %v11989_v36  ;;  %v12061_v51 = vld [vmem:[%s16709_s3 + $0x9f0] ss:$8 sps:$4 sm:$0xff]   ;;  %v12066_v36 = vld [vmem:[%s16709_s3 + $0x404] ss:$8 sps:$4 sm:$0xff]  }
 0x213   :  { %3053 = vmatmul.mubr.bf16.gmra.mrb[60].mxu0 %v11986_v21  ;;  %4658 = vmatprep.subr.bf16.mxu1 %v11992_v39  ;;  %v12069_v39 = vld [vmem:[%s16709_s3 + $0xa04] ss:$8 sps:$4 sm:$0xff]  }
 0x214   :  { %4632 = vmatmul.mubr.bf16.gmra.mrb[68].mxu1 %v11986_v21  ;;  %3062 = vmatprep.mubr.bf16.mxu0 %v14409_v4  ;;  %v12074_v21 = vld [vmem:[%s16709_s3 + $0x414] ss:$8 sps:$4 sm:$0xff]  }
 0x215   :  { %3080 = vmatpush1.bf16.msra.mxu0 %v11987_v43  ;;  %4641 = vmatprep.mubr.bf16.mxu1 %v14409_v4  ;;  %v12064_v43 = vld [vmem:[%s16709_s3 + $0x400] ss:$8 sps:$4 sm:$0xff]  }
 0x216   :  { %4659 = vmatpush1.bf16.msra.mxu1 %v11990_v62  ;;  %3081 = vmatprep.subr.bf16.mxu0 %v11996_v52  ;;  %v12067_v62 = vld [vmem:[%s16709_s3 + $0xa00] ss:$8 sps:$4 sm:$0xff]   ;;  %v12070_v52 = vld [vmem:[#allocation2 + $0x7c] ss:$48 sps:$4 sm:$0xff]  }
 0x217   :  { %4660 = vmatprep.subr.bf16.mxu1 %v11999_v46  ;;  %v12077_v46 = vld [vmem:[%s16709_s3 + $0xa14] ss:$8 sps:$4 sm:$0xff]  }
 0x219   :  { %3082 = vmatpush1.bf16.msra.mxu0 %v11994_v37  ;;  %v12072_v37 = vld [vmem:[%s16709_s3 + $0x410] ss:$8 sps:$4 sm:$0xff]  }
 0x21a   :  { %4661 = vmatpush1.bf16.msra.mxu1 %v11997_v48  ;;  %3083 = vmatprep.subr.bf16.mxu0 %v12003_v53  ;;  %v12075_v48 = vld [vmem:[%s16709_s3 + $0xa10] ss:$8 sps:$4 sm:$0xff]   ;;  %v12081_v53 = vld [vmem:[%s16709_s3 + $0x424] ss:$8 sps:$4 sm:$0xff]  }
 0x21b   :  { %3063 = vmatmul.mubr.bf16.gmra.mrb[64].mxu0 %v14434_v57  ;;  %4662 = vmatprep.subr.bf16.mxu1 %v12006_v5  ;;  %v12078_v5 = vld [vmem:[#allocation2 + $0x78] ss:$48 sps:$4 sm:$0xff]  }
 0x21c   :  { %4642 = vmatmul.mubr.bf16.gmra.mrb[72].mxu1 %v14434_v57  ;;  %3103 = vmatprep.mubr.bf16.mxu0 %v12009_v11 }
 0x21d   :  { %3084 = vmatpush1.bf16.msra.mxu0 %v12001_v9  ;;  %4682 = vmatprep.mubr.bf16.mxu1 %v12009_v11  ;;  %v12084_v9 = vld [vmem:[%s16709_s3 + $0xa24] ss:$8 sps:$4 sm:$0xff]   ;;  %v12082_v11 = vld [vmem:[%s16709_s3 + $0xa20] ss:$8 sps:$4 sm:$0xff]  }
 0x21e   :  { %4663 = vmatpush1.bf16.msra.mxu1 %v12004_v44  ;;  %3085 = vmatprep.subr.bf16.mxu0 %v12012_v7  ;;  %v12079_v44 = vld [vmem:[%s16709_s3 + $0x420] ss:$8 sps:$4 sm:$0xff]   ;;  %v12085_v7 = vld [vmem:[#allocation2 + $0xdc] ss:$48 sps:$4 sm:$0xff]  }
 0x21f   :  { %4664 = vmatprep.subr.bf16.mxu1 %v12015_v58  ;;  %v12089_v58 = vld [vmem:[%s16709_s3 + $0x434] ss:$8 sps:$4 sm:$0xff]  }
 0x221   :  { %3086 = vmatpush1.bf16.msra.mxu0 %v12010_v16  ;;  %v12092_v16 = vld [vmem:[%s16709_s3 + $0xa34] ss:$8 sps:$4 sm:$0xff]  }
 0x222   :  { %4665 = vmatpush1.bf16.msra.mxu1 %v12013_v24  ;;  %3087 = vmatprep.subr.bf16.mxu0 %v12018_v17  ;;  %v12087_v24 = vld [vmem:[%s16709_s3 + $0x430] ss:$8 sps:$4 sm:$0xff]  }
 0x223   :  { %4666 = vmatprep.subr.bf16.mxu1 %v12021_v60  ;;  %v12090_v17 = vld [vmem:[%s16709_s3 + $0xa30] ss:$8 sps:$4 sm:$0xff]   ;;  %v12096_v60 = vld [vmem:[%s16709_s3 + $0x444] ss:$8 sps:$4 sm:$0xff]  }
 0x225   :  { %3088 = vmatpush1.bf16.msra.mxu0 %v12016_v8  ;;  %v1481_v8 = vld [vmem:[#allocation2 + $0x138] sm:$0xff] }
 0x226   :  { %4667 = vmatpush1.bf16.msra.mxu1 %v12019_v31  ;;  %3089 = vmatprep.subr.bf16.mxu0 %v12024_v59  ;;  %v12093_v31 = vld [vmem:[#allocation2 + $0xd8] ss:$48 sps:$4 sm:$0xff]   ;;  %v12099_v59 = vld [vmem:[%s16709_s3 + $0xa44] ss:$8 sps:$4 sm:$0xff]  }
 0x227   :  { %4668 = vmatprep.subr.bf16.mxu1 %v12027_v33  ;;  %v12094_v33 = vld [vmem:[%s16709_s3 + $0x440] ss:$8 sps:$4 sm:$0xff]  }
 0x229   :  { %3090 = vmatpush1.bf16.msra.mxu0 %v12022_v18  ;;  %v12097_v18 = vld [vmem:[%s16709_s3 + $0xa40] ss:$8 sps:$4 sm:$0xff]  }
 0x22a   :  { %4669 = vmatpush1.bf16.msra.mxu1 %v12025_v61  ;;  %3091 = vmatprep.subr.bf16.mxu0 %v12030_v13  ;;  %v12103_v61 = vld [vmem:[%s16709_s3 + $0x454] ss:$8 sps:$4 sm:$0xff]  }
 0x22b   :  { %4670 = vmatprep.subr.bf16.mxu1 %v12033_v19  ;;  %v12106_v13 = vld [vmem:[%s16709_s3 + $0xa54] ss:$8 sps:$4 sm:$0xff]   ;;  %v14609_v19 = vcombine.high %v1481_v8, %v1481_v8 }
 0x22d   :  { %3092 = vmatpush1.bf16.msra.mxu0 %v12028_v41  ;;  %v12101_v41 = vld [vmem:[%s16709_s3 + $0x450] ss:$8 sps:$4 sm:$0xff]  }
 0x22e   :  { %4671 = vmatpush1.bf16.msra.mxu1 %v12031_v30  ;;  %3093 = vmatprep.subr.bf16.mxu0 %v12036_v3  ;;  %v12104_v30 = vld [vmem:[%s16709_s3 + $0xa50] ss:$8 sps:$4 sm:$0xff]   ;;  %v12110_v3 = vld [vmem:[%s16709_s3 + $0x464] ss:$8 sps:$4 sm:$0xff]  }
 0x22f   :  { %4672 = vmatprep.subr.bf16.mxu1 %v12039_v20  ;;  %v12113_v20 = vld [vmem:[%s16709_s3 + $0xa64] ss:$8 sps:$4 sm:$0xff]  }
 0x231   :  { %3094 = vmatpush1.bf16.msra.mxu0 %v12034_v32  ;;  %v12108_v32 = vld [vmem:[%s16709_s3 + $0x460] ss:$8 sps:$4 sm:$0xff]  }
 0x232   :  { %4673 = vmatpush1.bf16.msra.mxu1 %v12037_v10  ;;  %3095 = vmatprep.subr.bf16.mxu0 %v12042_v22  ;;  %v12111_v10 = vld [vmem:[%s16709_s3 + $0xa60] ss:$8 sps:$4 sm:$0xff]   ;;  %v12116_v22 = vld [vmem:[#allocation2 + $0x24] ss:$48 sps:$4 sm:$0xff]  }
 0x233   :  { %4674 = vmatprep.subr.bf16.mxu1 %v12045_v63  ;;  %v12119_v63 = vld [vmem:[%s16709_s3 + $0x474] ss:$8 sps:$4 sm:$0xff]  }
 0x235   :  { %3096 = vmatpush1.bf16.msra.mxu0 %v12040_v12  ;;  %v14634_v12 = vcombine.low %v1481_v8, %v1481_v8  ;;  %v12168_v8 = vld [vmem:[%s16709_s3 + $0xaf0] ss:$8 sps:$4 sm:$0xff]  }
 0x236   :  { %4675 = vmatpush1.bf16.msra.mxu1 %v12043_v42  ;;  %3097 = vmatprep.subr.bf16.mxu0 %v12048_v34  ;;  %v12122_v42 = vld [vmem:[%s16709_s3 + $0xa74] ss:$8 sps:$4 sm:$0xff]   ;;  %v12117_v34 = vld [vmem:[%s16709_s3 + $0x470] ss:$8 sps:$4 sm:$0xff]  }
 0x237   :  { %4676 = vmatprep.subr.bf16.mxu1 %v12051_v55  ;;  %v12120_v55 = vld [vmem:[%s16709_s3 + $0xa70] ss:$8 sps:$4 sm:$0xff]  }
 0x239   :  { %3098 = vmatpush1.bf16.msra.mxu0 %v12046_v45  ;;  %v12125_v45 = vld [vmem:[%s16709_s3 + $0x484] ss:$8 sps:$4 sm:$0xff]  }
 0x23a   :  { %4677 = vmatpush1.bf16.msra.mxu1 %v12049_v25  ;;  %3099 = vmatprep.subr.bf16.mxu0 %v12054_v56  ;;  %v12128_v25 = vld [vmem:[%s16709_s3 + $0xa84] ss:$8 sps:$4 sm:$0xff]   ;;  %v12123_v56 = vld [vmem:[%s16709_s3 + $0x480] ss:$8 sps:$4 sm:$0xff]  }
 0x23b   :  { %4678 = vmatprep.subr.bf16.mxu1 %v12057_v0  ;;  %v12126_v0 = vld [vmem:[%s16709_s3 + $0xa80] ss:$8 sps:$4 sm:$0xff]  }
 0x23d   :  { %3100 = vmatpush1.bf16.msra.mxu0 %v12052_v27  ;;  %v12131_v27 = vld [vmem:[%s16709_s3 + $0x494] ss:$8 sps:$4 sm:$0xff]  }
 0x23e   :  { %4679 = vmatpush1.bf16.msra.mxu1 %v12055_v49  ;;  %3101 = vmatprep.subr.bf16.mxu0 %v12060_v1  ;;  %v12134_v49 = vld [vmem:[%s16709_s3 + $0xa94] ss:$8 sps:$4 sm:$0xff]   ;;  %v12129_v1 = vld [vmem:[%s16709_s3 + $0x490] ss:$8 sps:$4 sm:$0xff]  }
 0x23f   :  { %4680 = vmatprep.subr.bf16.mxu1 %v12063_v38  ;;  %v12132_v38 = vld [vmem:[%s16709_s3 + $0xa90] ss:$8 sps:$4 sm:$0xff]  }
 0x241   :  { %3102 = vmatpush1.bf16.msra.mxu0 %v12058_v35  ;;  %v12137_v35 = vld [vmem:[%s16709_s3 + $0x4a4] ss:$8 sps:$4 sm:$0xff]  }
 0x242   :  { %4681 = vmatpush1.bf16.msra.mxu1 %v12061_v51  ;;  %3142 = vmatprep.subr.bf16.mxu0 %v12066_v36  ;;  %v12140_v51 = vld [vmem:[%s16709_s3 + $0xaa4] ss:$8 sps:$4 sm:$0xff]   ;;  %v12135_v36 = vld [vmem:[%s16709_s3 + $0x4a0] ss:$8 sps:$4 sm:$0xff]  }
 0x243   :  { %4721 = vmatprep.subr.bf16.mxu1 %v12069_v39  ;;  %v12138_v39 = vld [vmem:[%s16709_s3 + $0xaa0] ss:$8 sps:$4 sm:$0xff]  }
 0x244   :  { %3104 = vmatmul.mubr.bf16.vlgmr.msra.gmra.mrb[52].mxu0 %v12007_v40 }
 0x245   :  { %4683 = vmatmul.mubr.bf16.vlgmr.msra.gmra.mrb[60].mxu1 %v12007_v40  ;;  %3113 = vmatprep.mubr.bf16.mxu0 %v12070_v52  ;;  %v12143_v40 = vld [vmem:[%s16709_s3 + $0x4b4] ss:$8 sps:$4 sm:$0xff]  }
 0x246   :  { %3143 = vmatpush1.bf16.msra.mxu0 %v12064_v43  ;;  %4692 = vmatprep.mubr.bf16.mxu1 %v12070_v52  ;;  %v12146_v43 = vld [vmem:[%s16709_s3 + $0xab4] ss:$8 sps:$4 sm:$0xff]   ;;  %v12144_v52 = vld [vmem:[%s16709_s3 + $0xab0] ss:$8 sps:$4 sm:$0xff]  }
 0x247   :  { %4722 = vmatpush1.bf16.msra.mxu1 %v12067_v62  ;;  %3144 = vmatprep.subr.bf16.mxu0 %v12074_v21  ;;  %v12141_v62 = vld [vmem:[%s16709_s3 + $0x4b0] ss:$8 sps:$4 sm:$0xff]   ;;  %v12149_v21 = vld [vmem:[%s16709_s3 + $0x4c4] ss:$8 sps:$4 sm:$0xff]  }
 0x248   :  { %4723 = vmatprep.subr.bf16.mxu1 %v12077_v46  ;;  %v12152_v46 = vld [vmem:[%s16709_s3 + $0xac4] ss:$8 sps:$4 sm:$0xff]  }
 0x24a   :  { %3145 = vmatpush1.bf16.msra.mxu0 %v12072_v37  ;;  %v12147_v37 = vld [vmem:[%s16709_s3 + $0x4c0] ss:$8 sps:$4 sm:$0xff]  }
 0x24b   :  { %4724 = vmatpush1.bf16.msra.mxu1 %v12075_v48  ;;  %3146 = vmatprep.subr.bf16.mxu0 %v12081_v53  ;;  %v12150_v48 = vld [vmem:[%s16709_s3 + $0xac0] ss:$8 sps:$4 sm:$0xff]   ;;  %v12155_v53 = vld [vmem:[%s16709_s3 + $0x4d4] ss:$8 sps:$4 sm:$0xff]  }
 0x24c   :  { %3114 = vmatmul.mubr.bf16.gmra.mrb[56].mxu0 %v12078_v5  ;;  %4725 = vmatprep.subr.bf16.mxu1 %v12084_v9  ;;  %v12153_v9 = vld [vmem:[%s16709_s3 + $0x4d0] ss:$8 sps:$4 sm:$0xff]  }
 0x24d   :  { %4693 = vmatmul.mubr.bf16.gmra.mrb[64].mxu1 %v12078_v5  ;;  %3123 = vmatprep.mubr.bf16.mxu0 %v12085_v7  ;;  %v12158_v5 = vld [vmem:[%s16709_s3 + $0xad4] ss:$8 sps:$4 sm:$0xff]  }
 0x24e   :  { %3147 = vmatpush1.bf16.msra.mxu0 %v12079_v44  ;;  %4702 = vmatprep.mubr.bf16.mxu1 %v12085_v7  ;;  %v12156_v44 = vld [vmem:[%s16709_s3 + $0xad0] ss:$8 sps:$4 sm:$0xff]   ;;  %v12164_v7 = vld [vmem:[%s16709_s3 + $0xae4] ss:$8 sps:$4 sm:$0xff]  }
 0x24f   :  { %4726 = vmatpush1.bf16.msra.mxu1 %v12082_v11  ;;  %3148 = vmatprep.subr.bf16.mxu0 %v12089_v58  ;;  %v12161_v11 = vld [vmem:[%s16709_s3 + $0x4e4] ss:$8 sps:$4 sm:$0xff]   ;;  %v12159_v58 = vld [vmem:[%s16709_s3 + $0x4e0] ss:$8 sps:$4 sm:$0xff]  }
 0x250   :  { %4727 = vmatprep.subr.bf16.mxu1 %v12092_v16  ;;  %v12162_v16 = vld [vmem:[%s16709_s3 + $0xae0] ss:$8 sps:$4 sm:$0xff]  }
 0x252   :  { %3149 = vmatpush1.bf16.msra.mxu0 %v12087_v24  ;;  %v12167_v24 = vld [vmem:[%s16709_s3 + $0x4f4] ss:$8 sps:$4 sm:$0xff]  }
 0x253   :  { %4728 = vmatpush1.bf16.msra.mxu1 %v12090_v17  ;;  %3150 = vmatprep.subr.bf16.mxu0 %v12096_v60  ;;  %v12170_v17 = vld [vmem:[%s16709_s3 + $0xaf4] ss:$8 sps:$4 sm:$0xff]   ;;  %v12165_v60 = vld [vmem:[%s16709_s3 + $0x4f0] ss:$8 sps:$4 sm:$0xff]  }
 0x254   :  { %3124 = vmatmul.mubr.bf16.gmra.mrb[60].mxu0 %v12093_v31  ;;  %4729 = vmatprep.subr.bf16.mxu1 %v12099_v59  ;;  %v12176_v59 = vld [vmem:[%s16709_s3 + $0xb04] ss:$8 sps:$4 sm:$0xff]  }
 0x255   :  { %4703 = vmatmul.mubr.bf16.gmra.mrb[68].mxu1 %v12093_v31  ;;  %3133 = vmatprep.mubr.bf16.mxu0 %v14609_v19  ;;  %v12173_v31 = vld [vmem:[%s16709_s3 + $0x504] ss:$8 sps:$4 sm:$0xff]  }
 0x256   :  { %3151 = vmatpush1.bf16.msra.mxu0 %v12094_v33  ;;  %4712 = vmatprep.mubr.bf16.mxu1 %v14609_v19  ;;  %v12114_v33 = vld [vmem:[#allocation2 + $0x20] ss:$48 sps:$4 sm:$0xff]  }
 0x257   :  { %4730 = vmatpush1.bf16.msra.mxu1 %v12097_v18  ;;  %3152 = vmatprep.subr.bf16.mxu0 %v12103_v61  ;;  %v12171_v18 = vld [vmem:[%s16709_s3 + $0x500] ss:$8 sps:$4 sm:$0xff]  }
 0x258   :  { %4731 = vmatprep.subr.bf16.mxu1 %v12106_v13  ;;  %v12174_v61 = vld [vmem:[%s16709_s3 + $0xb00] ss:$8 sps:$4 sm:$0xff]   ;;  %v12177_v13 = vld [vmem:[#allocation2 + $0x84] ss:$48 sps:$4 sm:$0xff]  }
 0x25a   :  { %3153 = vmatpush1.bf16.msra.mxu0 %v12101_v41  ;;  %v12181_v41 = vld [vmem:[%s16709_s3 + $0x514] ss:$8 sps:$4 sm:$0xff]  }
 0x25b   :  { %4732 = vmatpush1.bf16.msra.mxu1 %v12104_v30  ;;  %3154 = vmatprep.subr.bf16.mxu0 %v12110_v3  ;;  %v12184_v30 = vld [vmem:[%s16709_s3 + $0xb14] ss:$8 sps:$4 sm:$0xff]   ;;  %v12179_v3 = vld [vmem:[%s16709_s3 + $0x510] ss:$8 sps:$4 sm:$0xff]  }
 0x25c   :  { %3134 = vmatmul.mubr.bf16.gmra.mrb[64].mxu0 %v14634_v12  ;;  %4733 = vmatprep.subr.bf16.mxu1 %v12113_v20  ;;  %v12182_v20 = vld [vmem:[%s16709_s3 + $0xb10] ss:$8 sps:$4 sm:$0xff]  }
 0x25d   :  { %4713 = vmatmul.mubr.bf16.gmra.mrb[72].mxu1 %v14634_v12  ;;  %3174 = vmatprep.mubr.bf16.mxu0 %v12116_v22 }
 0x25e   :  { %3155 = vmatpush1.bf16.msra.mxu0 %v12108_v32  ;;  %4753 = vmatprep.mubr.bf16.mxu1 %v12116_v22  ;;  %v12188_v32 = vld [vmem:[%s16709_s3 + $0x524] ss:$8 sps:$4 sm:$0xff]   ;;  %v12185_v22 = vld [vmem:[#allocation2 + $0x80] ss:$48 sps:$4 sm:$0xff]  }
 0x25f   :  { %4734 = vmatpush1.bf16.msra.mxu1 %v12111_v10  ;;  %3156 = vmatprep.subr.bf16.mxu0 %v12119_v63  ;;  %v12191_v10 = vld [vmem:[%s16709_s3 + $0xb24] ss:$8 sps:$4 sm:$0xff]   ;;  %v12186_v63 = vld [vmem:[%s16709_s3 + $0x520] ss:$8 sps:$4 sm:$0xff]  }
 0x260   :  { %4735 = vmatprep.subr.bf16.mxu1 %v12122_v42  ;;  %v12189_v42 = vld [vmem:[%s16709_s3 + $0xb20] ss:$8 sps:$4 sm:$0xff]  }
 0x262   :  { %3157 = vmatpush1.bf16.msra.mxu0 %v12117_v34  ;;  %v12192_v34 = vld [vmem:[#allocation2 + $0xe4] ss:$48 sps:$4 sm:$0xff]  }
 0x263   :  { %4736 = vmatpush1.bf16.msra.mxu1 %v12120_v55  ;;  %3158 = vmatprep.subr.bf16.mxu0 %v12125_v45  ;;  %v12196_v55 = vld [vmem:[%s16709_s3 + $0x534] ss:$8 sps:$4 sm:$0xff]  }
 0x264   :  { %4737 = vmatprep.subr.bf16.mxu1 %v12128_v25  ;;  %v12199_v45 = vld [vmem:[%s16709_s3 + $0xb34] ss:$8 sps:$4 sm:$0xff]   ;;  %v12194_v25 = vld [vmem:[%s16709_s3 + $0x530] ss:$8 sps:$4 sm:$0xff]  }
 0x266   :  { %3159 = vmatpush1.bf16.msra.mxu0 %v12123_v56  ;;  %v12197_v56 = vld [vmem:[%s16709_s3 + $0xb30] ss:$8 sps:$4 sm:$0xff]  }
 0x267   :  { %4738 = vmatpush1.bf16.msra.mxu1 %v12126_v0  ;;  %3160 = vmatprep.subr.bf16.mxu0 %v12131_v27  ;;  %v12203_v0 = vld [vmem:[%s16709_s3 + $0x544] ss:$8 sps:$4 sm:$0xff]  }
 0x268   :  { %4739 = vmatprep.subr.bf16.mxu1 %v12134_v49  ;;  %v12206_v27 = vld [vmem:[%s16709_s3 + $0xb44] ss:$8 sps:$4 sm:$0xff]  }
 0x269   :  { %v12957_v49 = vld [vmem:[#allocation2] sm:$0xff] }
 0x26a   :  { %3161 = vmatpush1.bf16.msra.mxu0 %v12129_v1  ;;  %v14797_v1 = vcombine.high %v12957_v49, %v12957_v49 }
 0x26b   :  { %4740 = vmatpush1.bf16.msra.mxu1 %v12132_v38  ;;  %3162 = vmatprep.subr.bf16.mxu0 %v12137_v35  ;;  %v12200_v38 = vld [vmem:[#allocation2 + $0xe0] ss:$48 sps:$4 sm:$0xff]  }
 0x26c   :  { %4741 = vmatprep.subr.bf16.mxu1 %v12140_v51  ;;  %v12201_v35 = vld [vmem:[%s16709_s3 + $0x540] ss:$8 sps:$4 sm:$0xff]  }
 0x26d   :  { %v12204_v51 = vld [vmem:[%s16709_s3 + $0xb40] ss:$8 sps:$4 sm:$0xff]  }
 0x26e   :  { %3163 = vmatpush1.bf16.msra.mxu0 %v12135_v36  ;;  %v12209_v36 = vld [vmem:[%s16709_s3 + $0x554] ss:$8 sps:$4 sm:$0xff]  }
 0x26f   :  { %4742 = vmatpush1.bf16.msra.mxu1 %v12138_v39  ;;  %3164 = vmatprep.subr.bf16.mxu0 %v12143_v40  ;;  %v12212_v39 = vld [vmem:[%s16709_s3 + $0xb54] ss:$8 sps:$4 sm:$0xff]   ;;  %v12207_v40 = vld [vmem:[%s16709_s3 + $0x550] ss:$8 sps:$4 sm:$0xff]  }
 0x270   :  { %4743 = vmatprep.subr.bf16.mxu1 %v12146_v43  ;;  %v12210_v43 = vld [vmem:[%s16709_s3 + $0xb50] ss:$8 sps:$4 sm:$0xff]  }
 0x272   :  { %3165 = vmatpush1.bf16.msra.mxu0 %v12141_v62  ;;  %v12215_v62 = vld [vmem:[%s16709_s3 + $0x564] ss:$8 sps:$4 sm:$0xff]  }
 0x273   :  { %4744 = vmatpush1.bf16.msra.mxu1 %v12144_v52  ;;  %3166 = vmatprep.subr.bf16.mxu0 %v12149_v21  ;;  %v14822_v52 = vcombine.low %v12957_v49, %v12957_v49  ;;  %v12218_v21 = vld [vmem:[%s16709_s3 + $0xb64] ss:$8 sps:$4 sm:$0xff]   ;;  %v12270_v49 = vld [vmem:[%s16709_s3 + $0x5f0] ss:$8 sps:$4 sm:$0xff]  }
 0x274   :  { %4745 = vmatprep.subr.bf16.mxu1 %v12152_v46  ;;  %v12213_v46 = vld [vmem:[%s16709_s3 + $0x560] ss:$8 sps:$4 sm:$0xff]  }
 0x276   :  { %3167 = vmatpush1.bf16.msra.mxu0 %v12147_v37  ;;  %v12216_v37 = vld [vmem:[%s16709_s3 + $0xb60] ss:$8 sps:$4 sm:$0xff]  }
 0x277   :  { %4746 = vmatpush1.bf16.msra.mxu1 %v12150_v48  ;;  %3168 = vmatprep.subr.bf16.mxu0 %v12155_v53  ;;  %v12221_v48 = vld [vmem:[#allocation2 + $0x2c] ss:$48 sps:$4 sm:$0xff]  }
 0x278   :  { %4747 = vmatprep.subr.bf16.mxu1 %v12158_v5  ;;  %v12224_v53 = vld [vmem:[%s16709_s3 + $0x574] ss:$8 sps:$4 sm:$0xff]  }
 0x279   :  { %v12227_v5 = vld [vmem:[%s16709_s3 + $0xb74] ss:$8 sps:$4 sm:$0xff]  }
 0x27a   :  { %3169 = vmatpush1.bf16.msra.mxu0 %v12153_v9  ;;  %v12222_v9 = vld [vmem:[%s16709_s3 + $0x570] ss:$8 sps:$4 sm:$0xff]  }
 0x27b   :  { %4748 = vmatpush1.bf16.msra.mxu1 %v12156_v44  ;;  %3170 = vmatprep.subr.bf16.mxu0 %v12161_v11  ;;  %v12225_v44 = vld [vmem:[%s16709_s3 + $0xb70] ss:$8 sps:$4 sm:$0xff]   ;;  %v12230_v11 = vld [vmem:[%s16709_s3 + $0x584] ss:$8 sps:$4 sm:$0xff]  }
 0x27c   :  { %4749 = vmatprep.subr.bf16.mxu1 %v12164_v7  ;;  %v12233_v7 = vld [vmem:[%s16709_s3 + $0xb84] ss:$8 sps:$4 sm:$0xff]  }
 0x27e   :  { %3171 = vmatpush1.bf16.msra.mxu0 %v12159_v58  ;;  %v12228_v58 = vld [vmem:[%s16709_s3 + $0x580] ss:$8 sps:$4 sm:$0xff]  }
 0x27f   :  { %4750 = vmatpush1.bf16.msra.mxu1 %v12162_v16  ;;  %3172 = vmatprep.subr.bf16.mxu0 %v12167_v24  ;;  %v12231_v16 = vld [vmem:[%s16709_s3 + $0xb80] ss:$8 sps:$4 sm:$0xff]   ;;  %v12236_v24 = vld [vmem:[%s16709_s3 + $0x594] ss:$8 sps:$4 sm:$0xff]  }
 0x280   :  { %4751 = vmatprep.subr.bf16.mxu1 %v12170_v17  ;;  %v12239_v17 = vld [vmem:[%s16709_s3 + $0xb94] ss:$8 sps:$4 sm:$0xff]  }
 0x282   :  { %3173 = vmatpush1.bf16.msra.mxu0 %v12165_v60  ;;  %v12234_v60 = vld [vmem:[%s16709_s3 + $0x590] ss:$8 sps:$4 sm:$0xff]  }
 0x283   :  { %4752 = vmatpush1.bf16.msra.mxu1 %v12168_v8  ;;  %3213 = vmatprep.subr.bf16.mxu0 %v12173_v31  ;;  %v12237_v8 = vld [vmem:[%s16709_s3 + $0xb90] ss:$8 sps:$4 sm:$0xff]   ;;  %v12242_v31 = vld [vmem:[%s16709_s3 + $0x5a4] ss:$8 sps:$4 sm:$0xff]  }
 0x284   :  { %4792 = vmatprep.subr.bf16.mxu1 %v12176_v59  ;;  %v12245_v59 = vld [vmem:[%s16709_s3 + $0xba4] ss:$8 sps:$4 sm:$0xff]  }
 0x285   :  { %3175 = vmatmul.mubr.bf16.vlgmr.msra.gmra.mrb[52].mxu0 %v12114_v33 }
 0x286   :  { %4754 = vmatmul.mubr.bf16.vlgmr.msra.gmra.mrb[60].mxu1 %v12114_v33  ;;  %3184 = vmatprep.mubr.bf16.mxu0 %v12177_v13  ;;  %v12240_v33 = vld [vmem:[%s16709_s3 + $0x5a0] ss:$8 sps:$4 sm:$0xff]  }
 0x287   :  { %3214 = vmatpush1.bf16.msra.mxu0 %v12171_v18  ;;  %4763 = vmatprep.mubr.bf16.mxu1 %v12177_v13  ;;  %v12243_v18 = vld [vmem:[%s16709_s3 + $0xba0] ss:$8 sps:$4 sm:$0xff]   ;;  %v12251_v13 = vld [vmem:[%s16709_s3 + $0xbb4] ss:$8 sps:$4 sm:$0xff]  }
 0x288   :  { %4793 = vmatpush1.bf16.msra.mxu1 %v12174_v61  ;;  %3215 = vmatprep.subr.bf16.mxu0 %v12181_v41  ;;  %v12248_v61 = vld [vmem:[%s16709_s3 + $0x5b4] ss:$8 sps:$4 sm:$0xff]   ;;  %v12246_v41 = vld [vmem:[%s16709_s3 + $0x5b0] ss:$8 sps:$4 sm:$0xff]  }
 0x289   :  { %4794 = vmatprep.subr.bf16.mxu1 %v12184_v30  ;;  %v12249_v30 = vld [vmem:[%s16709_s3 + $0xbb0] ss:$8 sps:$4 sm:$0xff]  }
 0x28b   :  { %3216 = vmatpush1.bf16.msra.mxu0 %v12179_v3  ;;  %v12254_v3 = vld [vmem:[%s16709_s3 + $0x5c4] ss:$8 sps:$4 sm:$0xff]  }
 0x28c   :  { %4795 = vmatpush1.bf16.msra.mxu1 %v12182_v20  ;;  %3217 = vmatprep.subr.bf16.mxu0 %v12188_v32  ;;  %v12257_v20 = vld [vmem:[%s16709_s3 + $0xbc4] ss:$8 sps:$4 sm:$0xff]   ;;  %v12252_v32 = vld [vmem:[%s16709_s3 + $0x5c0] ss:$8 sps:$4 sm:$0xff]  }
 0x28d   :  { %3185 = vmatmul.mubr.bf16.gmra.mrb[56].mxu0 %v12185_v22  ;;  %4796 = vmatprep.subr.bf16.mxu1 %v12191_v10  ;;  %v12255_v10 = vld [vmem:[%s16709_s3 + $0xbc0] ss:$8 sps:$4 sm:$0xff]  }
 0x28e   :  { %4764 = vmatmul.mubr.bf16.gmra.mrb[64].mxu1 %v12185_v22  ;;  %3194 = vmatprep.mubr.bf16.mxu0 %v12192_v34  ;;  %v12260_v22 = vld [vmem:[%s16709_s3 + $0x5d4] ss:$8 sps:$4 sm:$0xff]  }
 0x28f   :  { %3218 = vmatpush1.bf16.msra.mxu0 %v12186_v63  ;;  %4773 = vmatprep.mubr.bf16.mxu1 %v12192_v34  ;;  %v12263_v63 = vld [vmem:[%s16709_s3 + $0xbd4] ss:$8 sps:$4 sm:$0xff]   ;;  %v12261_v34 = vld [vmem:[%s16709_s3 + $0xbd0] ss:$8 sps:$4 sm:$0xff]  }
 0x290   :  { %4797 = vmatpush1.bf16.msra.mxu1 %v12189_v42  ;;  %3219 = vmatprep.subr.bf16.mxu0 %v12196_v55  ;;  %v12258_v42 = vld [vmem:[%s16709_s3 + $0x5d0] ss:$8 sps:$4 sm:$0xff]   ;;  %v12266_v55 = vld [vmem:[%s16709_s3 + $0x5e4] ss:$8 sps:$4 sm:$0xff]  }
 0x291   :  { %4798 = vmatprep.subr.bf16.mxu1 %v12199_v45  ;;  %v12269_v45 = vld [vmem:[%s16709_s3 + $0xbe4] ss:$8 sps:$4 sm:$0xff]  }
 0x293   :  { %3220 = vmatpush1.bf16.msra.mxu0 %v12194_v25  ;;  %v12264_v25 = vld [vmem:[%s16709_s3 + $0x5e0] ss:$8 sps:$4 sm:$0xff]  }
 0x294   :  { %4799 = vmatpush1.bf16.msra.mxu1 %v12197_v56  ;;  %3221 = vmatprep.subr.bf16.mxu0 %v12203_v0  ;;  %v12267_v56 = vld [vmem:[%s16709_s3 + $0xbe0] ss:$8 sps:$4 sm:$0xff]   ;;  %v12272_v0 = vld [vmem:[%s16709_s3 + $0x5f4] ss:$8 sps:$4 sm:$0xff]  }
 0x295   :  { %3195 = vmatmul.mubr.bf16.gmra.mrb[60].mxu0 %v12200_v38  ;;  %4800 = vmatprep.subr.bf16.mxu1 %v12206_v27  ;;  %v12275_v27 = vld [vmem:[%s16709_s3 + $0xbf4] ss:$8 sps:$4 sm:$0xff]  }
 0x296   :  { %4774 = vmatmul.mubr.bf16.gmra.mrb[68].mxu1 %v12200_v38  ;;  %3204 = vmatprep.mubr.bf16.mxu0 %v14797_v1  ;;  %v12273_v38 = vld [vmem:[%s16709_s3 + $0xbf0] ss:$8 sps:$4 sm:$0xff]  }
 0x297   :  { %3222 = vmatpush1.bf16.msra.mxu0 %v12201_v35  ;;  %4783 = vmatprep.mubr.bf16.mxu1 %v14797_v1  ;;  %v12278_v35 = vld [vmem:[%s16709_s3 + $0xc04] ss:$8 sps:$4 sm:$0xff]  }
 0x298   :  { %4801 = vmatpush1.bf16.msra.mxu1 %v12204_v51  ;;  %3223 = vmatprep.subr.bf16.mxu0 %v12209_v36  ;;  %v12281_v51 = vld [vmem:[%s16709_s3 + $0x1204] ss:$8 sps:$4 sm:$0xff]   ;;  %v12219_v36 = vld [vmem:[#allocation2 + $0x28] ss:$48 sps:$4 sm:$0xff]  }
 0x299   :  { %4802 = vmatprep.subr.bf16.mxu1 %v12212_v39  ;;  %v12276_v39 = vld [vmem:[%s16709_s3 + $0xc00] ss:$8 sps:$4 sm:$0xff]  }
 0x29b   :  { %3224 = vmatpush1.bf16.msra.mxu0 %v12207_v40  ;;  %v12279_v40 = vld [vmem:[%s16709_s3 + $0x1200] ss:$8 sps:$4 sm:$0xff]  }
 0x29c   :  { %4803 = vmatpush1.bf16.msra.mxu1 %v12210_v43  ;;  %3225 = vmatprep.subr.bf16.mxu0 %v12215_v62  ;;  %v12282_v43 = vld [vmem:[#allocation2 + $0x8c] ss:$48 sps:$4 sm:$0xff]  }
 0x29d   :  { %3205 = vmatmul.mubr.bf16.gmra.mrb[64].mxu0 %v14822_v52  ;;  %4804 = vmatprep.subr.bf16.mxu1 %v12218_v21  ;;  %v12286_v62 = vld [vmem:[%s16709_s3 + $0xc14] ss:$8 sps:$4 sm:$0xff]  }
 0x29e   :  { %4784 = vmatmul.mubr.bf16.gmra.mrb[72].mxu1 %v14822_v52  ;;  %3245 = vmatprep.mubr.bf16.mxu0 %v12221_v48  ;;  %v12289_v21 = vld [vmem:[%s16709_s3 + $0x1214] ss:$8 sps:$4 sm:$0xff]  }
 0x29f   :  { %3226 = vmatpush1.bf16.msra.mxu0 %v12213_v46  ;;  %4824 = vmatprep.mubr.bf16.mxu1 %v12221_v48  ;;  %v12284_v46 = vld [vmem:[%s16709_s3 + $0xc10] ss:$8 sps:$4 sm:$0xff]   ;;  %v12293_v48 = vld [vmem:[%s16709_s3 + $0xc24] ss:$8 sps:$4 sm:$0xff]  }
 0x2a0   :  { %4805 = vmatpush1.bf16.msra.mxu1 %v12216_v37  ;;  %3227 = vmatprep.subr.bf16.mxu0 %v12224_v53  ;;  %v12287_v37 = vld [vmem:[%s16709_s3 + $0x1210] ss:$8 sps:$4 sm:$0xff]   ;;  %v12296_v53 = vld [vmem:[%s16709_s3 + $0x1224] ss:$8 sps:$4 sm:$0xff]  }
 0x2a1   :  { %4806 = vmatprep.subr.bf16.mxu1 %v12227_v5  ;;  %v12290_v5 = vld [vmem:[#allocation2 + $0x88] ss:$48 sps:$4 sm:$0xff]  }
 0x2a3   :  { %3228 = vmatpush1.bf16.msra.mxu0 %v12222_v9  ;;  %v12291_v9 = vld [vmem:[%s16709_s3 + $0xc20] ss:$8 sps:$4 sm:$0xff]  }
 0x2a4   :  { %4807 = vmatpush1.bf16.msra.mxu1 %v12225_v44  ;;  %3229 = vmatprep.subr.bf16.mxu0 %v12230_v11  ;;  %v12294_v44 = vld [vmem:[%s16709_s3 + $0x1220] ss:$8 sps:$4 sm:$0xff]   ;;  %v12297_v11 = vld [vmem:[#allocation2 + $0xec] ss:$48 sps:$4 sm:$0xff]  }
 0x2a5   :  { %4808 = vmatprep.subr.bf16.mxu1 %v12233_v7  ;;  %v12301_v7 = vld [vmem:[%s16709_s3 + $0xc34] ss:$8 sps:$4 sm:$0xff]  }
 0x2a7   :  { %3230 = vmatpush1.bf16.msra.mxu0 %v12228_v58  ;;  %v12304_v58 = vld [vmem:[%s16709_s3 + $0x1234] ss:$8 sps:$4 sm:$0xff]  }
 0x2a8   :  { %4809 = vmatpush1.bf16.msra.mxu1 %v12231_v16  ;;  %3231 = vmatprep.subr.bf16.mxu0 %v12236_v24  ;;  %v12299_v16 = vld [vmem:[%s16709_s3 + $0xc30] ss:$8 sps:$4 sm:$0xff]  }
 0x2a9   :  { %4810 = vmatprep.subr.bf16.mxu1 %v12239_v17  ;;  %v12302_v24 = vld [vmem:[%s16709_s3 + $0x1230] ss:$8 sps:$4 sm:$0xff]   ;;  %v12308_v17 = vld [vmem:[%s16709_s3 + $0xc44] ss:$8 sps:$4 sm:$0xff]  }
 0x2ab   :  { %3232 = vmatpush1.bf16.msra.mxu0 %v12234_v60  ;;  %v12311_v60 = vld [vmem:[%s16709_s3 + $0x1244] ss:$8 sps:$4 sm:$0xff]  }
 0x2ac   :  { %4811 = vmatpush1.bf16.msra.mxu1 %v12237_v8  ;;  %3233 = vmatprep.subr.bf16.mxu0 %v12242_v31  ;;  %v12305_v8 = vld [vmem:[#allocation2 + $0xe8] ss:$48 sps:$4 sm:$0xff]  }
 0x2ad   :  { %4812 = vmatprep.subr.bf16.mxu1 %v12245_v59  ;;  %v12306_v31 = vld [vmem:[%s16709_s3 + $0xc40] ss:$8 sps:$4 sm:$0xff]  }
 0x2ae   :  { %v12309_v59 = vld [vmem:[%s16709_s3 + $0x1240] ss:$8 sps:$4 sm:$0xff]  }
 0x2af   :  { %3234 = vmatpush1.bf16.msra.mxu0 %v12240_v33  ;;  %v12314_v33 = vld [vmem:[%s16709_s3 + $0xc54] ss:$8 sps:$4 sm:$0xff]  }
 0x2b0   :  { %4813 = vmatpush1.bf16.msra.mxu1 %v12243_v18  ;;  %3235 = vmatprep.subr.bf16.mxu0 %v12248_v61  ;;  %v12317_v18 = vld [vmem:[%s16709_s3 + $0x1254] ss:$8 sps:$4 sm:$0xff]   ;;  %v12312_v61 = vld [vmem:[%s16709_s3 + $0xc50] ss:$8 sps:$4 sm:$0xff]  }
 0x2b1   :  { %4814 = vmatprep.subr.bf16.mxu1 %v12251_v13  ;;  %v12315_v13 = vld [vmem:[%s16709_s3 + $0x1250] ss:$8 sps:$4 sm:$0xff]  }
 0x2b3   :  { %3236 = vmatpush1.bf16.msra.mxu0 %v12246_v41  ;;  %v12320_v41 = vld [vmem:[%s16709_s3 + $0xc64] ss:$8 sps:$4 sm:$0xff]  }
 0x2b4   :  { %4815 = vmatpush1.bf16.msra.mxu1 %v12249_v30  ;;  %3237 = vmatprep.subr.bf16.mxu0 %v12254_v3  ;;  %v12323_v30 = vld [vmem:[%s16709_s3 + $0x1264] ss:$8 sps:$4 sm:$0xff]   ;;  %v12318_v3 = vld [vmem:[%s16709_s3 + $0xc60] ss:$8 sps:$4 sm:$0xff]  }
 0x2b5   :  { %4816 = vmatprep.subr.bf16.mxu1 %v12257_v20  ;;  %v12321_v20 = vld [vmem:[%s16709_s3 + $0x1260] ss:$8 sps:$4 sm:$0xff]  }
 0x2b7   :  { %3238 = vmatpush1.bf16.msra.mxu0 %v12252_v32  ;;  %v12326_v32 = vld [vmem:[%s16709_s3 + $0xc74] ss:$8 sps:$4 sm:$0xff]  }
 0x2b8   :  { %4817 = vmatpush1.bf16.msra.mxu1 %v12255_v10  ;;  %3239 = vmatprep.subr.bf16.mxu0 %v12260_v22  ;;  %v12329_v10 = vld [vmem:[%s16709_s3 + $0x1274] ss:$8 sps:$4 sm:$0xff]   ;;  %v12324_v22 = vld [vmem:[%s16709_s3 + $0xc70] ss:$8 sps:$4 sm:$0xff]  }
 0x2b9   :  { %4818 = vmatprep.subr.bf16.mxu1 %v12263_v63  ;;  %v12327_v63 = vld [vmem:[%s16709_s3 + $0x1270] ss:$8 sps:$4 sm:$0xff]  }
 0x2bb   :  { %3240 = vmatpush1.bf16.msra.mxu0 %v12258_v42  ;;  %v12332_v42 = vld [vmem:[%s16709_s3 + $0xc84] ss:$8 sps:$4 sm:$0xff]  }
 0x2bc   :  { %4819 = vmatpush1.bf16.msra.mxu1 %v12261_v34  ;;  %3241 = vmatprep.subr.bf16.mxu0 %v12266_v55  ;;  %v12335_v34 = vld [vmem:[%s16709_s3 + $0x1284] ss:$8 sps:$4 sm:$0xff]   ;;  %v12333_v55 = vld [vmem:[%s16709_s3 + $0x1280] ss:$8 sps:$4 sm:$0xff]  }
 0x2bd   :  { %4820 = vmatprep.subr.bf16.mxu1 %v12269_v45  ;;  %v12338_v45 = vld [vmem:[%s16709_s3 + $0xc94] ss:$8 sps:$4 sm:$0xff]  }
 0x2bf   :  { %3242 = vmatpush1.bf16.msra.mxu0 %v12264_v25  ;;  %v12341_v25 = vld [vmem:[%s16709_s3 + $0x1294] ss:$8 sps:$4 sm:$0xff]  }
 0x2c0   :  { %4821 = vmatpush1.bf16.msra.mxu1 %v12267_v56  ;;  %3243 = vmatprep.subr.bf16.mxu0 %v12272_v0  ;;  %v12336_v56 = vld [vmem:[%s16709_s3 + $0xc90] ss:$8 sps:$4 sm:$0xff]  }
 0x2c1   :  { %4822 = vmatprep.subr.bf16.mxu1 %v12275_v27  ;;  %v12339_v0 = vld [vmem:[%s16709_s3 + $0x1290] ss:$8 sps:$4 sm:$0xff]   ;;  %v12344_v27 = vld [vmem:[%s16709_s3 + $0xca4] ss:$8 sps:$4 sm:$0xff]  }
 0x2c3   :  { %3244 = vmatpush1.bf16.msra.mxu0 %v12270_v49  ;;  %v12347_v49 = vld [vmem:[%s16709_s3 + $0x12a4] ss:$8 sps:$4 sm:$0xff]  }
 0x2c4   :  { %4823 = vmatpush1.bf16.msra.mxu1 %v12273_v38  ;;  %6030 = vmatprep.subr.bf16.mxu0 %v12278_v35  ;;  %v12342_v38 = vld [vmem:[%s16709_s3 + $0xca0] ss:$8 sps:$4 sm:$0xff]  }
 0x2c5   :  { %7623 = vmatprep.subr.bf16.mxu1 %v12281_v51  ;;  %v12345_v35 = vld [vmem:[%s16709_s3 + $0x12a0] ss:$8 sps:$4 sm:$0xff]   ;;  %v12350_v51 = vld [vmem:[%s16709_s3 + $0xcb4] ss:$8 sps:$4 sm:$0xff]  }
 0x2c6   :  { %3246 = vmatmul.mubr.bf16.vlgmr.msra.gmra.mrb[52].mxu0 %v12219_v36 }
 0x2c7   :  { %4825 = vmatmul.mubr.bf16.vlgmr.msra.gmra.mrb[60].mxu1 %v12219_v36  ;;  %3255 = vmatprep.mubr.bf16.mxu0 %v12282_v43  ;;  %v12353_v36 = vld [vmem:[%s16709_s3 + $0x12b4] ss:$8 sps:$4 sm:$0xff]  }
 0x2c8   :  { %4834 = vmatprep.mubr.bf16.mxu1 %v12282_v43  ;;  %6031 = vmatpush1.bf16.msra.mxu0 %v12276_v39  ;;  %v12348_v39 = vld [vmem:[%s16709_s3 + $0xcb0] ss:$8 sps:$4 sm:$0xff]   ;;  %v12356_v43 = vld [vmem:[%s16709_s3 + $0xcc4] ss:$8 sps:$4 sm:$0xff]  }
 0x2c9   :  { %7624 = vmatpush1.bf16.msra.mxu1 %v12279_v40  ;;  %6032 = vmatprep.subr.bf16.mxu0 %v12286_v62  ;;  %v12351_v40 = vld [vmem:[%s16709_s3 + $0x12b0] ss:$8 sps:$4 sm:$0xff]   ;;  %v12359_v62 = vld [vmem:[%s16709_s3 + $0x12c4] ss:$8 sps:$4 sm:$0xff]  }
 0x2ca   :  { %7625 = vmatprep.subr.bf16.mxu1 %v12289_v21  ;;  %v12354_v21 = vld [vmem:[%s16709_s3 + $0xcc0] ss:$8 sps:$4 sm:$0xff]  }
 0x2cc   :  { %6033 = vmatpush1.bf16.msra.mxu0 %v12284_v46  ;;  %v12357_v46 = vld [vmem:[%s16709_s3 + $0x12c0] ss:$8 sps:$4 sm:$0xff]  }
 0x2cd   :  { %7626 = vmatpush1.bf16.msra.mxu1 %v12287_v37  ;;  %6034 = vmatprep.subr.bf16.mxu0 %v12293_v48  ;;  %v12362_v37 = vld [vmem:[%s16709_s3 + $0xcd4] ss:$8 sps:$4 sm:$0xff]  }
 0x2ce   :  { %3256 = vmatmul.mubr.bf16.gmra.mrb[56].mxu0 %v12290_v5  ;;  %7627 = vmatprep.subr.bf16.mxu1 %v12296_v53  ;;  %v12365_v48 = vld [vmem:[%s16709_s3 + $0x12d4] ss:$8 sps:$4 sm:$0xff]   ;;  %v12360_v53 = vld [vmem:[%s16709_s3 + $0xcd0] ss:$8 sps:$4 sm:$0xff]  }
 0x2cf   :  { %4835 = vmatmul.mubr.bf16.gmra.mrb[64].mxu1 %v12290_v5  ;;  %3265 = vmatprep.mubr.bf16.mxu0 %v12297_v11  ;;  %v12363_v5 = vld [vmem:[%s16709_s3 + $0x12d0] ss:$8 sps:$4 sm:$0xff]  }
 0x2d0   :  { %4844 = vmatprep.mubr.bf16.mxu1 %v12297_v11  ;;  %6035 = vmatpush1.bf16.msra.mxu0 %v12291_v9  ;;  %v12368_v9 = vld [vmem:[%s16709_s3 + $0xce4] ss:$8 sps:$4 sm:$0xff]   ;;  %v12366_v11 = vld [vmem:[%s16709_s3 + $0xce0] ss:$8 sps:$4 sm:$0xff]  }
 0x2d1   :  { %7628 = vmatpush1.bf16.msra.mxu1 %v12294_v44  ;;  %6036 = vmatprep.subr.bf16.mxu0 %v12301_v7  ;;  %v12371_v44 = vld [vmem:[%s16709_s3 + $0x12e4] ss:$8 sps:$4 sm:$0xff]   ;;  %v12369_v7 = vld [vmem:[%s16709_s3 + $0x12e0] ss:$8 sps:$4 sm:$0xff]  }
 0x2d2   :  { %7629 = vmatprep.subr.bf16.mxu1 %v12304_v58  ;;  %v12374_v58 = vld [vmem:[%s16709_s3 + $0xcf4] ss:$8 sps:$4 sm:$0xff]  }
 0x2d4   :  { %6037 = vmatpush1.bf16.msra.mxu0 %v12299_v16  ;;  %v12377_v16 = vld [vmem:[%s16709_s3 + $0x12f4] ss:$8 sps:$4 sm:$0xff]  }
 0x2d5   :  { %7630 = vmatpush1.bf16.msra.mxu1 %v12302_v24  ;;  %6038 = vmatprep.subr.bf16.mxu0 %v12308_v17  ;;  %v12372_v24 = vld [vmem:[%s16709_s3 + $0xcf0] ss:$8 sps:$4 sm:$0xff]  }
 0x2d6   :  { %3266 = vmatmul.mubr.bf16.gmra.mrb[60].mxu0 %v12305_v8  ;;  %7631 = vmatprep.subr.bf16.mxu1 %v12311_v60  ;;  %v12375_v17 = vld [vmem:[%s16709_s3 + $0x12f0] ss:$8 sps:$4 sm:$0xff]   ;;  %v12380_v60 = vld [vmem:[%s16709_s3 + $0xd04] ss:$8 sps:$4 sm:$0xff]  }
 0x2d7   :  { %4845 = vmatmul.mubr.bf16.gmra.mrb[68].mxu1 %v12305_v8  ;;  %3275 = vmatprep.mubr.bf16.mxu0 %v14797_v1  ;;  %v12383_v8 = vld [vmem:[%s16709_s3 + $0x1304] ss:$8 sps:$4 sm:$0xff]  }
 0x2d8   :  { %6039 = vmatpush1.bf16.msra.mxu0 %v12306_v31  ;;  %4854 = vmatprep.mubr.bf16.mxu1 %v14797_v1  ;;  %v12378_v31 = vld [vmem:[%s16709_s3 + $0xd00] ss:$8 sps:$4 sm:$0xff]  }
 0x2d9   :  { %7632 = vmatpush1.bf16.msra.mxu1 %v12309_v59  ;;  %6040 = vmatprep.subr.bf16.mxu0 %v12314_v33  ;;  %v12381_v59 = vld [vmem:[%s16709_s3 + $0x1300] ss:$8 sps:$4 sm:$0xff]   ;;  %v12386_v33 = vld [vmem:[%s16709_s3 + $0xd14] ss:$8 sps:$4 sm:$0xff]  }
 0x2da   :  { %7633 = vmatprep.subr.bf16.mxu1 %v12317_v18  ;;  %v12389_v18 = vld [vmem:[%s16709_s3 + $0x1314] ss:$8 sps:$4 sm:$0xff]  }
 0x2dc   :  { %6041 = vmatpush1.bf16.msra.mxu0 %v12312_v61  ;;  %v12958_v61 = vld [vmem:[#allocation2 + $0x64] ss:$48 sps:$4 sm:$0xff]  }
 0x2dd   :  { %7634 = vmatpush1.bf16.msra.mxu1 %v12315_v13  ;;  %6042 = vmatprep.subr.bf16.mxu0 %v12320_v41  ;;  %v12384_v13 = vld [vmem:[%s16709_s3 + $0xd10] ss:$8 sps:$4 sm:$0xff]  }
 0x2de   :  { %3276 = vmatmul.mubr.bf16.gmra.mrb[64].mxu0 %v14822_v52  ;;  %7635 = vmatprep.subr.bf16.mxu1 %v12323_v30  ;;  %v12387_v41 = vld [vmem:[%s16709_s3 + $0x1310] ss:$8 sps:$4 sm:$0xff]   ;;  %v12392_v30 = vld [vmem:[%s16709_s3 + $0xd24] ss:$8 sps:$4 sm:$0xff]  }
 0x2df   :  { %4855 = vmatmul.mubr.bf16.gmra.mrb[72].mxu1 %v14822_v52  ;;  %6062 = vmatprep.mubr.bf16.mxu0 %v13842_v54 }
 0x2e0   :  { %6043 = vmatpush1.bf16.msra.mxu0 %v12318_v3  ;;  %7655 = vmatprep.mubr.bf16.mxu1 %v13842_v54  ;;  %v12330_v54 = vld [vmem:[%s16709_s3 + $0xc80] ss:$8 sps:$4 sm:$0xff]  }
 0x2e1   :  { %7636 = vmatpush1.bf16.msra.mxu1 %v12321_v20  ;;  %6044 = vmatprep.subr.bf16.mxu0 %v12326_v32  ;;  %v12390_v3 = vld [vmem:[%s16709_s3 + $0xd20] ss:$8 sps:$4 sm:$0xff]   ;;  %v12398_v32 = vld [vmem:[%s16709_s3 + $0xd34] ss:$8 sps:$4 sm:$0xff]  }
 0x2e2   :  { %7637 = vmatprep.subr.bf16.mxu1 %v12329_v10  ;;  %v12393_v20 = vld [vmem:[%s16709_s3 + $0x1320] ss:$8 sps:$4 sm:$0xff]  }
 0x2e3   :  { %v12959_v10 = vld [vmem:[#allocation2 + $0x60] ss:$48 sps:$4 sm:$0xff]  }
 0x2e4   :  { %6045 = vmatpush1.bf16.msra.mxu0 %v12324_v22  ;;  %v12401_v22 = vld [vmem:[%s16709_s3 + $0x1334] ss:$8 sps:$4 sm:$0xff]  }
 0x2e5   :  { %7638 = vmatpush1.bf16.msra.mxu1 %v12327_v63  ;;  %6046 = vmatprep.subr.bf16.mxu0 %v12332_v42  ;;  %v12960_v63 = vld [vmem:[#allocation2 + $0xc4] ss:$48 sps:$4 sm:$0xff]   ;;  %v12396_v42 = vld [vmem:[%s16709_s3 + $0xd30] ss:$8 sps:$4 sm:$0xff]  }
 0x2e6   :  { %7639 = vmatprep.subr.bf16.mxu1 %v12335_v34  ;;  %v12399_v34 = vld [vmem:[%s16709_s3 + $0x1330] ss:$8 sps:$4 sm:$0xff]  }
 0x2e8   :  { %6047 = vmatpush1.bf16.msra.mxu0 %v12330_v54  ;;  %v12404_v54 = vld [vmem:[%s16709_s3 + $0xd44] ss:$8 sps:$4 sm:$0xff]  }
 0x2e9   :  { %7640 = vmatpush1.bf16.msra.mxu1 %v12333_v55  ;;  %6048 = vmatprep.subr.bf16.mxu0 %v12338_v45  ;;  %v12407_v55 = vld [vmem:[%s16709_s3 + $0x1344] ss:$8 sps:$4 sm:$0xff]   ;;  %v12402_v45 = vld [vmem:[%s16709_s3 + $0xd40] ss:$8 sps:$4 sm:$0xff]  }
 0x2ea   :  { %7641 = vmatprep.subr.bf16.mxu1 %v12341_v25  ;;  %v12405_v25 = vld [vmem:[%s16709_s3 + $0x1340] ss:$8 sps:$4 sm:$0xff]  }
 0x2ec   :  { %6049 = vmatpush1.bf16.msra.mxu0 %v12336_v56  ;;  %v12410_v56 = vld [vmem:[%s16709_s3 + $0xd54] ss:$8 sps:$4 sm:$0xff]  }
 0x2ed   :  { %7642 = vmatpush1.bf16.msra.mxu1 %v12339_v0  ;;  %6050 = vmatprep.subr.bf16.mxu0 %v12344_v27  ;;  %v12961_v0 = vld [vmem:[#allocation2 + $0xc0] ss:$48 sps:$4 sm:$0xff]   ;;  %v12413_v27 = vld [vmem:[%s16709_s3 + $0x1354] ss:$8 sps:$4 sm:$0xff]  }
 0x2ee   :  { %7643 = vmatprep.subr.bf16.mxu1 %v12347_v49  ;;  %v12408_v49 = vld [vmem:[%s16709_s3 + $0xd50] ss:$8 sps:$4 sm:$0xff]  }
 0x2f0   :  { %6051 = vmatpush1.bf16.msra.mxu0 %v12342_v38  ;;  %v12411_v38 = vld [vmem:[%s16709_s3 + $0x1350] ss:$8 sps:$4 sm:$0xff]  }
 0x2f1   :  { %7644 = vmatpush1.bf16.msra.mxu1 %v12345_v35  ;;  %6052 = vmatprep.subr.bf16.mxu0 %v12350_v51  ;;  %v12416_v35 = vld [vmem:[%s16709_s3 + $0xd64] ss:$8 sps:$4 sm:$0xff]  }
 0x2f2   :  { %7645 = vmatprep.subr.bf16.mxu1 %v12353_v36  ;;  %v12419_v51 = vld [vmem:[%s16709_s3 + $0x1364] ss:$8 sps:$4 sm:$0xff]   ;;  %v12417_v36 = vld [vmem:[%s16709_s3 + $0x1360] ss:$8 sps:$4 sm:$0xff]  }
 0x2f4   :  { %6053 = vmatpush1.bf16.msra.mxu0 %v12348_v39  ;;  %v12422_v39 = vld [vmem:[%s16709_s3 + $0xd74] ss:$8 sps:$4 sm:$0xff]  }
 0x2f5   :  { %7646 = vmatpush1.bf16.msra.mxu1 %v12351_v40  ;;  %6054 = vmatprep.subr.bf16.mxu0 %v12356_v43  ;;  %v12425_v40 = vld [vmem:[%s16709_s3 + $0x1374] ss:$8 sps:$4 sm:$0xff]   ;;  %v12420_v43 = vld [vmem:[%s16709_s3 + $0xd70] ss:$8 sps:$4 sm:$0xff]  }
 0x2f6   :  { %7647 = vmatprep.subr.bf16.mxu1 %v12359_v62  ;;  %v12423_v62 = vld [vmem:[%s16709_s3 + $0x1370] ss:$8 sps:$4 sm:$0xff]  }
 0x2f8   :  { %6055 = vmatpush1.bf16.msra.mxu0 %v12354_v21  ;;  %v12428_v21 = vld [vmem:[%s16709_s3 + $0xd84] ss:$8 sps:$4 sm:$0xff]  }
 0x2f9   :  { %7648 = vmatpush1.bf16.msra.mxu1 %v12357_v46  ;;  %6056 = vmatprep.subr.bf16.mxu0 %v12362_v37  ;;  %v12429_v46 = vld [vmem:[%s16709_s3 + $0x1380] ss:$8 sps:$4 sm:$0xff]   ;;  %v12434_v37 = vld [vmem:[%s16709_s3 + $0xd94] ss:$8 sps:$4 sm:$0xff]  }
 0x2fa   :  { %7649 = vmatprep.subr.bf16.mxu1 %v12365_v48  ;;  %v12437_v48 = vld [vmem:[%s16709_s3 + $0x1394] ss:$8 sps:$4 sm:$0xff]  }
 0x2fc   :  { %6057 = vmatpush1.bf16.msra.mxu0 %v12360_v53  ;;  %v12432_v53 = vld [vmem:[%s16709_s3 + $0xd90] ss:$8 sps:$4 sm:$0xff]  }
 0x2fd   :  { %7650 = vmatpush1.bf16.msra.mxu1 %v12363_v5  ;;  %6058 = vmatprep.subr.bf16.mxu0 %v12368_v9  ;;  %v12435_v5 = vld [vmem:[%s16709_s3 + $0x1390] ss:$8 sps:$4 sm:$0xff]   ;;  %v12440_v9 = vld [vmem:[%s16709_s3 + $0xda4] ss:$8 sps:$4 sm:$0xff]  }
 0x2fe   :  { %7651 = vmatprep.subr.bf16.mxu1 %v12371_v44  ;;  %v12443_v44 = vld [vmem:[%s16709_s3 + $0x13a4] ss:$8 sps:$4 sm:$0xff]  }
 0x300   :  { %6059 = vmatpush1.bf16.msra.mxu0 %v12366_v11  ;;  %v12438_v11 = vld [vmem:[%s16709_s3 + $0xda0] ss:$8 sps:$4 sm:$0xff]  }
 0x301   :  { %7652 = vmatpush1.bf16.msra.mxu1 %v12369_v7  ;;  %6060 = vmatprep.subr.bf16.mxu0 %v12374_v58  ;;  %v12441_v7 = vld [vmem:[%s16709_s3 + $0x13a0] ss:$8 sps:$4 sm:$0xff]   ;;  %v12446_v58 = vld [vmem:[%s16709_s3 + $0xdb4] ss:$8 sps:$4 sm:$0xff]  }
 0x302   :  { %7653 = vmatprep.subr.bf16.mxu1 %v12377_v16  ;;  %v12449_v16 = vld [vmem:[%s16709_s3 + $0x13b4] ss:$8 sps:$4 sm:$0xff]  }
 0x304   :  { %6061 = vmatpush1.bf16.msra.mxu0 %v12372_v24  ;;  %v12444_v24 = vld [vmem:[%s16709_s3 + $0xdb0] ss:$8 sps:$4 sm:$0xff]  }
 0x305   :  { %7654 = vmatpush1.bf16.msra.mxu1 %v12375_v17  ;;  %6101 = vmatprep.subr.bf16.mxu0 %v12380_v60  ;;  %v12447_v17 = vld [vmem:[%s16709_s3 + $0x13b0] ss:$8 sps:$4 sm:$0xff]   ;;  %v12452_v60 = vld [vmem:[%s16709_s3 + $0xdc4] ss:$8 sps:$4 sm:$0xff]  }
 0x306   :  { %7694 = vmatprep.subr.bf16.mxu1 %v12383_v8  ;;  %v12455_v8 = vld [vmem:[%s16709_s3 + $0x13c4] ss:$8 sps:$4 sm:$0xff]  }
 0x307   :  { %6063 = vmatmul.mubr.bf16.vlgmr.msra.gmra.mrb[68].mxu0 %v13839_v6 }
 0x308   :  { %7656 = vmatmul.mubr.bf16.vlgmr.msra.gmra.mrb[76].mxu1 %v13839_v6  ;;  %6072 = vmatprep.mubr.bf16.mxu0 %v12958_v61  ;;  %v12395_v6 = vld [vmem:[%s16709_s3 + $0x1324] ss:$8 sps:$4 sm:$0xff]  }
 0x309   :  { %6102 = vmatpush1.bf16.msra.mxu0 %v12378_v31  ;;  %7665 = vmatprep.mubr.bf16.mxu1 %v12958_v61  ;;  %v12450_v31 = vld [vmem:[%s16709_s3 + $0xdc0] ss:$8 sps:$4 sm:$0xff]   ;;  %v12456_v61 = vld [vmem:[%s16709_s3 + $0xdd0] ss:$8 sps:$4 sm:$0xff]  }
 0x30a   :  { %7695 = vmatpush1.bf16.msra.mxu1 %v12381_v59  ;;  %6103 = vmatprep.subr.bf16.mxu0 %v12386_v33  ;;  %v12453_v59 = vld [vmem:[%s16709_s3 + $0x13c0] ss:$8 sps:$4 sm:$0xff]   ;;  %v12458_v33 = vld [vmem:[%s16709_s3 + $0xdd4] ss:$8 sps:$4 sm:$0xff]  }
 0x30b   :  { %7696 = vmatprep.subr.bf16.mxu1 %v12389_v18  ;;  %v12461_v18 = vld [vmem:[%s16709_s3 + $0x13d4] ss:$8 sps:$4 sm:$0xff]  }
 0x30d   :  { %6104 = vmatpush1.bf16.msra.mxu0 %v12384_v13  ;;  %v12459_v13 = vld [vmem:[%s16709_s3 + $0x13d0] ss:$8 sps:$4 sm:$0xff]  }
 0x30e   :  { %7697 = vmatpush1.bf16.msra.mxu1 %v12387_v41  ;;  %6105 = vmatprep.subr.bf16.mxu0 %v12392_v30  ;;  %v12464_v41 = vld [vmem:[%s16709_s3 + $0xde4] ss:$8 sps:$4 sm:$0xff]  }
 0x30f   :  { %6073 = vmatmul.mubr.bf16.gmra.mrb[72].mxu0 %v12959_v10  ;;  %7698 = vmatprep.subr.bf16.mxu1 %v12395_v6  ;;  %v12467_v30 = vld [vmem:[%s16709_s3 + $0x13e4] ss:$8 sps:$4 sm:$0xff]   ;;  %v12462_v6 = vld [vmem:[%s16709_s3 + $0xde0] ss:$8 sps:$4 sm:$0xff]  }
 0x310   :  { %7666 = vmatmul.mubr.bf16.gmra.mrb[80].mxu1 %v12959_v10  ;;  %6082 = vmatprep.mubr.bf16.mxu0 %v12960_v63  ;;  %v12468_v10 = vld [vmem:[%s16709_s3 + $0xdf0] ss:$8 sps:$4 sm:$0xff]  }
 0x311   :  { %6106 = vmatpush1.bf16.msra.mxu0 %v12390_v3  ;;  %7675 = vmatprep.mubr.bf16.mxu1 %v12960_v63  ;;  %v12465_v3 = vld [vmem:[%s16709_s3 + $0x13e0] ss:$8 sps:$4 sm:$0xff]   ;;  %v12476_v63 = vld [vmem:[%s16709_s3 + $0xe04] ss:$8 sps:$4 sm:$0xff]  }
 0x312   :  { %7699 = vmatpush1.bf16.msra.mxu1 %v12393_v20  ;;  %6107 = vmatprep.subr.bf16.mxu0 %v12398_v32  ;;  %v12470_v20 = vld [vmem:[%s16709_s3 + $0xdf4] ss:$8 sps:$4 sm:$0xff]  }
 0x313   :  { %7700 = vmatprep.subr.bf16.mxu1 %v12401_v22  ;;  %v12473_v32 = vld [vmem:[%s16709_s3 + $0x13f4] ss:$8 sps:$4 sm:$0xff]   ;;  %v12471_v22 = vld [vmem:[%s16709_s3 + $0x13f0] ss:$8 sps:$4 sm:$0xff]  }
 0x315   :  { %6108 = vmatpush1.bf16.msra.mxu0 %v12396_v42  ;;  %v12479_v42 = vld [vmem:[%s16709_s3 + $0x1404] ss:$8 sps:$4 sm:$0xff]  }
 0x316   :  { %7701 = vmatpush1.bf16.msra.mxu1 %v12399_v34  ;;  %6109 = vmatprep.subr.bf16.mxu0 %v12404_v54  ;;  %v12474_v34 = vld [vmem:[%s16709_s3 + $0xe00] ss:$8 sps:$4 sm:$0xff]  }
 0x317   :  { %6083 = vmatmul.mubr.bf16.gmra.mrb[76].mxu0 %v12961_v0  ;;  %7702 = vmatprep.subr.bf16.mxu1 %v12407_v55  ;;  %v12477_v54 = vld [vmem:[%s16709_s3 + $0x1400] ss:$8 sps:$4 sm:$0xff]   ;;  %v12482_v55 = vld [vmem:[%s16709_s3 + $0xe14] ss:$8 sps:$4 sm:$0xff]  }
 0x318   :  { %7676 = vmatmul.mubr.bf16.gmra.mrb[84].mxu1 %v12961_v0  ;;  %6092 = vmatprep.mubr.bf16.mxu0 %v14055_v26  ;;  %v12483_v0 = vld [vmem:[%s16709_s3 + $0x1410] ss:$8 sps:$4 sm:$0xff]  }
 0x319   :  { %6110 = vmatpush1.bf16.msra.mxu0 %v12402_v45  ;;  %7685 = vmatprep.mubr.bf16.mxu1 %v14055_v26  ;;  %v12414_v26 = vld [vmem:[%s16709_s3 + $0xd60] ss:$8 sps:$4 sm:$0xff]   ;;  %v12485_v45 = vld [vmem:[%s16709_s3 + $0x1414] ss:$8 sps:$4 sm:$0xff]  }
 0x31a   :  { %7703 = vmatpush1.bf16.msra.mxu1 %v12405_v25  ;;  %6111 = vmatprep.subr.bf16.mxu0 %v12410_v56  ;;  %v12962_v25 = vld [vmem:[#allocation2 + $0x6c] ss:$48 sps:$4 sm:$0xff]   ;;  %v12480_v56 = vld [vmem:[%s16709_s3 + $0xe10] ss:$8 sps:$4 sm:$0xff]  }
 0x31b   :  { %7704 = vmatprep.subr.bf16.mxu1 %v12413_v27  ;;  %v12488_v27 = vld [vmem:[%s16709_s3 + $0xe24] ss:$8 sps:$4 sm:$0xff]  }
 0x31d   :  { %6112 = vmatpush1.bf16.msra.mxu0 %v12408_v49  ;;  %v12486_v49 = vld [vmem:[%s16709_s3 + $0xe20] ss:$8 sps:$4 sm:$0xff]  }
 0x31e   :  { %7705 = vmatpush1.bf16.msra.mxu1 %v12411_v38  ;;  %6113 = vmatprep.subr.bf16.mxu0 %v12416_v35  ;;  %v12489_v38 = vld [vmem:[%s16709_s3 + $0x1420] ss:$8 sps:$4 sm:$0xff]   ;;  %v12494_v35 = vld [vmem:[%s16709_s3 + $0xe34] ss:$8 sps:$4 sm:$0xff]  }
 0x31f   :  { %6093 = vmatmul.mubr.bf16.gmra.mrb[80].mxu0 %v14063_v14  ;;  %7706 = vmatprep.subr.bf16.mxu1 %v12419_v51  ;;  %v12963_v51 = vld [vmem:[#allocation2 + $0x68] ss:$48 sps:$4 sm:$0xff]  }
 0x320   :  { %7686 = vmatmul.mubr.bf16.gmra.mrb[88].mxu1 %v14063_v14  ;;  %6133 = vmatprep.mubr.bf16.mxu0 %v14083_v29  ;;  %v12431_v14 = vld [vmem:[%s16709_s3 + $0x1384] ss:$8 sps:$4 sm:$0xff]  }
 0x321   :  { %6114 = vmatpush1.bf16.msra.mxu0 %v12414_v26  ;;  %7726 = vmatprep.mubr.bf16.mxu1 %v14083_v29  ;;  %v12426_v29 = vld [vmem:[%s16709_s3 + $0xd80] ss:$8 sps:$4 sm:$0xff]   ;;  %v12497_v26 = vld [vmem:[%s16709_s3 + $0x1434] ss:$8 sps:$4 sm:$0xff]  }
 0x322   :  { %7707 = vmatpush1.bf16.msra.mxu1 %v12417_v36  ;;  %6115 = vmatprep.subr.bf16.mxu0 %v12422_v39  ;;  %v12964_v36 = vld [vmem:[#allocation2 + $0xcc] ss:$48 sps:$4 sm:$0xff]   ;;  %v12492_v39 = vld [vmem:[%s16709_s3 + $0xe30] ss:$8 sps:$4 sm:$0xff]  }
 0x323   :  { %7708 = vmatprep.subr.bf16.mxu1 %v12425_v40  ;;  %v12495_v40 = vld [vmem:[%s16709_s3 + $0x1430] ss:$8 sps:$4 sm:$0xff]  }
 0x325   :  { %6116 = vmatpush1.bf16.msra.mxu0 %v12420_v43  ;;  %v12500_v43 = vld [vmem:[%s16709_s3 + $0xe44] ss:$8 sps:$4 sm:$0xff]  }
 0x326   :  { %7709 = vmatpush1.bf16.msra.mxu1 %v12423_v62  ;;  %6117 = vmatprep.subr.bf16.mxu0 %v12428_v21  ;;  %v12503_v62 = vld [vmem:[%s16709_s3 + $0x1444] ss:$8 sps:$4 sm:$0xff]   ;;  %v12498_v21 = vld [vmem:[%s16709_s3 + $0xe40] ss:$8 sps:$4 sm:$0xff]  }
 0x327   :  { %7710 = vmatprep.subr.bf16.mxu1 %v12431_v14  ;;  %v12501_v14 = vld [vmem:[%s16709_s3 + $0x1440] ss:$8 sps:$4 sm:$0xff]  }
 0x329   :  { %6118 = vmatpush1.bf16.msra.mxu0 %v12426_v29  ;;  %v12506_v29 = vld [vmem:[%s16709_s3 + $0xe54] ss:$8 sps:$4 sm:$0xff]  }
 0x32a   :  { %7711 = vmatpush1.bf16.msra.mxu1 %v12429_v46  ;;  %6119 = vmatprep.subr.bf16.mxu0 %v12434_v37  ;;  %v12965_v46 = vld [vmem:[#allocation2 + $0xc8] ss:$48 sps:$4 sm:$0xff]   ;;  %v12509_v37 = vld [vmem:[%s16709_s3 + $0x1454] ss:$8 sps:$4 sm:$0xff]  }
 0x32b   :  { %7712 = vmatprep.subr.bf16.mxu1 %v12437_v48  ;;  %v12504_v48 = vld [vmem:[%s16709_s3 + $0xe50] ss:$8 sps:$4 sm:$0xff]  }
 0x32d   :  { %6120 = vmatpush1.bf16.msra.mxu0 %v12432_v53  ;;  %v12507_v53 = vld [vmem:[%s16709_s3 + $0x1450] ss:$8 sps:$4 sm:$0xff]  }
 0x32e   :  { %7713 = vmatpush1.bf16.msra.mxu1 %v12435_v5  ;;  %6121 = vmatprep.subr.bf16.mxu0 %v12440_v9  ;;  %v12512_v5 = vld [vmem:[%s16709_s3 + $0xe64] ss:$8 sps:$4 sm:$0xff]  }
 0x32f   :  { %7714 = vmatprep.subr.bf16.mxu1 %v12443_v44  ;;  %v12515_v9 = vld [vmem:[%s16709_s3 + $0x1464] ss:$8 sps:$4 sm:$0xff]   ;;  %v12513_v44 = vld [vmem:[%s16709_s3 + $0x1460] ss:$8 sps:$4 sm:$0xff]  }
 0x331   :  { %6122 = vmatpush1.bf16.msra.mxu0 %v12438_v11  ;;  %v12518_v11 = vld [vmem:[%s16709_s3 + $0xe74] ss:$8 sps:$4 sm:$0xff]  }
 0x332   :  { %7715 = vmatpush1.bf16.msra.mxu1 %v12441_v7  ;;  %6123 = vmatprep.subr.bf16.mxu0 %v12446_v58  ;;  %v12521_v7 = vld [vmem:[%s16709_s3 + $0x1474] ss:$8 sps:$4 sm:$0xff]  }
 0x333   :  { %7716 = vmatprep.subr.bf16.mxu1 %v12449_v16  ;;  %v12966_v58 = vld [vmem:[#allocation2 + $0x14] ss:$48 sps:$4 sm:$0xff]   ;;  %v12516_v16 = vld [vmem:[%s16709_s3 + $0xe70] ss:$8 sps:$4 sm:$0xff]  }
 0x335   :  { %6124 = vmatpush1.bf16.msra.mxu0 %v12444_v24  ;;  %v12519_v24 = vld [vmem:[%s16709_s3 + $0x1470] ss:$8 sps:$4 sm:$0xff]  }
 0x336   :  { %7717 = vmatpush1.bf16.msra.mxu1 %v12447_v17  ;;  %6125 = vmatprep.subr.bf16.mxu0 %v12452_v60  ;;  %v12524_v17 = vld [vmem:[%s16709_s3 + $0xe84] ss:$8 sps:$4 sm:$0xff]   ;;  %v12522_v60 = vld [vmem:[%s16709_s3 + $0xe80] ss:$8 sps:$4 sm:$0xff]  }
 0x337   :  { %7718 = vmatprep.subr.bf16.mxu1 %v12455_v8  ;;  %v12525_v8 = vld [vmem:[%s16709_s3 + $0x1480] ss:$8 sps:$4 sm:$0xff]  }
 0x339   :  { %6126 = vmatpush1.bf16.msra.mxu0 %v12450_v31  ;;  %v12530_v31 = vld [vmem:[%s16709_s3 + $0xe94] ss:$8 sps:$4 sm:$0xff]  }
 0x33a   :  { %7719 = vmatpush1.bf16.msra.mxu1 %v12453_v59  ;;  %6127 = vmatprep.subr.bf16.mxu0 %v12458_v33  ;;  %v12533_v59 = vld [vmem:[%s16709_s3 + $0x1494] ss:$8 sps:$4 sm:$0xff]   ;;  %v12528_v33 = vld [vmem:[%s16709_s3 + $0xe90] ss:$8 sps:$4 sm:$0xff]  }
 0x33b   :  { %7720 = vmatprep.subr.bf16.mxu1 %v12461_v18  ;;  %v12531_v18 = vld [vmem:[%s16709_s3 + $0x1490] ss:$8 sps:$4 sm:$0xff]  }
 0x33d   :  { %6128 = vmatpush1.bf16.msra.mxu0 %v12456_v61  ;;  %v12536_v61 = vld [vmem:[%s16709_s3 + $0xea4] ss:$8 sps:$4 sm:$0xff]  }
 0x33e   :  { %7721 = vmatpush1.bf16.msra.mxu1 %v12459_v13  ;;  %6129 = vmatprep.subr.bf16.mxu0 %v12464_v41  ;;  %v12539_v13 = vld [vmem:[%s16709_s3 + $0x14a4] ss:$8 sps:$4 sm:$0xff]   ;;  %v12534_v41 = vld [vmem:[%s16709_s3 + $0xea0] ss:$8 sps:$4 sm:$0xff]  }
 0x33f   :  { %7722 = vmatprep.subr.bf16.mxu1 %v12467_v30  ;;  %v12537_v30 = vld [vmem:[%s16709_s3 + $0x14a0] ss:$8 sps:$4 sm:$0xff]  }
 0x341   :  { %6130 = vmatpush1.bf16.msra.mxu0 %v12462_v6  ;;  %v12542_v6 = vld [vmem:[%s16709_s3 + $0xeb4] ss:$8 sps:$4 sm:$0xff]  }
 0x342   :  { %7723 = vmatpush1.bf16.msra.mxu1 %v12465_v3  ;;  %6131 = vmatprep.subr.bf16.mxu0 %v12470_v20  ;;  %v12545_v3 = vld [vmem:[%s16709_s3 + $0x14b4] ss:$8 sps:$4 sm:$0xff]   ;;  %v12540_v20 = vld [vmem:[%s16709_s3 + $0xeb0] ss:$8 sps:$4 sm:$0xff]  }
 0x343   :  { %7724 = vmatprep.subr.bf16.mxu1 %v12473_v32  ;;  %v12543_v32 = vld [vmem:[%s16709_s3 + $0x14b0] ss:$8 sps:$4 sm:$0xff]  }
 0x345   :  { %6132 = vmatpush1.bf16.msra.mxu0 %v12468_v10  ;;  %v12548_v10 = vld [vmem:[%s16709_s3 + $0xec4] ss:$8 sps:$4 sm:$0xff]  }
 0x346   :  { %7725 = vmatpush1.bf16.msra.mxu1 %v12471_v22  ;;  %6172 = vmatprep.subr.bf16.mxu0 %v12476_v63  ;;  %v12551_v22 = vld [vmem:[%s16709_s3 + $0x14c4] ss:$8 sps:$4 sm:$0xff]   ;;  %v12546_v63 = vld [vmem:[%s16709_s3 + $0xec0] ss:$8 sps:$4 sm:$0xff]  }
 0x347   :  { %7765 = vmatprep.subr.bf16.mxu1 %v12479_v42  ;;  %v12549_v42 = vld [vmem:[%s16709_s3 + $0x14c0] ss:$8 sps:$4 sm:$0xff]  }
 0x348   :  { %6134 = vmatmul.mubr.bf16.vlgmr.msra.gmra.mrb[68].mxu0 %v14157_v47 }
 0x349   :  { %7727 = vmatmul.mubr.bf16.vlgmr.msra.gmra.mrb[76].mxu1 %v14157_v47  ;;  %6143 = vmatprep.mubr.bf16.mxu0 %v12962_v25  ;;  %v12491_v47 = vld [vmem:[%s16709_s3 + $0x1424] ss:$8 sps:$4 sm:$0xff]  }
 0x34a   :  { %6173 = vmatpush1.bf16.msra.mxu0 %v12474_v34  ;;  %7736 = vmatprep.mubr.bf16.mxu1 %v12962_v25  ;;  %v12554_v34 = vld [vmem:[%s16709_s3 + $0xed4] ss:$8 sps:$4 sm:$0xff]   ;;  %v12560_v25 = vld [vmem:[%s16709_s3 + $0xee4] ss:$8 sps:$4 sm:$0xff]  }
 0x34b   :  { %7766 = vmatpush1.bf16.msra.mxu1 %v12477_v54  ;;  %6174 = vmatprep.subr.bf16.mxu0 %v12482_v55  ;;  %v12557_v54 = vld [vmem:[%s16709_s3 + $0x14d4] ss:$8 sps:$4 sm:$0xff]   ;;  %v12552_v55 = vld [vmem:[%s16709_s3 + $0xed0] ss:$8 sps:$4 sm:$0xff]  }
 0x34c   :  { %7767 = vmatprep.subr.bf16.mxu1 %v12485_v45  ;;  %v12555_v45 = vld [vmem:[%s16709_s3 + $0x14d0] ss:$8 sps:$4 sm:$0xff]  }
 0x34e   :  { %6175 = vmatpush1.bf16.msra.mxu0 %v12480_v56  ;;  %v12563_v56 = vld [vmem:[%s16709_s3 + $0x14e4] ss:$8 sps:$4 sm:$0xff]  }
 0x34f   :  { %7768 = vmatpush1.bf16.msra.mxu1 %v12483_v0  ;;  %6176 = vmatprep.subr.bf16.mxu0 %v12488_v27  ;;  %v12558_v0 = vld [vmem:[%s16709_s3 + $0xee0] ss:$8 sps:$4 sm:$0xff]  }
 0x350   :  { %6144 = vmatmul.mubr.bf16.gmra.mrb[72].mxu0 %v12963_v51  ;;  %7769 = vmatprep.subr.bf16.mxu1 %v12491_v47  ;;  %v12561_v27 = vld [vmem:[%s16709_s3 + $0x14e0] ss:$8 sps:$4 sm:$0xff]   ;;  %v12566_v47 = vld [vmem:[%s16709_s3 + $0xef4] ss:$8 sps:$4 sm:$0xff]  }
 0x351   :  { %7737 = vmatmul.mubr.bf16.gmra.mrb[80].mxu1 %v12963_v51  ;;  %6153 = vmatprep.mubr.bf16.mxu0 %v12964_v36  ;;  %v12572_v51 = vld [vmem:[%s16709_s3 + $0xf04] ss:$8 sps:$4 sm:$0xff]  }
 0x352   :  { %6177 = vmatpush1.bf16.msra.mxu0 %v12486_v49  ;;  %7746 = vmatprep.mubr.bf16.mxu1 %v12964_v36  ;;  %v12569_v49 = vld [vmem:[%s16709_s3 + $0x14f4] ss:$8 sps:$4 sm:$0xff]   ;;  %v12570_v36 = vld [vmem:[%s16709_s3 + $0xf00] ss:$8 sps:$4 sm:$0xff]  }
 0x353   :  { %7770 = vmatpush1.bf16.msra.mxu1 %v12489_v38  ;;  %6178 = vmatprep.subr.bf16.mxu0 %v12494_v35  ;;  %v12564_v38 = vld [vmem:[%s16709_s3 + $0xef0] ss:$8 sps:$4 sm:$0xff]  }
 0x354   :  { %7771 = vmatprep.subr.bf16.mxu1 %v12497_v26  ;;  %v12567_v35 = vld [vmem:[%s16709_s3 + $0x14f0] ss:$8 sps:$4 sm:$0xff]   ;;  %v12575_v26 = vld [vmem:[%s16709_s3 + $0x1504] ss:$8 sps:$4 sm:$0xff]  }
 0x356   :  { %6179 = vmatpush1.bf16.msra.mxu0 %v12492_v39  ;;  %v12573_v39 = vld [vmem:[%s16709_s3 + $0x1500] ss:$8 sps:$4 sm:$0xff]  }
 0x357   :  { %7772 = vmatpush1.bf16.msra.mxu1 %v12495_v40  ;;  %6180 = vmatprep.subr.bf16.mxu0 %v12500_v43  ;;  %v12578_v40 = vld [vmem:[%s16709_s3 + $0xf14] ss:$8 sps:$4 sm:$0xff]   ;;  %v12967_v43 = vld [vmem:[#allocation2 + $0x10] ss:$48 sps:$4 sm:$0xff]  }
 0x358   :  { %6154 = vmatmul.mubr.bf16.gmra.mrb[76].mxu0 %v12965_v46  ;;  %7773 = vmatprep.subr.bf16.mxu1 %v12503_v62  ;;  %v12581_v62 = vld [vmem:[%s16709_s3 + $0x1514] ss:$8 sps:$4 sm:$0xff]  }
 0x359   :  { %7747 = vmatmul.mubr.bf16.gmra.mrb[84].mxu1 %v12965_v46  ;;  %6163 = vmatprep.mubr.bf16.mxu0 %v14209_v23  ;;  %v12584_v46 = vld [vmem:[%s16709_s3 + $0xf24] ss:$8 sps:$4 sm:$0xff]  }
 0x35a   :  { %6181 = vmatpush1.bf16.msra.mxu0 %v12498_v21  ;;  %7756 = vmatprep.mubr.bf16.mxu1 %v14209_v23  ;;  %v12510_v23 = vld [vmem:[%s16709_s3 + $0xe60] ss:$8 sps:$4 sm:$0xff]   ;;  %v12968_v21 = vld [vmem:[#allocation2 + $0x74] ss:$48 sps:$4 sm:$0xff]  }
 0x35b   :  { %7774 = vmatpush1.bf16.msra.mxu1 %v12501_v14  ;;  %6182 = vmatprep.subr.bf16.mxu0 %v12506_v29  ;;  %v12576_v14 = vld [vmem:[%s16709_s3 + $0xf10] ss:$8 sps:$4 sm:$0xff]  }
 0x35c   :  { %7775 = vmatprep.subr.bf16.mxu1 %v12509_v37  ;;  %v12579_v29 = vld [vmem:[%s16709_s3 + $0x1510] ss:$8 sps:$4 sm:$0xff]   ;;  %v12587_v37 = vld [vmem:[%s16709_s3 + $0x1524] ss:$8 sps:$4 sm:$0xff]  }
 0x35e   :  { %6183 = vmatpush1.bf16.msra.mxu0 %v12504_v48  ;;  %v12582_v48 = vld [vmem:[%s16709_s3 + $0xf20] ss:$8 sps:$4 sm:$0xff]  }
 0x35f   :  { %7776 = vmatpush1.bf16.msra.mxu1 %v12507_v53  ;;  %6184 = vmatprep.subr.bf16.mxu0 %v12512_v5  ;;  %v12585_v53 = vld [vmem:[%s16709_s3 + $0x1520] ss:$8 sps:$4 sm:$0xff]   ;;  %v12590_v5 = vld [vmem:[%s16709_s3 + $0xf34] ss:$8 sps:$4 sm:$0xff]  }
 0x360   :  { %6164 = vmatmul.mubr.bf16.gmra.mrb[80].mxu0 %v14237_v15  ;;  %7777 = vmatprep.subr.bf16.mxu1 %v12515_v9  ;;  %v12969_v9 = vld [vmem:[#allocation2 + $0x70] ss:$48 sps:$4 sm:$0xff]  }
 0x361   :  { %7757 = vmatmul.mubr.bf16.gmra.mrb[88].mxu1 %v14237_v15  ;;  %6204 = vmatprep.mubr.bf16.mxu0 %v12966_v58  ;;  %v12527_v15 = vld [vmem:[%s16709_s3 + $0x1484] ss:$8 sps:$4 sm:$0xff]  }
 0x362   :  { %6185 = vmatpush1.bf16.msra.mxu0 %v12510_v23  ;;  %7797 = vmatprep.mubr.bf16.mxu1 %v12966_v58  ;;  %v12593_v23 = vld [vmem:[%s16709_s3 + $0x1534] ss:$8 sps:$4 sm:$0xff]   ;;  %v12596_v58 = vld [vmem:[%s16709_s3 + $0xf44] ss:$8 sps:$4 sm:$0xff]  }
 0x363   :  { %7778 = vmatpush1.bf16.msra.mxu1 %v12513_v44  ;;  %6186 = vmatprep.subr.bf16.mxu0 %v12518_v11  ;;  %v12970_v44 = vld [vmem:[#allocation2 + $0xd4] ss:$48 sps:$4 sm:$0xff]   ;;  %v12588_v11 = vld [vmem:[%s16709_s3 + $0xf30] ss:$8 sps:$4 sm:$0xff]  }
 0x364   :  { %7779 = vmatprep.subr.bf16.mxu1 %v12521_v7  ;;  %v12591_v7 = vld [vmem:[%s16709_s3 + $0x1530] ss:$8 sps:$4 sm:$0xff]  }
 0x366   :  { %6187 = vmatpush1.bf16.msra.mxu0 %v12516_v16  ;;  %v12599_v16 = vld [vmem:[%s16709_s3 + $0x1544] ss:$8 sps:$4 sm:$0xff]  }
 0x367   :  { %7780 = vmatpush1.bf16.msra.mxu1 %v12519_v24  ;;  %6188 = vmatprep.subr.bf16.mxu0 %v12524_v17  ;;  %v12594_v24 = vld [vmem:[%s16709_s3 + $0xf40] ss:$8 sps:$4 sm:$0xff]  }
 0x368   :  { %7781 = vmatprep.subr.bf16.mxu1 %v12527_v15  ;;  %v12597_v17 = vld [vmem:[%s16709_s3 + $0x1540] ss:$8 sps:$4 sm:$0xff]   ;;  %v12602_v15 = vld [vmem:[%s16709_s3 + $0xf54] ss:$8 sps:$4 sm:$0xff]  }
 0x36a   :  { %6189 = vmatpush1.bf16.msra.mxu0 %v12522_v60  ;;  %v12971_v60 = vld [vmem:[#allocation2 + $0xd0] ss:$48 sps:$4 sm:$0xff]  }
 0x36b   :  { %7782 = vmatpush1.bf16.msra.mxu1 %v12525_v8  ;;  %6190 = vmatprep.subr.bf16.mxu0 %v12530_v31  ;;  %v12605_v31 = vld [vmem:[%s16709_s3 + $0x1554] ss:$8 sps:$4 sm:$0xff]  }
 0x36c   :  { %7783 = vmatprep.subr.bf16.mxu1 %v12533_v59 }
 0x36e   :  { %6191 = vmatpush1.bf16.msra.mxu0 %v12528_v33 }
 0x36f   :  { %7784 = vmatpush1.bf16.msra.mxu1 %v12531_v18  ;;  %6192 = vmatprep.subr.bf16.mxu0 %v12536_v61 }
 0x370   :  { %7785 = vmatprep.subr.bf16.mxu1 %v12539_v13  ;;  %v12600_v13 = vld [vmem:[%s16709_s3 + $0xf50] ss:$8 sps:$4 sm:$0xff]  }
 0x372   :  { %6193 = vmatpush1.bf16.msra.mxu0 %v12534_v41 }
 0x373   :  { %7786 = vmatpush1.bf16.msra.mxu1 %v12537_v30  ;;  %6194 = vmatprep.subr.bf16.mxu0 %v12542_v6 }
 0x374   :  { %7787 = vmatprep.subr.bf16.mxu1 %v12545_v3 }
 0x376   :  { %6195 = vmatpush1.bf16.msra.mxu0 %v12540_v20  ;;  %v12608_v20 = vld [vmem:[%s16709_s3 + $0xf64] ss:$8 sps:$4 sm:$0xff]  }
 0x377   :  { %7788 = vmatpush1.bf16.msra.mxu1 %v12543_v32  ;;  %6196 = vmatprep.subr.bf16.mxu0 %v12548_v10 }
 0x378   :  { %7789 = vmatprep.subr.bf16.mxu1 %v12551_v22  ;;  %v12611_v22 = vld [vmem:[%s16709_s3 + $0x1564] ss:$8 sps:$4 sm:$0xff]  }
 0x37a   :  { %6197 = vmatpush1.bf16.msra.mxu0 %v12546_v63 }
 0x37b   :  { %7790 = vmatpush1.bf16.msra.mxu1 %v12549_v42  ;;  %6198 = vmatprep.subr.bf16.mxu0 %v12554_v34  ;;  %v12606_v42 = vld [vmem:[%s16709_s3 + $0xf60] ss:$8 sps:$4 sm:$0xff]  }
 0x37c   :  { %7791 = vmatprep.subr.bf16.mxu1 %v12557_v54  ;;  %v12609_v34 = vld [vmem:[%s16709_s3 + $0x1560] ss:$8 sps:$4 sm:$0xff]   ;;  %v12614_v54 = vld [vmem:[%s16709_s3 + $0xf74] ss:$8 sps:$4 sm:$0xff]  }
 0x37e   :  { %6199 = vmatpush1.bf16.msra.mxu0 %v12552_v55 }
 0x37f   :  { %7792 = vmatpush1.bf16.msra.mxu1 %v12555_v45  ;;  %6200 = vmatprep.subr.bf16.mxu0 %v12560_v25  ;;  %v12617_v45 = vld [vmem:[%s16709_s3 + $0x1574] ss:$8 sps:$4 sm:$0xff]  }
 0x380   :  { %7793 = vmatprep.subr.bf16.mxu1 %v12563_v56  ;;  %v12972_v25 = vld [vmem:[#allocation2 + $0x1c] ss:$48 sps:$4 sm:$0xff]  }
 0x382   :  { %6201 = vmatpush1.bf16.msra.mxu0 %v12558_v0 }
 0x383   :  { %7794 = vmatpush1.bf16.msra.mxu1 %v12561_v27  ;;  %6202 = vmatprep.subr.bf16.mxu0 %v12566_v47 }
 0x384   :  { %7795 = vmatprep.subr.bf16.mxu1 %v12569_v49  ;;  %v12612_v49 = vld [vmem:[%s16709_s3 + $0xf70] ss:$8 sps:$4 sm:$0xff]  }
 0x386   :  { %6203 = vmatpush1.bf16.msra.mxu0 %v12564_v38 }
 0x387   :  { %7796 = vmatpush1.bf16.msra.mxu1 %v12567_v35  ;;  %6243 = vmatprep.subr.bf16.mxu0 %v12572_v51  ;;  %v12615_v35 = vld [vmem:[%s16709_s3 + $0x1570] ss:$8 sps:$4 sm:$0xff]  }
 0x388   :  { %7836 = vmatprep.subr.bf16.mxu1 %v12575_v26 }
 0x389   :  { %6205 = vmatmul.mubr.bf16.vlgmr.msra.gmra.mrb[68].mxu0 %v12967_v43 }
 0x38a   :  { %7798 = vmatmul.mubr.bf16.vlgmr.msra.gmra.mrb[76].mxu1 %v12967_v43  ;;  %6214 = vmatprep.mubr.bf16.mxu0 %v12968_v21  ;;  %v12623_v43 = vld [vmem:[%s16709_s3 + $0x1584] ss:$8 sps:$4 sm:$0xff]  }
 0x38b   :  { %6244 = vmatpush1.bf16.msra.mxu0 %v12570_v36  ;;  %7807 = vmatprep.mubr.bf16.mxu1 %v12968_v21  ;;  %v12620_v36 = vld [vmem:[%s16709_s3 + $0xf84] ss:$8 sps:$4 sm:$0xff]   ;;  %v12618_v21 = vld [vmem:[%s16709_s3 + $0xf80] ss:$8 sps:$4 sm:$0xff]  }
 0x38c   :  { %7837 = vmatpush1.bf16.msra.mxu1 %v12573_v39  ;;  %6245 = vmatprep.subr.bf16.mxu0 %v12578_v40 }
 0x38d   :  { %7838 = vmatprep.subr.bf16.mxu1 %v12581_v62 }
 0x38f   :  { %6246 = vmatpush1.bf16.msra.mxu0 %v12576_v14  ;;  %v12621_v14 = vld [vmem:[%s16709_s3 + $0x1580] ss:$8 sps:$4 sm:$0xff]  }
 0x390   :  { %7839 = vmatpush1.bf16.msra.mxu1 %v12579_v29  ;;  %6247 = vmatprep.subr.bf16.mxu0 %v12584_v46  ;;  %v12626_v29 = vld [vmem:[%s16709_s3 + $0xf94] ss:$8 sps:$4 sm:$0xff]  }
 0x391   :  { %6215 = vmatmul.mubr.bf16.gmra.mrb[72].mxu0 %v12969_v9  ;;  %7840 = vmatprep.subr.bf16.mxu1 %v12587_v37  ;;  %v12629_v37 = vld [vmem:[%s16709_s3 + $0x1594] ss:$8 sps:$4 sm:$0xff]  }
 0x392   :  { %7808 = vmatmul.mubr.bf16.gmra.mrb[80].mxu1 %v12969_v9  ;;  %6224 = vmatprep.mubr.bf16.mxu0 %v12970_v44 }
 0x393   :  { %6248 = vmatpush1.bf16.msra.mxu0 %v12582_v48  ;;  %7817 = vmatprep.mubr.bf16.mxu1 %v12970_v44 }
 0x394   :  { %7841 = vmatpush1.bf16.msra.mxu1 %v12585_v53  ;;  %6249 = vmatprep.subr.bf16.mxu0 %v12590_v5 }
 0x395   :  { %7842 = vmatprep.subr.bf16.mxu1 %v12593_v23  ;;  %v12624_v23 = vld [vmem:[%s16709_s3 + $0xf90] ss:$8 sps:$4 sm:$0xff]  }
 0x397   :  { %6250 = vmatpush1.bf16.msra.mxu0 %v12588_v11 }
 0x398   :  { %7843 = vmatpush1.bf16.msra.mxu1 %v12591_v7  ;;  %6251 = vmatprep.subr.bf16.mxu0 %v12596_v58  ;;  %v12627_v7 = vld [vmem:[%s16709_s3 + $0x1590] ss:$8 sps:$4 sm:$0xff]  }
 0x399   :  { %6225 = vmatmul.mubr.bf16.gmra.mrb[76].mxu0 %v12971_v60  ;;  %7844 = vmatprep.subr.bf16.mxu1 %v12599_v16  ;;  %v15602_v8 = vpop.f32.mrb[52].mxu0 }
 0x39a   :  { %7818 = vmatmul.mubr.bf16.gmra.mrb[84].mxu1 %v12971_v60  ;;  %6234 = vmatprep.mubr.bf16.mxu0 %v14409_v4  ;;  %v15608_v59 = vpop.f32.mrb[60].mxu1  ;;  %v15610_v33 = vpop.f32.mrb[53].mxu0  ;;  %v12635_v60 = vld [vmem:[%s16709_s3 + $0x15a4] ss:$8 sps:$4 sm:$0xff]  }
 0x39b   :  { %6252 = vmatpush1.bf16.msra.mxu0 %v12594_v24  ;;  %7827 = vmatprep.mubr.bf16.mxu1 %v14409_v4  ;;  %v4863_v18 = vmax.f32 %v15602_v8, %v15608_v59  ;;  %v15615_v61 = vpop.f32.mrb[61].mxu1  ;;  %v15620_v41 = vpop.f32.mrb[54].mxu0  ;;  %v12603_v4 = vld [vmem:[%s16709_s3 + $0x1550] ss:$8 sps:$4 sm:$0xff]   ;;  %v12632_v24 = vld [vmem:[%s16709_s3 + $0xfa4] ss:$8 sps:$4 sm:$0xff]  }
 0x39c   :  { %7845 = vmatpush1.bf16.msra.mxu1 %v12597_v17  ;;  %v4864_v30 = vmax.f32 %v15610_v33, %v15615_v61  ;;  %6253 = vmatprep.subr.bf16.mxu0 %v12602_v15  ;;  %v15627_v6 = vpop.f32.mrb[62].mxu1  ;;  %v15629_v3 = vpop.f32.mrb[55].mxu0 }
 0x39d   :  { %7846 = vmatprep.subr.bf16.mxu1 %v12605_v31  ;;  %v4865_v32 = vmax.f32 %v15620_v41, %v15627_v6  ;;  %v15636_v10 = vpop.f32.mrb[63].mxu1 }
 0x39e   :  { %v4866_v63 = vmax.f32 %v15629_v3, %v15636_v10 }
 0x39f   :  { %6254 = vmatpush1.bf16.msra.mxu0 %v12600_v13  ;;  %v12630_v13 = vld [vmem:[%s16709_s3 + $0xfa0] ss:$8 sps:$4 sm:$0xff]  }
 0x3a0   :  { %7847 = vmatpush1.bf16.msra.mxu1 %v12603_v4  ;;  %6255 = vmatprep.subr.bf16.mxu0 %v12608_v20  ;;  %v12633_v4 = vld [vmem:[%s16709_s3 + $0x15a0] ss:$8 sps:$4 sm:$0xff]   ;;  %v12638_v20 = vld [vmem:[%s16709_s3 + $0xfb4] ss:$8 sps:$4 sm:$0xff]  }
 0x3a1   :  { %6235 = vmatmul.mubr.bf16.gmra.mrb[80].mxu0 %v14434_v57  ;;  %7848 = vmatprep.subr.bf16.mxu1 %v12611_v22  ;;  %v15653_v55 = vpop.f32.mrb[56].mxu0 }
 0x3a2   :  { %7828 = vmatmul.mubr.bf16.gmra.mrb[88].mxu1 %v14434_v57  ;;  %6275 = vmatprep.mubr.bf16.mxu0 %v12972_v25  ;;  %v15659_v56 = vpop.f32.mrb[64].mxu1  ;;  %v15661_v0 = vpop.f32.mrb[57].mxu0 }
 0x3a3   :  { %6256 = vmatpush1.bf16.msra.mxu0 %v12606_v42  ;;  %7868 = vmatprep.mubr.bf16.mxu1 %v12972_v25  ;;  %v4867_v27 = vmax.f32 %v15653_v55, %v15659_v56  ;;  %v15665_v47 = vpop.f32.mrb[65].mxu1  ;;  %v15670_v38 = vpop.f32.mrb[58].mxu0  ;;  %v12641_v42 = vld [vmem:[%s16709_s3 + $0x15b4] ss:$8 sps:$4 sm:$0xff]  }
 0x3a4   :  { %7849 = vmatpush1.bf16.msra.mxu1 %v12609_v34  ;;  %v4868_v57 = vmax.f32 %v15661_v0, %v15665_v47  ;;  %6257 = vmatprep.subr.bf16.mxu0 %v12614_v54  ;;  %v15677_v51 = vpop.f32.mrb[66].mxu1  ;;  %v15679_v26 = vpop.f32.mrb[59].mxu0  ;;  %v12886_v0 = vld [vmem:[%s16711_s5 + $0x150] sm:$0xff]  }
 0x3a5   :  { %7850 = vmatprep.subr.bf16.mxu1 %v12617_v45  ;;  %v4869_v39 = vmax.f32 %v15670_v38, %v15677_v51  ;;  %v15686_v40 = vpop.f32.mrb[67].mxu1 }
 0x3a6   :  { %v4870_v62 = vmax.f32 %v15679_v26, %v15686_v40 }
 0x3a7   :  { %6258 = vmatpush1.bf16.msra.mxu0 %v12612_v49  ;;  %v12636_v49 = vld [vmem:[%s16709_s3 + $0xfb0] ss:$8 sps:$4 sm:$0xff]  }
 0x3a8   :  { %7851 = vmatpush1.bf16.msra.mxu1 %v12615_v35  ;;  %6259 = vmatprep.subr.bf16.mxu0 %v12620_v36 }
 0x3a9   :  { %7852 = vmatprep.subr.bf16.mxu1 %v12623_v43  ;;  %v15702_v46 = vpop.f32.mrb[60].mxu0  ;;  %v12639_v43 = vld [vmem:[%s16709_s3 + $0x15b0] ss:$8 sps:$4 sm:$0xff]  }
 0x3aa   :  { %v15707_v48 = vpop.f32.mrb[68].mxu1  ;;  %v15709_v53 = vpop.f32.mrb[61].mxu0 }
 0x3ab   :  { %6260 = vmatpush1.bf16.msra.mxu0 %v12618_v21  ;;  %v4871_v5 = vmax.f32 %v15702_v46, %v15707_v48  ;;  %v15713_v9 = vpop.f32.mrb[69].mxu1  ;;  %v15718_v44 = vpop.f32.mrb[62].mxu0 }
 0x3ac   :  { %7853 = vmatpush1.bf16.msra.mxu1 %v12621_v14  ;;  %v4872_v11 = vmax.f32 %v15709_v53, %v15713_v9  ;;  %6261 = vmatprep.subr.bf16.mxu0 %v12626_v29  ;;  %v15725_v58 = vpop.f32.mrb[70].mxu1  ;;  %v15727_v16 = vpop.f32.mrb[63].mxu0  ;;  %v12644_v29 = vld [vmem:[%s16709_s3 + $0xfc4] ss:$8 sps:$4 sm:$0xff]  }
 0x3ad   :  { %7854 = vmatprep.subr.bf16.mxu1 %v12629_v37  ;;  %v4873_v17 = vmax.f32 %v15718_v44, %v15725_v58  ;;  %v15734_v15 = vpop.f32.mrb[71].mxu1 }
 0x3ae   :  { %v4874_v31 = vmax.f32 %v15727_v16, %v15734_v15  ;;  %v12891_v16 = vld [vmem:[%s16711_s5 + $0xf0] sm:$0xff]  }
 0x3af   :  { %6262 = vmatpush1.bf16.msra.mxu0 %v12624_v23  ;;  %v12647_v23 = vld [vmem:[%s16709_s3 + $0x15c4] ss:$8 sps:$4 sm:$0xff]  }
 0x3b0   :  { %7855 = vmatpush1.bf16.msra.mxu1 %v12627_v7  ;;  %6263 = vmatprep.subr.bf16.mxu0 %v12632_v24  ;;  %v12642_v7 = vld [vmem:[%s16709_s3 + $0xfc0] ss:$8 sps:$4 sm:$0xff]  }
 0x3b1   :  { %7856 = vmatprep.subr.bf16.mxu1 %v12635_v60  ;;  %v15750_v22 = vpop.f32.mrb[64].mxu0  ;;  %v12645_v24 = vld [vmem:[%s16709_s3 + $0x15c0] ss:$8 sps:$4 sm:$0xff]   ;;  %v12650_v60 = vld [vmem:[%s16709_s3 + $0xfd4] ss:$8 sps:$4 sm:$0xff]  }
 0x3b2   :  { %v15755_v34 = vpop.f32.mrb[72].mxu1  ;;  %v15757_v54 = vpop.f32.mrb[65].mxu0 }
 0x3b3   :  { %6264 = vmatpush1.bf16.msra.mxu0 %v12630_v13  ;;  %v4875_v45 = vmax.f32 %v15750_v22, %v15755_v34  ;;  %v15761_v25 = vpop.f32.mrb[73].mxu1  ;;  %v3281_v35 = vpop.f32.mrb[66].mxu0  ;;  %v12653_v13 = vld [vmem:[%s16709_s3 + $0x15d4] ss:$8 sps:$4 sm:$0xff]  }
 0x3b4   :  { %7857 = vmatpush1.bf16.msra.mxu1 %v12633_v4  ;;  %v4876_v36 = vmax.f32 %v15757_v54, %v15761_v25  ;;  %6265 = vmatprep.subr.bf16.mxu0 %v12638_v20  ;;  %v4860_v21 = vpop.f32.mrb[74].mxu1  ;;  %v3282_v14 = vpop.f32.mrb[67].mxu0  ;;  %v12648_v4 = vld [vmem:[%s16709_s3 + $0xfd0] ss:$8 sps:$4 sm:$0xff]   ;;  %v12654_v35 = vld [vmem:[%s16709_s3 + $0xfe0] ss:$8 sps:$4 sm:$0xff]  }
 0x3b5   :  { %7858 = vmatprep.subr.bf16.mxu1 %v12641_v42  ;;  %v4861_v37 = vpop.f32.mrb[75].mxu1  ;;  %v12651_v20 = vld [vmem:[%s16709_s3 + $0x15d0] ss:$8 sps:$4 sm:$0xff]   ;;  %v12656_v42 = vld [vmem:[%s16709_s3 + $0xfe4] ss:$8 sps:$4 sm:$0xff]  }
 0x3b6   :  { %v12662_v21 = vld [vmem:[%s16709_s3 + $0xff4] ss:$8 sps:$4 sm:$0xff]   ;;  %v12663_v37 = vld [vmem:[%s16709_s3 + $0x15f0] ss:$8 sps:$4 sm:$0xff]  }
 0x3b7   :  { %6266 = vmatpush1.bf16.msra.mxu0 %v12636_v49  ;;  %v12659_v49 = vld [vmem:[%s16709_s3 + $0x15e4] ss:$8 sps:$4 sm:$0xff]   ;;  %v12665_v14 = vld [vmem:[%s16709_s3 + $0x15f4] ss:$8 sps:$4 sm:$0xff]  }
 0x3b8   :  { %7859 = vmatpush1.bf16.msra.mxu1 %v12639_v43  ;;  %6267 = vmatprep.subr.bf16.mxu0 %v12644_v29  ;;  %v12657_v43 = vld [vmem:[%s16709_s3 + $0x15e0] ss:$8 sps:$4 sm:$0xff]   ;;  %v12660_v29 = vld [vmem:[%s16709_s3 + $0xff0] ss:$8 sps:$4 sm:$0xff]  }
 0x3b9   :  { %7860 = vmatprep.subr.bf16.mxu1 %v12647_v23  ;;  %v12668_v23 = vld [vmem:[%s16709_s3 + $0x1004] ss:$8 sps:$4 sm:$0xff]   ;;  %v12894_v54 = vld [vmem:[%s16711_s5 + $0x170] sm:$0xff]  }
 0x3bb   :  { %6268 = vmatpush1.bf16.msra.mxu0 %v12642_v7  ;;  %v12671_v7 = vld [vmem:[%s16709_s3 + $0x1604] ss:$8 sps:$4 sm:$0xff]  }
 0x3bc   :  { %7861 = vmatpush1.bf16.msra.mxu1 %v12645_v24  ;;  %6269 = vmatprep.subr.bf16.mxu0 %v12650_v60  ;;  %v12666_v24 = vld [vmem:[%s16709_s3 + $0x1000] ss:$8 sps:$4 sm:$0xff]  }
 0x3bd   :  { %7862 = vmatprep.subr.bf16.mxu1 %v12653_v13  ;;  %v12669_v60 = vld [vmem:[%s16709_s3 + $0x1600] ss:$8 sps:$4 sm:$0xff]   ;;  %v12674_v13 = vld [vmem:[%s16709_s3 + $0x1014] ss:$8 sps:$4 sm:$0xff]  }
 0x3bf   :  { %6270 = vmatpush1.bf16.msra.mxu0 %v12648_v4  ;;  %v12973_v4 = vld [vmem:[#allocation2 + $0x18] ss:$48 sps:$4 sm:$0xff]  }
 0x3c0   :  { %7863 = vmatpush1.bf16.msra.mxu1 %v12651_v20  ;;  %6271 = vmatprep.subr.bf16.mxu0 %v12656_v42  ;;  %v12677_v20 = vld [vmem:[%s16709_s3 + $0x1614] ss:$8 sps:$4 sm:$0xff]  }
 0x3c1   :  { %7864 = vmatprep.subr.bf16.mxu1 %v12659_v49  ;;  %v12974_v42 = vld [vmem:[#allocation2 + $0x7c] ss:$48 sps:$4 sm:$0xff]   ;;  %v12672_v49 = vld [vmem:[%s16709_s3 + $0x1010] ss:$8 sps:$4 sm:$0xff]  }
 0x3c3   :  { %6272 = vmatpush1.bf16.msra.mxu0 %v12654_v35  ;;  %v12675_v35 = vld [vmem:[%s16709_s3 + $0x1610] ss:$8 sps:$4 sm:$0xff]  }
 0x3c4   :  { %7865 = vmatpush1.bf16.msra.mxu1 %v12657_v43  ;;  %6273 = vmatprep.subr.bf16.mxu0 %v12662_v21  ;;  %v12680_v43 = vld [vmem:[%s16709_s3 + $0x1024] ss:$8 sps:$4 sm:$0xff]  }
 0x3c5   :  { %7866 = vmatprep.subr.bf16.mxu1 %v12665_v14  ;;  %v12683_v21 = vld [vmem:[%s16709_s3 + $0x1624] ss:$8 sps:$4 sm:$0xff]   ;;  %v12678_v14 = vld [vmem:[%s16709_s3 + $0x1020] ss:$8 sps:$4 sm:$0xff]  }
 0x3c7   :  { %6274 = vmatpush1.bf16.msra.mxu0 %v12660_v29  ;;  %v12681_v29 = vld [vmem:[%s16709_s3 + $0x1620] ss:$8 sps:$4 sm:$0xff]  }
 0x3c8   :  { %7867 = vmatpush1.bf16.msra.mxu1 %v12663_v37  ;;  %6314 = vmatprep.subr.bf16.mxu0 %v12668_v23  ;;  %v12686_v37 = vld [vmem:[%s16709_s3 + $0x1034] ss:$8 sps:$4 sm:$0xff]   ;;  %v12975_v23 = vld [vmem:[#allocation2 + $0x78] ss:$48 sps:$4 sm:$0xff]  }
 0x3c9   :  { %7907 = vmatprep.subr.bf16.mxu1 %v12671_v7  ;;  %v12689_v7 = vld [vmem:[%s16709_s3 + $0x1634] ss:$8 sps:$4 sm:$0xff]  }
 0x3ca   :  { %6276 = vmatmul.mubr.bf16.vlgmr.msra.gmra.mrb[68].mxu0 %v12973_v4 }
 0x3cb   :  { %7869 = vmatmul.mubr.bf16.vlgmr.msra.gmra.mrb[76].mxu1 %v12973_v4  ;;  %6285 = vmatprep.mubr.bf16.mxu0 %v12974_v42  ;;  %v12692_v4 = vld [vmem:[%s16709_s3 + $0x1044] ss:$8 sps:$4 sm:$0xff]  }
 0x3cc   :  { %6315 = vmatpush1.bf16.msra.mxu0 %v12666_v24  ;;  %7878 = vmatprep.mubr.bf16.mxu1 %v12974_v42  ;;  %v12976_v24 = vld [vmem:[#allocation2 + $0xdc] ss:$48 sps:$4 sm:$0xff]   ;;  %v12690_v42 = vld [vmem:[%s16709_s3 + $0x1040] ss:$8 sps:$4 sm:$0xff]  }
 0x3cd   :  { %7908 = vmatpush1.bf16.msra.mxu1 %v12669_v60  ;;  %6316 = vmatprep.subr.bf16.mxu0 %v12674_v13  ;;  %v12684_v60 = vld [vmem:[%s16709_s3 + $0x1030] ss:$8 sps:$4 sm:$0xff]  }
 0x3ce   :  { %7909 = vmatprep.subr.bf16.mxu1 %v12677_v20  ;;  %v12687_v13 = vld [vmem:[%s16709_s3 + $0x1630] ss:$8 sps:$4 sm:$0xff]   ;;  %v12695_v20 = vld [vmem:[%s16709_s3 + $0x1644] ss:$8 sps:$4 sm:$0xff]  }
 0x3d0   :  { %6317 = vmatpush1.bf16.msra.mxu0 %v12672_v49  ;;  %v12693_v49 = vld [vmem:[%s16709_s3 + $0x1640] ss:$8 sps:$4 sm:$0xff]  }
 0x3d1   :  { %7910 = vmatpush1.bf16.msra.mxu1 %v12675_v35  ;;  %6318 = vmatprep.subr.bf16.mxu0 %v12680_v43  ;;  %v12698_v35 = vld [vmem:[%s16709_s3 + $0x1054] ss:$8 sps:$4 sm:$0xff]   ;;  %v12977_v43 = vld [vmem:[#allocation2 + $0xd8] ss:$48 sps:$4 sm:$0xff]  }
 0x3d2   :  { %6286 = vmatmul.mubr.bf16.gmra.mrb[72].mxu0 %v12975_v23  ;;  %7911 = vmatprep.subr.bf16.mxu1 %v12683_v21  ;;  %v12701_v21 = vld [vmem:[%s16709_s3 + $0x1654] ss:$8 sps:$4 sm:$0xff]  }
 0x3d3   :  { %7879 = vmatmul.mubr.bf16.gmra.mrb[80].mxu1 %v12975_v23  ;;  %6295 = vmatprep.mubr.bf16.mxu0 %v12976_v24  ;;  %v12707_v23 = vld [vmem:[%s16709_s3 + $0x1664] ss:$8 sps:$4 sm:$0xff]  }
 0x3d4   :  { %6319 = vmatpush1.bf16.msra.mxu0 %v12678_v14  ;;  %7888 = vmatprep.mubr.bf16.mxu1 %v12976_v24  ;;  %v12696_v14 = vld [vmem:[%s16709_s3 + $0x1050] ss:$8 sps:$4 sm:$0xff]   ;;  %v12710_v24 = vld [vmem:[%s16709_s3 + $0x1074] ss:$8 sps:$4 sm:$0xff]  }
 0x3d5   :  { %7912 = vmatpush1.bf16.msra.mxu1 %v12681_v29  ;;  %6320 = vmatprep.subr.bf16.mxu0 %v12686_v37  ;;  %v12699_v29 = vld [vmem:[%s16709_s3 + $0x1650] ss:$8 sps:$4 sm:$0xff]   ;;  %v12704_v37 = vld [vmem:[%s16709_s3 + $0x1064] ss:$8 sps:$4 sm:$0xff]  }
 0x3d6   :  { %7913 = vmatprep.subr.bf16.mxu1 %v12689_v7  ;;  %v12705_v7 = vld [vmem:[%s16709_s3 + $0x1660] ss:$8 sps:$4 sm:$0xff]  }
 0x3d8   :  { %6321 = vmatpush1.bf16.msra.mxu0 %v12684_v60  ;;  %v12713_v60 = vld [vmem:[%s16709_s3 + $0x1674] ss:$8 sps:$4 sm:$0xff]  }
 0x3d9   :  { %7914 = vmatpush1.bf16.msra.mxu1 %v12687_v13  ;;  %6322 = vmatprep.subr.bf16.mxu0 %v12692_v4  ;;  %v12978_v13 = vld [vmem:[#allocation2 + $0x24] ss:$48 sps:$4 sm:$0xff]   ;;  %v12708_v4 = vld [vmem:[%s16709_s3 + $0x1070] ss:$8 sps:$4 sm:$0xff]  }
 0x3da   :  { %6296 = vmatmul.mubr.bf16.gmra.mrb[76].mxu0 %v12977_v43  ;;  %7915 = vmatprep.subr.bf16.mxu1 %v12695_v20  ;;  %v12711_v20 = vld [vmem:[%s16709_s3 + $0x1670] ss:$8 sps:$4 sm:$0xff]  }
 0x3db   :  { %7889 = vmatmul.mubr.bf16.gmra.mrb[84].mxu1 %v12977_v43  ;;  %6305 = vmatprep.mubr.bf16.mxu0 %v14609_v19  ;;  %v12722_v43 = vld [vmem:[%s16709_s3 + $0x1094] ss:$8 sps:$4 sm:$0xff]  }
 0x3dc   :  { %6323 = vmatpush1.bf16.msra.mxu0 %v12690_v42  ;;  %7898 = vmatprep.mubr.bf16.mxu1 %v14609_v19  ;;  %v12702_v19 = vld [vmem:[%s16709_s3 + $0x1060] ss:$8 sps:$4 sm:$0xff]   ;;  %v12716_v42 = vld [vmem:[%s16709_s3 + $0x1084] ss:$8 sps:$4 sm:$0xff]  }
 0x3dd   :  { %7916 = vmatpush1.bf16.msra.mxu1 %v12693_v49  ;;  %6324 = vmatprep.subr.bf16.mxu0 %v12698_v35  ;;  %v12714_v49 = vld [vmem:[%s16709_s3 + $0x1080] ss:$8 sps:$4 sm:$0xff]  }
 0x3de   :  { %7917 = vmatprep.subr.bf16.mxu1 %v12701_v21  ;;  %v12717_v35 = vld [vmem:[%s16709_s3 + $0x1680] ss:$8 sps:$4 sm:$0xff]   ;;  %v12725_v21 = vld [vmem:[%s16709_s3 + $0x1694] ss:$8 sps:$4 sm:$0xff]  }
 0x3e0   :  { %6325 = vmatpush1.bf16.msra.mxu0 %v12696_v14  ;;  %v12720_v14 = vld [vmem:[%s16709_s3 + $0x1090] ss:$8 sps:$4 sm:$0xff]  }
 0x3e1   :  { %7918 = vmatpush1.bf16.msra.mxu1 %v12699_v29  ;;  %6326 = vmatprep.subr.bf16.mxu0 %v12704_v37  ;;  %v12723_v29 = vld [vmem:[%s16709_s3 + $0x1690] ss:$8 sps:$4 sm:$0xff]   ;;  %v12728_v37 = vld [vmem:[%s16709_s3 + $0x10a4] ss:$8 sps:$4 sm:$0xff]  }
 0x3e2   :  { %6306 = vmatmul.mubr.bf16.gmra.mrb[80].mxu0 %v14634_v12  ;;  %7919 = vmatprep.subr.bf16.mxu1 %v12707_v23  ;;  %v12731_v23 = vld [vmem:[%s16709_s3 + $0x16a4] ss:$8 sps:$4 sm:$0xff]  }
 0x3e3   :  { %7899 = vmatmul.mubr.bf16.gmra.mrb[88].mxu1 %v14634_v12  ;;  %6346 = vmatprep.mubr.bf16.mxu0 %v12978_v13  ;;  %v12719_v12 = vld [vmem:[%s16709_s3 + $0x1684] ss:$8 sps:$4 sm:$0xff]  }
 0x3e4   :  { %6327 = vmatpush1.bf16.msra.mxu0 %v12702_v19  ;;  %7939 = vmatprep.mubr.bf16.mxu1 %v12978_v13  ;;  %v12726_v19 = vld [vmem:[%s16709_s3 + $0x10a0] ss:$8 sps:$4 sm:$0xff]   ;;  %v12732_v13 = vld [vmem:[%s16709_s3 + $0x10b0] ss:$8 sps:$4 sm:$0xff]  }
 0x3e5   :  { %7920 = vmatpush1.bf16.msra.mxu1 %v12705_v7  ;;  %6328 = vmatprep.subr.bf16.mxu0 %v12710_v24  ;;  %v12729_v7 = vld [vmem:[%s16709_s3 + $0x16a0] ss:$8 sps:$4 sm:$0xff]   ;;  %v12734_v24 = vld [vmem:[%s16709_s3 + $0x10b4] ss:$8 sps:$4 sm:$0xff]  }
 0x3e6   :  { %7921 = vmatprep.subr.bf16.mxu1 %v12713_v60  ;;  %v12737_v60 = vld [vmem:[%s16709_s3 + $0x16b4] ss:$8 sps:$4 sm:$0xff]  }
 0x3e8   :  { %6329 = vmatpush1.bf16.msra.mxu0 %v12708_v4  ;;  %v12735_v4 = vld [vmem:[%s16709_s3 + $0x16b0] ss:$8 sps:$4 sm:$0xff]  }
 0x3e9   :  { %7922 = vmatpush1.bf16.msra.mxu1 %v12711_v20  ;;  %6330 = vmatprep.subr.bf16.mxu0 %v12716_v42  ;;  %v12740_v20 = vld [vmem:[%s16709_s3 + $0x10c4] ss:$8 sps:$4 sm:$0xff]  }
 0x3ea   :  { %7923 = vmatprep.subr.bf16.mxu1 %v12719_v12  ;;  %v12743_v42 = vld [vmem:[%s16709_s3 + $0x16c4] ss:$8 sps:$4 sm:$0xff]   ;;  %v12738_v12 = vld [vmem:[%s16709_s3 + $0x10c0] ss:$8 sps:$4 sm:$0xff]  }
 0x3ec   :  { %6331 = vmatpush1.bf16.msra.mxu0 %v12714_v49  ;;  %v12741_v49 = vld [vmem:[%s16709_s3 + $0x16c0] ss:$8 sps:$4 sm:$0xff]  }
 0x3ed   :  { %7924 = vmatpush1.bf16.msra.mxu1 %v12717_v35  ;;  %6332 = vmatprep.subr.bf16.mxu0 %v12722_v43  ;;  %v12746_v35 = vld [vmem:[%s16709_s3 + $0x10d4] ss:$8 sps:$4 sm:$0xff]   ;;  %v12744_v43 = vld [vmem:[%s16709_s3 + $0x10d0] ss:$8 sps:$4 sm:$0xff]  }
 0x3ee   :  { %7925 = vmatprep.subr.bf16.mxu1 %v12725_v21  ;;  %v12749_v21 = vld [vmem:[%s16709_s3 + $0x16d4] ss:$8 sps:$4 sm:$0xff]  }
 0x3f0   :  { %6333 = vmatpush1.bf16.msra.mxu0 %v12720_v14  ;;  %v12747_v14 = vld [vmem:[%s16709_s3 + $0x16d0] ss:$8 sps:$4 sm:$0xff]  }
 0x3f1   :  { %7926 = vmatpush1.bf16.msra.mxu1 %v12723_v29  ;;  %6334 = vmatprep.subr.bf16.mxu0 %v12728_v37  ;;  %v12752_v29 = vld [vmem:[%s16709_s3 + $0x10e4] ss:$8 sps:$4 sm:$0xff]  }
 0x3f2   :  { %7927 = vmatprep.subr.bf16.mxu1 %v12731_v23  ;;  %v12755_v37 = vld [vmem:[%s16709_s3 + $0x16e4] ss:$8 sps:$4 sm:$0xff]   ;;  %v12750_v23 = vld [vmem:[%s16709_s3 + $0x10e0] ss:$8 sps:$4 sm:$0xff]  }
 0x3f4   :  { %6335 = vmatpush1.bf16.msra.mxu0 %v12726_v19  ;;  %v12753_v19 = vld [vmem:[%s16709_s3 + $0x16e0] ss:$8 sps:$4 sm:$0xff]  }
 0x3f5   :  { %7928 = vmatpush1.bf16.msra.mxu1 %v12729_v7  ;;  %6336 = vmatprep.subr.bf16.mxu0 %v12734_v24  ;;  %v12758_v7 = vld [vmem:[%s16709_s3 + $0x10f4] ss:$8 sps:$4 sm:$0xff]  }
 0x3f6   :  { %7929 = vmatprep.subr.bf16.mxu1 %v12737_v60  ;;  %v12761_v24 = vld [vmem:[%s16709_s3 + $0x16f4] ss:$8 sps:$4 sm:$0xff]   ;;  %v12756_v60 = vld [vmem:[%s16709_s3 + $0x10f0] ss:$8 sps:$4 sm:$0xff]  }
 0x3f8   :  { %6337 = vmatpush1.bf16.msra.mxu0 %v12732_v13  ;;  %v12759_v13 = vld [vmem:[%s16709_s3 + $0x16f0] ss:$8 sps:$4 sm:$0xff]  }
 0x3f9   :  { %7930 = vmatpush1.bf16.msra.mxu1 %v12735_v4  ;;  %6338 = vmatprep.subr.bf16.mxu0 %v12740_v20  ;;  %v12764_v4 = vld [vmem:[%s16709_s3 + $0x1104] ss:$8 sps:$4 sm:$0xff]  }
 0x3fa   :  { %7931 = vmatprep.subr.bf16.mxu1 %v12743_v42  ;;  %v12767_v20 = vld [vmem:[%s16709_s3 + $0x1704] ss:$8 sps:$4 sm:$0xff]   ;;  %v12762_v42 = vld [vmem:[%s16709_s3 + $0x1100] ss:$8 sps:$4 sm:$0xff]  }
 0x3fc   :  { %6339 = vmatpush1.bf16.msra.mxu0 %v12738_v12  ;;  %v12765_v12 = vld [vmem:[%s16709_s3 + $0x1700] ss:$8 sps:$4 sm:$0xff]  }
 0x3fd   :  { %7932 = vmatpush1.bf16.msra.mxu1 %v12741_v49  ;;  %6340 = vmatprep.subr.bf16.mxu0 %v12746_v35  ;;  %v12770_v49 = vld [vmem:[%s16709_s3 + $0x1114] ss:$8 sps:$4 sm:$0xff]  }
 0x3fe   :  { %7933 = vmatprep.subr.bf16.mxu1 %v12749_v21  ;;  %v12773_v35 = vld [vmem:[%s16709_s3 + $0x1714] ss:$8 sps:$4 sm:$0xff]   ;;  %v12768_v21 = vld [vmem:[%s16709_s3 + $0x1110] ss:$8 sps:$4 sm:$0xff]  }
 0x400   :  { %6341 = vmatpush1.bf16.msra.mxu0 %v12744_v43  ;;  %v12979_v43 = vld [vmem:[#allocation2 + $0x20] ss:$48 sps:$4 sm:$0xff]  }
 0x401   :  { %7934 = vmatpush1.bf16.msra.mxu1 %v12747_v14  ;;  %6342 = vmatprep.subr.bf16.mxu0 %v12752_v29  ;;  %v12980_v14 = vld [vmem:[#allocation2 + $0x84] ss:$48 sps:$4 sm:$0xff]   ;;  %v12771_v29 = vld [vmem:[%s16709_s3 + $0x1710] ss:$8 sps:$4 sm:$0xff]  }
 0x402   :  { %7935 = vmatprep.subr.bf16.mxu1 %v12755_v37  ;;  %v12776_v37 = vld [vmem:[%s16709_s3 + $0x1124] ss:$8 sps:$4 sm:$0xff]  }
 0x404   :  { %6343 = vmatpush1.bf16.msra.mxu0 %v12750_v23  ;;  %v12779_v23 = vld [vmem:[%s16709_s3 + $0x1724] ss:$8 sps:$4 sm:$0xff]  }
 0x405   :  { %7936 = vmatpush1.bf16.msra.mxu1 %v12753_v19  ;;  %6344 = vmatprep.subr.bf16.mxu0 %v12758_v7  ;;  %v12774_v19 = vld [vmem:[%s16709_s3 + $0x1120] ss:$8 sps:$4 sm:$0xff]  }
 0x406   :  { %7937 = vmatprep.subr.bf16.mxu1 %v12761_v24  ;;  %v12777_v7 = vld [vmem:[%s16709_s3 + $0x1720] ss:$8 sps:$4 sm:$0xff]   ;;  %v12782_v24 = vld [vmem:[%s16709_s3 + $0x1134] ss:$8 sps:$4 sm:$0xff]  }
 0x408   :  { %6345 = vmatpush1.bf16.msra.mxu0 %v12756_v60  ;;  %v12785_v60 = vld [vmem:[%s16709_s3 + $0x1734] ss:$8 sps:$4 sm:$0xff]  }
 0x409   :  { %7938 = vmatpush1.bf16.msra.mxu1 %v12759_v13  ;;  %6385 = vmatprep.subr.bf16.mxu0 %v12764_v4  ;;  %v12981_v13 = vld [vmem:[#allocation2 + $0x80] ss:$48 sps:$4 sm:$0xff]  }
 0x40a   :  { %7978 = vmatprep.subr.bf16.mxu1 %v12767_v20  ;;  %v12780_v4 = vld [vmem:[%s16709_s3 + $0x1130] ss:$8 sps:$4 sm:$0xff]   ;;  %v12982_v20 = vld [vmem:[#allocation2 + $0xe4] ss:$48 sps:$4 sm:$0xff]  }
 0x40b   :  { %6347 = vmatmul.mubr.bf16.vlgmr.msra.gmra.mrb[68].mxu0 %v12979_v43 }
 0x40c   :  { %7940 = vmatmul.mubr.bf16.vlgmr.msra.gmra.mrb[76].mxu1 %v12979_v43  ;;  %6356 = vmatprep.mubr.bf16.mxu0 %v12980_v14  ;;  %v12789_v43 = vld [vmem:[%s16709_s3 + $0x1740] ss:$8 sps:$4 sm:$0xff]  }
 0x40d   :  { %6386 = vmatpush1.bf16.msra.mxu0 %v12762_v42  ;;  %7949 = vmatprep.mubr.bf16.mxu1 %v12980_v14  ;;  %v12783_v42 = vld [vmem:[%s16709_s3 + $0x1730] ss:$8 sps:$4 sm:$0xff]   ;;  %v12797_v14 = vld [vmem:[%s16709_s3 + $0x1754] ss:$8 sps:$4 sm:$0xff]  }
 0x40e   :  { %7979 = vmatpush1.bf16.msra.mxu1 %v12765_v12  ;;  %6387 = vmatprep.subr.bf16.mxu0 %v12770_v49  ;;  %v12788_v12 = vld [vmem:[%s16709_s3 + $0x1144] ss:$8 sps:$4 sm:$0xff]  }
 0x40f   :  { %7980 = vmatprep.subr.bf16.mxu1 %v12773_v35  ;;  %v12791_v49 = vld [vmem:[%s16709_s3 + $0x1744] ss:$8 sps:$4 sm:$0xff]   ;;  %v12786_v35 = vld [vmem:[%s16709_s3 + $0x1140] ss:$8 sps:$4 sm:$0xff]  }
 0x411   :  { %6388 = vmatpush1.bf16.msra.mxu0 %v12768_v21  ;;  %v12794_v21 = vld [vmem:[%s16709_s3 + $0x1154] ss:$8 sps:$4 sm:$0xff]  }
 0x412   :  { %7981 = vmatpush1.bf16.msra.mxu1 %v12771_v29  ;;  %6389 = vmatprep.subr.bf16.mxu0 %v12776_v37  ;;  %v12983_v29 = vld [vmem:[#allocation2 + $0xe0] ss:$48 sps:$4 sm:$0xff]  }
 0x413   :  { %6357 = vmatmul.mubr.bf16.gmra.mrb[72].mxu0 %v12981_v13  ;;  %7982 = vmatprep.subr.bf16.mxu1 %v12779_v23  ;;  %v12792_v37 = vld [vmem:[%s16709_s3 + $0x1150] ss:$8 sps:$4 sm:$0xff]  }
 0x414   :  { %7950 = vmatmul.mubr.bf16.gmra.mrb[80].mxu1 %v12981_v13  ;;  %6366 = vmatprep.mubr.bf16.mxu0 %v12982_v20  ;;  %v12795_v23 = vld [vmem:[%s16709_s3 + $0x1750] ss:$8 sps:$4 sm:$0xff]   ;;  %v12806_v13 = vld [vmem:[%s16709_s3 + $0x1174] ss:$8 sps:$4 sm:$0xff]  }
 0x415   :  { %6390 = vmatpush1.bf16.msra.mxu0 %v12774_v19  ;;  %7959 = vmatprep.mubr.bf16.mxu1 %v12982_v20  ;;  %v12800_v19 = vld [vmem:[%s16709_s3 + $0x1164] ss:$8 sps:$4 sm:$0xff]   ;;  %v12804_v20 = vld [vmem:[%s16709_s3 + $0x1170] ss:$8 sps:$4 sm:$0xff]  }
 0x416   :  { %7983 = vmatpush1.bf16.msra.mxu1 %v12777_v7  ;;  %6391 = vmatprep.subr.bf16.mxu0 %v12782_v24  ;;  %v12803_v7 = vld [vmem:[%s16709_s3 + $0x1764] ss:$8 sps:$4 sm:$0xff]   ;;  %v12798_v24 = vld [vmem:[%s16709_s3 + $0x1160] ss:$8 sps:$4 sm:$0xff]  }
 0x417   :  { %7984 = vmatprep.subr.bf16.mxu1 %v12785_v60  ;;  %v12801_v60 = vld [vmem:[%s16709_s3 + $0x1760] ss:$8 sps:$4 sm:$0xff]  }
 0x419   :  { %6392 = vmatpush1.bf16.msra.mxu0 %v12780_v4  ;;  %v12809_v4 = vld [vmem:[%s16709_s3 + $0x1774] ss:$8 sps:$4 sm:$0xff]  }
 0x41a   :  { %7985 = vmatpush1.bf16.msra.mxu1 %v12783_v42  ;;  %6393 = vmatprep.subr.bf16.mxu0 %v12788_v12  ;;  %v12984_v42 = vld [vmem:[#allocation2 + $0x2c] ss:$48 sps:$4 sm:$0xff]   ;;  %v12807_v12 = vld [vmem:[%s16709_s3 + $0x1770] ss:$8 sps:$4 sm:$0xff]  }
 0x41b   :  { %6367 = vmatmul.mubr.bf16.gmra.mrb[76].mxu0 %v12983_v29  ;;  %7986 = vmatprep.subr.bf16.mxu1 %v12791_v49  ;;  %v12812_v49 = vld [vmem:[%s16709_s3 + $0x1184] ss:$8 sps:$4 sm:$0xff]  }
 0x41c   :  { %7960 = vmatmul.mubr.bf16.gmra.mrb[84].mxu1 %v12983_v29  ;;  %6376 = vmatprep.mubr.bf16.mxu0 %v14797_v1  ;;  %v12821_v29 = vld [vmem:[%s16709_s3 + $0x1794] ss:$8 sps:$4 sm:$0xff]  }
 0x41d   :  { %6394 = vmatpush1.bf16.msra.mxu0 %v12786_v35  ;;  %7969 = vmatprep.mubr.bf16.mxu1 %v14797_v1  ;;  %v12815_v35 = vld [vmem:[%s16709_s3 + $0x1784] ss:$8 sps:$4 sm:$0xff]  }
 0x41e   :  { %7987 = vmatpush1.bf16.msra.mxu1 %v12789_v43  ;;  %6395 = vmatprep.subr.bf16.mxu0 %v12794_v21  ;;  %v12810_v43 = vld [vmem:[%s16709_s3 + $0x1180] ss:$8 sps:$4 sm:$0xff]  }
 0x41f   :  { %7988 = vmatprep.subr.bf16.mxu1 %v12797_v14  ;;  %v12813_v21 = vld [vmem:[%s16709_s3 + $0x1780] ss:$8 sps:$4 sm:$0xff]   ;;  %v12818_v14 = vld [vmem:[%s16709_s3 + $0x1194] ss:$8 sps:$4 sm:$0xff]  }
 0x421   :  { %6396 = vmatpush1.bf16.msra.mxu0 %v12792_v37  ;;  %v12816_v37 = vld [vmem:[%s16709_s3 + $0x1190] ss:$8 sps:$4 sm:$0xff]  }
 0x422   :  { %7989 = vmatpush1.bf16.msra.mxu1 %v12795_v23  ;;  %6397 = vmatprep.subr.bf16.mxu0 %v12800_v19  ;;  %v12819_v23 = vld [vmem:[%s16709_s3 + $0x1790] ss:$8 sps:$4 sm:$0xff]   ;;  %v12824_v19 = vld [vmem:[%s16709_s3 + $0x11a4] ss:$8 sps:$4 sm:$0xff]  }
 0x423   :  { %6377 = vmatmul.mubr.bf16.gmra.mrb[80].mxu0 %v14822_v52  ;;  %7990 = vmatprep.subr.bf16.mxu1 %v12803_v7  ;;  %v12827_v7 = vld [vmem:[%s16709_s3 + $0x17a4] ss:$8 sps:$4 sm:$0xff]  }
 0x424   :  { %7970 = vmatmul.mubr.bf16.gmra.mrb[88].mxu1 %v14822_v52  ;;  %6417 = vmatprep.mubr.bf16.mxu0 %v12984_v42 }
 0x425   :  { %6398 = vmatpush1.bf16.msra.mxu0 %v12798_v24  ;;  %8010 = vmatprep.mubr.bf16.mxu1 %v12984_v42  ;;  %v12822_v24 = vld [vmem:[%s16709_s3 + $0x11a0] ss:$8 sps:$4 sm:$0xff]   ;;  %v12831_v42 = vld [vmem:[%s16709_s3 + $0x17b0] ss:$8 sps:$4 sm:$0xff]  }
 0x426   :  { %7991 = vmatpush1.bf16.msra.mxu1 %v12801_v60  ;;  %6399 = vmatprep.subr.bf16.mxu0 %v12806_v13  ;;  %v12825_v60 = vld [vmem:[%s16709_s3 + $0x17a0] ss:$8 sps:$4 sm:$0xff]   ;;  %v12830_v13 = vld [vmem:[%s16709_s3 + $0x11b4] ss:$8 sps:$4 sm:$0xff]  }
 0x427   :  { %7992 = vmatprep.subr.bf16.mxu1 %v12809_v4  ;;  %v12833_v4 = vld [vmem:[%s16709_s3 + $0x17b4] ss:$8 sps:$4 sm:$0xff]  }
 0x429   :  { %6400 = vmatpush1.bf16.msra.mxu0 %v12804_v20  ;;  %v12828_v20 = vld [vmem:[%s16709_s3 + $0x11b0] ss:$8 sps:$4 sm:$0xff]  }
 0x42a   :  { %7993 = vmatpush1.bf16.msra.mxu1 %v12807_v12  ;;  %6401 = vmatprep.subr.bf16.mxu0 %v12812_v49  ;;  %v12836_v12 = vld [vmem:[%s16709_s3 + $0x11c4] ss:$8 sps:$4 sm:$0xff]  }
 0x42b   :  { %7994 = vmatprep.subr.bf16.mxu1 %v12815_v35  ;;  %v12839_v49 = vld [vmem:[%s16709_s3 + $0x17c4] ss:$8 sps:$4 sm:$0xff]   ;;  %v12834_v35 = vld [vmem:[%s16709_s3 + $0x11c0] ss:$8 sps:$4 sm:$0xff]  }
 0x42d   :  { %6402 = vmatpush1.bf16.msra.mxu0 %v12810_v43  ;;  %v12837_v43 = vld [vmem:[%s16709_s3 + $0x17c0] ss:$8 sps:$4 sm:$0xff]  }
 0x42e   :  { %7995 = vmatpush1.bf16.msra.mxu1 %v12813_v21  ;;  %6403 = vmatprep.subr.bf16.mxu0 %v12818_v14  ;;  %v12842_v21 = vld [vmem:[%s16709_s3 + $0x11d4] ss:$8 sps:$4 sm:$0xff]  }
 0x42f   :  { %7996 = vmatprep.subr.bf16.mxu1 %v12821_v29  ;;  %v12845_v14 = vld [vmem:[%s16709_s3 + $0x17d4] ss:$8 sps:$4 sm:$0xff]   ;;  %v12840_v29 = vld [vmem:[%s16709_s3 + $0x11d0] ss:$8 sps:$4 sm:$0xff]  }
 0x431   :  { %6404 = vmatpush1.bf16.msra.mxu0 %v12816_v37  ;;  %v12843_v37 = vld [vmem:[%s16709_s3 + $0x17d0] ss:$8 sps:$4 sm:$0xff]  }
 0x432   :  { %7997 = vmatpush1.bf16.msra.mxu1 %v12819_v23  ;;  %6405 = vmatprep.subr.bf16.mxu0 %v12824_v19  ;;  %v12848_v23 = vld [vmem:[%s16709_s3 + $0x11e4] ss:$8 sps:$4 sm:$0xff]  }
 0x433   :  { %7998 = vmatprep.subr.bf16.mxu1 %v12827_v7  ;;  %v12851_v19 = vld [vmem:[%s16709_s3 + $0x17e4] ss:$8 sps:$4 sm:$0xff]   ;;  %v12846_v7 = vld [vmem:[%s16709_s3 + $0x11e0] ss:$8 sps:$4 sm:$0xff]  }
 0x435   :  { %6406 = vmatpush1.bf16.msra.mxu0 %v12822_v24  ;;  %v12849_v24 = vld [vmem:[%s16709_s3 + $0x17e0] ss:$8 sps:$4 sm:$0xff]  }
 0x436   :  { %7999 = vmatpush1.bf16.msra.mxu1 %v12825_v60  ;;  %6407 = vmatprep.subr.bf16.mxu0 %v12830_v13  ;;  %v12854_v60 = vld [vmem:[%s16709_s3 + $0x11f4] ss:$8 sps:$4 sm:$0xff]  }
 0x437   :  { %8000 = vmatprep.subr.bf16.mxu1 %v12833_v4  ;;  %v12857_v13 = vld [vmem:[%s16709_s3 + $0x17f4] ss:$8 sps:$4 sm:$0xff]   ;;  %v12852_v4 = vld [vmem:[%s16709_s3 + $0x11f0] ss:$8 sps:$4 sm:$0xff]  }
 0x439   :  { %6408 = vmatpush1.bf16.msra.mxu0 %v12828_v20  ;;  %v12855_v20 = vld [vmem:[%s16709_s3 + $0x17f0] ss:$8 sps:$4 sm:$0xff]  }
 0x43a   :  { %8001 = vmatpush1.bf16.msra.mxu1 %v12831_v42  ;;  %6409 = vmatprep.subr.bf16.mxu0 %v12836_v12  ;;  %v12858_v42 = vld [vmem:[%s16711_s5] sm:$0xff]  }
 0x43b   :  { %8002 = vmatprep.subr.bf16.mxu1 %v12839_v49  ;;  %v16214_v12 = vld [vmem:[#allocation2] sm:$0xff]  ;;  %v12859_v49 = vld [vmem:[%s16711_s5 + $0x70] sm:$0xff]  }
 0x43d   :  { %6410 = vmatpush1.bf16.msra.mxu0 %v12834_v35  ;;  %v12986_v35 = vld [vmem:[#allocation2 + $0x28] ss:$48 sps:$4 sm:$0xff]  }
 0x43e   :  { %8003 = vmatpush1.bf16.msra.mxu1 %v12837_v43  ;;  %6411 = vmatprep.subr.bf16.mxu0 %v12842_v21  ;;  %v12987_v43 = vld [vmem:[#allocation2 + $0x8c] ss:$48 sps:$4 sm:$0xff]  }
 0x43f   :  { %8004 = vmatprep.subr.bf16.mxu1 %v12845_v14  ;;  %v12860_v21 = vld [vmem:[%s16711_s5 + $0x8] sm:$0xff]   ;;  %v12861_v14 = vld [vmem:[%s16711_s5 + $0x78] sm:$0xff]  }
 0x441   :  { %6412 = vmatpush1.bf16.msra.mxu0 %v12840_v29  ;;  %v12862_v29 = vld [vmem:[%s16711_s5 + $0x10] sm:$0xff]  }
 0x442   :  { %8005 = vmatpush1.bf16.msra.mxu1 %v12843_v37  ;;  %6413 = vmatprep.subr.bf16.mxu0 %v12848_v23  ;;  %v12863_v37 = vld [vmem:[%s16711_s5 + $0x80] sm:$0xff]   ;;  %v12988_v23 = vld [vmem:[#allocation2 + $0x88] ss:$48 sps:$4 sm:$0xff]  }
 0x443   :  { %8006 = vmatprep.subr.bf16.mxu1 %v12851_v19  ;;  %v12989_v19 = vld [vmem:[#allocation2 + $0xec] ss:$48 sps:$4 sm:$0xff]  }
 0x445   :  { %6414 = vmatpush1.bf16.msra.mxu0 %v12846_v7  ;;  %v12864_v7 = vld [vmem:[%s16711_s5 + $0x18] sm:$0xff]  }
 0x446   :  { %8007 = vmatpush1.bf16.msra.mxu1 %v12849_v24  ;;  %6415 = vmatprep.subr.bf16.mxu0 %v12854_v60  ;;  %v12865_v24 = vld [vmem:[%s16711_s5 + $0x88] sm:$0xff]   ;;  %v12866_v60 = vld [vmem:[%s16711_s5 + $0x20] sm:$0xff]  }
 0x447   :  { %8008 = vmatprep.subr.bf16.mxu1 %v12857_v13  ;;  %v12867_v13 = vld [vmem:[%s16711_s5 + $0x90] sm:$0xff]  }
 0x449   :  { %6416 = vmatpush1.bf16.msra.mxu0 %v12852_v4  ;;  %v12990_v4 = vld [vmem:[#allocation2 + $0xe8] ss:$48 sps:$4 sm:$0xff]  }
 0x44a   :  { %8009 = vmatpush1.bf16.msra.mxu1 %v12855_v20  ;;  %8261 = vmatprep.subr.bf16.mxu0 %v16214_v12  ;;  %v12868_v20 = vld [vmem:[%s16711_s5 + $0x28] sm:$0xff]  }
 0x44b   :  { %8388 = vmatprep.subr.bf16.mxu1 %v16214_v12 }
 0x44c   :  { %6418 = vmatmul.mubr.bf16.vlgmr.msra.gmra.mrb[68].mxu0 %v12986_v35 }
 0x44d   :  { %8011 = vmatmul.mubr.bf16.vlgmr.msra.gmra.mrb[76].mxu1 %v12986_v35  ;;  %6427 = vmatprep.mubr.bf16.mxu0 %v12987_v43  ;;  %v12872_v35 = vld [vmem:[%s16711_s5 + $0x38] sm:$0xff]  }
 0x44e   :  { %8020 = vmatprep.mubr.bf16.mxu1 %v12987_v43  ;;  %8389 = vmatpush1.bf16.msra.mxu1 %v12858_v42  ;;  %v12869_v42 = vld [vmem:[%s16711_s5 + $0x98] sm:$0xff]   ;;  %v12873_v43 = vld [vmem:[%s16711_s5 + $0xa8] sm:$0xff]  }
 0x44f   :  { %8262 = vmatpush1.bf16.msra.mxu0 %v12859_v49  ;;  %8390 = vmatprep.subr.bf16.mxu1 %v16214_v12  ;;  %v12870_v49 = vld [vmem:[%s16711_s5 + $0x30] sm:$0xff]  }
 0x450   :  { %8263 = vmatprep.subr.bf16.mxu0 %v16214_v12 }
 0x452   :  { %8391 = vmatpush1.bf16.msra.mxu1 %v12860_v21  ;;  %v12874_v21 = vld [vmem:[%s16711_s5 + $0x40] sm:$0xff]  }
 0x453   :  { %8264 = vmatpush1.bf16.msra.mxu0 %v12861_v14  ;;  %8392 = vmatprep.subr.bf16.mxu1 %v16214_v12  ;;  %v12876_v14 = vld [vmem:[%s16711_s5 + $0x48] sm:$0xff]  }
 0x454   :  { %6428 = vmatmul.mubr.bf16.gmra.mrb[72].mxu0 %v12988_v23  ;;  %8265 = vmatprep.subr.bf16.mxu0 %v16214_v12 }
 0x455   :  { %8021 = vmatmul.mubr.bf16.gmra.mrb[80].mxu1 %v12988_v23  ;;  %6437 = vmatprep.mubr.bf16.mxu0 %v12989_v19  ;;  %v12879_v23 = vld [vmem:[%s16711_s5 + $0xc0] sm:$0xff]  }
 0x456   :  { %8030 = vmatprep.mubr.bf16.mxu1 %v12989_v19  ;;  %8393 = vmatpush1.bf16.msra.mxu1 %v12862_v29  ;;  %v12877_v29 = vld [vmem:[%s16711_s5 + $0xb8] sm:$0xff]  }
 0x457   :  { %8266 = vmatpush1.bf16.msra.mxu0 %v12863_v37  ;;  %8394 = vmatprep.subr.bf16.mxu1 %v16214_v12  ;;  %v12878_v37 = vld [vmem:[%s16711_s5 + $0x50] sm:$0xff]   ;;  %v12880_v19 = vld [vmem:[%s16711_s5 + $0x58] sm:$0xff]  }
 0x458   :  { %8267 = vmatprep.subr.bf16.mxu0 %v16214_v12 }
 0x45a   :  { %8395 = vmatpush1.bf16.msra.mxu1 %v12864_v7  ;;  %v12881_v7 = vld [vmem:[%s16711_s5 + $0xc8] sm:$0xff]  }
 0x45b   :  { %8268 = vmatpush1.bf16.msra.mxu0 %v12865_v24  ;;  %8396 = vmatprep.subr.bf16.mxu1 %v16214_v12  ;;  %v12882_v24 = vld [vmem:[%s16711_s5 + $0x60] sm:$0xff]  }
 0x45c   :  { %6438 = vmatmul.mubr.bf16.gmra.mrb[76].mxu0 %v12990_v4  ;;  %8269 = vmatprep.subr.bf16.mxu0 %v16214_v12 }
 0x45d   :  { %8031 = vmatmul.mubr.bf16.gmra.mrb[84].mxu1 %v12990_v4  ;;  %6447 = vmatprep.mubr.bf16.mxu0 %v14797_v1  ;;  %v12885_v4 = vld [vmem:[%s16711_s5 + $0xd8] sm:$0xff]  }
 0x45e   :  { %8040 = vmatprep.mubr.bf16.mxu1 %v14797_v1  ;;  %8397 = vmatpush1.bf16.msra.mxu1 %v12866_v60  ;;  %v12871_v1 = vld [vmem:[%s16711_s5 + $0xa0] sm:$0xff]   ;;  %v12883_v60 = vld [vmem:[%s16711_s5 + $0xd0] sm:$0xff]  }
 0x45f   :  { %8270 = vmatpush1.bf16.msra.mxu0 %v12867_v13  ;;  %8398 = vmatprep.subr.bf16.mxu1 %v16214_v12  ;;  %v12884_v13 = vld [vmem:[%s16711_s5 + $0x68] sm:$0xff]  }
 0x460   :  { %8271 = vmatprep.subr.bf16.mxu0 %v16214_v12 }
 0x462   :  { %8399 = vmatpush1.bf16.msra.mxu1 %v12868_v20  ;;  %v8063_v20 = vld [vmem:[%s16712_s4] sm:$0x3] }
 0x463   :  { %8272 = vmatpush1.bf16.msra.mxu0 %v12869_v42  ;;  %8400 = vmatprep.subr.bf16.mxu1 %v16214_v12 }
 0x464   :  { %6448 = vmatmul.mubr.bf16.gmra.mrb[80].mxu0 %v14822_v52  ;;  %8273 = vmatprep.subr.bf16.mxu0 %v16214_v12 }
 0x465   :  { %8041 = vmatmul.mubr.bf16.gmra.mrb[88].mxu1 %v14822_v52  ;;  %v12875_v52 = vld [vmem:[%s16711_s5 + $0xb0] sm:$0xff]  }
 0x466   :  { %8401 = vmatpush1.bf16.msra.mxu1 %v12870_v49 }
 0x467   :  { %8274 = vmatpush1.bf16.msra.mxu0 %v12871_v1  ;;  %8402 = vmatprep.subr.bf16.mxu1 %v16214_v12 }
 0x468   :  { %8275 = vmatprep.subr.bf16.mxu0 %v16214_v12 }
 0x46a   :  { %8403 = vmatpush1.bf16.msra.mxu1 %v12872_v35  ;;  %v16339_v35 = vrot.slane %v8063_v20, %v1205_v2 }
 0x46b   :  { %8276 = vmatpush1.bf16.msra.mxu0 %v12873_v43  ;;  %8404 = vmatprep.subr.bf16.mxu1 %v16214_v12 }
 0x46c   :  { %8277 = vmatprep.subr.bf16.mxu0 %v16214_v12 }
 0x46e   :  { %8405 = vmatpush1.bf16.msra.mxu1 %v12874_v21 }
 0x46f   :  { %8278 = vmatpush1.bf16.msra.mxu0 %v12875_v52  ;;  %8406 = vmatprep.subr.bf16.mxu1 %v16214_v12 }
 0x470   :  { %8279 = vmatprep.subr.bf16.mxu0 %v16214_v12 }
 0x472   :  { %8407 = vmatpush1.bf16.msra.mxu1 %v12876_v14  ;;  %v16346_v14 = vrot.slane %v8063_v20, %v1209_v50 }
 0x473   :  { %8280 = vmatpush1.bf16.msra.mxu0 %v12877_v29  ;;  %8408 = vmatprep.subr.bf16.mxu1 %v16214_v12 }
 0x474   :  { %8281 = vmatprep.subr.bf16.mxu0 %v16214_v12 }
 0x476   :  { %8409 = vmatpush1.bf16.msra.mxu1 %v12878_v37 }
 0x477   :  { %8410 = vmatprep.subr.bf16.mxu1 %v16214_v12  ;;  %8282 = vmatpush1.bf16.msra.mxu0 %v12879_v23 }
 0x478   :  { %8283 = vmatprep.subr.bf16.mxu0 %v16214_v12 }
 0x47a   :  { %8411 = vmatpush1.bf16.msra.mxu1 %v12880_v19 }
 0x47b   :  { %8412 = vmatprep.subr.bf16.mxu1 %v16214_v12  ;;  %8284 = vmatpush1.bf16.msra.mxu0 %v12881_v7 }
 0x47c   :  { %8285 = vmatprep.subr.bf16.mxu0 %v16214_v12 }
 0x47e   :  { %8413 = vmatpush1.bf16.msra.mxu1 %v12882_v24 }
 0x47f   :  { %8414 = vmatprep.subr.bf16.mxu1 %v16214_v12  ;;  %8286 = vmatpush1.bf16.msra.mxu0 %v12883_v60 }
 0x480   :  { %8287 = vmatprep.subr.bf16.mxu0 %v16214_v12 }
 0x482   :  { %8415 = vmatpush1.bf16.msra.mxu1 %v12884_v13 }
 0x483   :  { %8706 = vmatprep.subr.bf16.mxu1 %v16214_v12  ;;  %8288 = vmatpush1.bf16.msra.mxu0 %v12885_v4 }
 0x484   :  { %8544 = vmatprep.subr.bf16.mxu0 %v16214_v12 }
 0x51f   :  { %v6419_v42 = vpop.f32.mrb[68].mxu0 }
 0x520   :  { %v6456_v49 = vmax.f32 %v4863_v18, %v6419_v42  ;;  %v8012_v1 = vpop.f32.mrb[76].mxu1  ;;  %v6421_v43 = vpop.f32.mrb[69].mxu0 }
 0x521   :  { %v6457_v21 = vmax.f32 %v4864_v30, %v6421_v43  ;;  %v8014_v52 = vpop.f32.mrb[77].mxu1  ;;  %v6423_v29 = vpop.f32.mrb[70].mxu0 }
 0x522   :  { %v8049_v37 = vmax.f32 %v6456_v49, %v8012_v1  ;;  %v6458_v8 = vmax.f32 %v4865_v32, %v6423_v29  ;;  %v8016_v59 = vpop.f32.mrb[78].mxu1  ;;  %v6425_v18 = vpop.f32.mrb[71].mxu0 }
 0x523   :  { %v8050_v2 = vmax.f32 %v6457_v21, %v8014_v52  ;;  %v6459_v23 = vmax.f32 %v4866_v63, %v6425_v18  ;;  %v8018_v33 = vpop.f32.mrb[79].mxu1 }
 0x524   :  { %v8075_v61 = vadd.f32 %v16339_v35, %v8049_v37  ;;  %v8051_v30 = vmax.f32 %v6458_v8, %v8016_v59  ;;  %v12888_v8 = vld [vmem:[%s16711_s5 + $0x158] sm:$0xff]  }
 0x525   :  { %v8076_v28 = vadd.f32 %v16346_v14, %v8050_v2  ;;  %v8052_v50 = vmax.f32 %v6459_v23, %v8018_v33 }
 0x526   :  { %v8077_v19 = vadd.f32 %v16339_v35, %v8051_v30  ;;  %v8089_v6 = vmax.f32 %v8075_v61, 0.0 }
 0x527   :  { %v8078_v7 = vadd.f32 %v16346_v14, %v8052_v50  ;;  %v6429_v41 = vpop.f32.mrb[72].mxu0  ;;  %v8090_v63 = vmax.f32 %v8076_v28, 0.0 }
 0x528   :  { %v8091_v32 = vmax.f32 %v8077_v19, 0.0  ;;  %v6460_v24 = vmax.f32 %v4867_v27, %v6429_v41  ;;  %v8022_v3 = vpop.f32.mrb[80].mxu1  ;;  %v6431_v10 = vpop.f32.mrb[73].mxu0 }
 0x529   :  { %v8092_v60 = vmax.f32 %v8078_v7, 0.0  ;;  %v6461_v13 = vmax.f32 %v4868_v57, %v6431_v10  ;;  %v8024_v4 = vpop.f32.mrb[81].mxu1  ;;  %v6433_v20 = vpop.f32.mrb[74].mxu0  ;;  %v12889_v7 = vld [vmem:[%s16711_s5 + $0xe8] sm:$0xff]  }
 0x52a   :  { %v8103_v42 = vpack.c.bf16 %v8091_v32, %v8089_v6  ;;  %v8053_v49 = vmax.f32 %v6460_v24, %v8022_v3  ;;  %v6462_v1 = vmax.f32 %v4869_v39, %v6433_v20  ;;  %v8026_v43 = vpop.f32.mrb[82].mxu1  ;;  %v6435_v21 = vpop.f32.mrb[75].mxu0  ;;  %v12887_v39 = vld [vmem:[%s16711_s5 + $0xe0] sm:$0xff]  }
 0x52b   :  { %v8104_v55 = vpack.c.bf16 %v8092_v60, %v8090_v63  ;;  %v8054_v56 = vmax.f32 %v6461_v13, %v8024_v4  ;;  %v6463_v27 = vmax.f32 %v4870_v62, %v6435_v21  ;;  %v8028_v52 = vpop.f32.mrb[83].mxu1  ;;  %v12890_v24 = vld [vmem:[%s16711_s5 + $0x160] sm:$0xff]   ;;  %v12892_v60 = vld [vmem:[%s16711_s5 + $0x168] sm:$0xff]  }
 0x52c   :  { %v8079_v47 = vadd.f32 %v16339_v35, %v8053_v49  ;;  %v8055_v57 = vmax.f32 %v6462_v1, %v8026_v43  ;;  %v8170_v26 = vrot.slane %v8103_v42, 4 }
 0x52d   :  { %v8171_v29 = vrot.slane %v8104_v55, 4  ;;  %v8080_v38 = vadd.f32 %v16346_v14, %v8054_v56  ;;  %v8056_v51 = vmax.f32 %v6463_v27, %v8028_v52  ;;  %10909 = vmatprep.mubr.msk.bf16.mxu1 %vm8257_vm4, %v8104_v55  ;;  %v12893_v27 = vld [vmem:[%s16711_s5 + $0xf8] sm:$0xff]  }
 0x52e   :  { %v8081_v40 = vadd.f32 %v16339_v35, %v8055_v57  ;;  %8421 = vmatmul.mubr.bf16.vlgmr.msra.gmra.mrb[92].mxu1 %v8103_v42  ;;  %v8093_v59 = vmax.f32 %v8079_v47, 0.0 }
 0x52f   :  { %v8082_v62 = vadd.f32 %v16346_v14, %v8056_v51  ;;  %8707 = vmatpush1.bf16.msra.mxu1 %v12886_v0  ;;  %v6439_v37 = vpop.f32.mrb[76].mxu0  ;;  %10894 = vmatprep.mubr.msk.bf16.mxu0 %vm8257_vm4, %v8171_v29  ;;  %v8094_v61 = vmax.f32 %v8080_v38, 0.0  ;;  %v12895_v29 = vld [vmem:[%s16711_s5 + $0x100] sm:$0xff]   ;;  %v12896_v38 = vld [vmem:[%s16711_s5 + $0x178] sm:$0xff]   ;;  %v12899_v51 = vld [vmem:[%s16711_s5 + $0x110] sm:$0xff]  }
 0x530   :  { %v8095_v18 = vmax.f32 %v8081_v40, 0.0  ;;  %v6464_v2 = vmax.f32 %v4871_v5, %v6439_v37  ;;  %v8032_v23 = vpop.f32.mrb[84].mxu1  ;;  %v6441_v33 = vpop.f32.mrb[77].mxu0  ;;  %8294 = vmatmul.mubr.bf16.vlgmr.msra.gmra.mrb[84].mxu0 %v8170_v26  ;;  %8708 = vmatprep.subr.bf16.mxu1 %v16214_v12  ;;  %v12901_v26 = vld [vmem:[%s16711_s5 + $0x118] sm:$0xff]   ;;  %v12902_v40 = vld [vmem:[%s16711_s5 + $0x190] sm:$0xff]  }
 0x531   :  { %v8096_v30 = vmax.f32 %v8082_v62, 0.0  ;;  %v6465_v28 = vmax.f32 %v4872_v11, %v6441_v33  ;;  %v8034_v50 = vpop.f32.mrb[85].mxu1  ;;  %8545 = vmatpush1.bf16.msra.mxu0 %v12887_v39  ;;  %v6443_v19 = vpop.f32.mrb[78].mxu0  ;;  %v12900_v39 = vld [vmem:[%s16711_s5 + $0x188] sm:$0xff]   ;;  %v12903_v62 = vld [vmem:[%s16711_s5 + $0x120] sm:$0xff]   ;;  %v12904_v37 = vld [vmem:[%s16711_s5 + $0x198] sm:$0xff]  }
 0x532   :  { %v16395_v46 = vpack.c.bf16 %v8095_v18, %v8093_v59  ;;  %v8057_v48 = vmax.f32 %v6464_v2, %v8032_v23  ;;  %v6466_v5 = vmax.f32 %v4873_v17, %v6443_v19  ;;  %v8036_v41 = vpop.f32.mrb[86].mxu1  ;;  %v6445_v6 = vpop.f32.mrb[79].mxu0  ;;  %8546 = vmatprep.subr.bf16.mxu0 %v16214_v12  ;;  %v12906_v59 = vld [vmem:[%s16711_s5 + $0x1a0] sm:$0xff]   ;;  %v12907_v18 = vld [vmem:[%s16711_s5 + $0x130] sm:$0xff]   ;;  %v12908_v2 = vld [vmem:[%s16711_s5 + $0x1a8] sm:$0xff]  }
 0x533   :  { %v8106_v53 = vpack.c.bf16 %v8096_v30, %v8094_v61  ;;  %v8058_v9 = vmax.f32 %v6465_v28, %v8034_v50  ;;  %v6467_v11 = vmax.f32 %v4874_v31, %v6445_v6  ;;  %v8038_v32 = vpop.f32.mrb[87].mxu1  ;;  %8709 = vmatpush1.bf16.msra.mxu1 %v12888_v8  ;;  %v12905_v8 = vld [vmem:[%s16711_s5 + $0x128] sm:$0xff]   ;;  %v12909_v23 = vld [vmem:[%s16711_s5 + $0x138] sm:$0xff]   ;;  %v12910_v33 = vld [vmem:[%s16711_s5 + $0x1b0] sm:$0xff]  }
 0x534   :  { %v8083_v3 = vadd.f32 %v16339_v35, %v8057_v48  ;;  %v8059_v44 = vmax.f32 %v6466_v5, %v8036_v41  ;;  %8710 = vmatprep.subr.bf16.mxu1 %v16214_v12  ;;  %v12911_v61 = vld [vmem:[%s16711_s5 + $0x140] sm:$0xff]   ;;  %v12912_v30 = vld [vmem:[%s16711_s5 + $0x1b8] sm:$0xff]   ;;  %v12913_v28 = vld [vmem:[%s16711_s5 + $0x148] sm:$0xff]   ;;  %v8616_v19 = vrot.slane %v16395_v46, 4 }
 0x535   :  { %v8617_v58 = vrot.slane %v8106_v53, 4  ;;  %v8084_v17 = vadd.f32 %v16346_v14, %v8058_v9  ;;  %v8060_v10 = vmax.f32 %v6467_v11, %v8038_v32  ;;  %8547 = vmatpush1.bf16.msra.mxu0 %v12889_v7  ;;  %10952 = vmatprep.mubr.msk.bf16.mxu0 %vm8257_vm4, %v8106_v53  ;;  %v12914_v50 = vld [vmem:[%s16711_s5 + $0x230] sm:$0xff]   ;;  %v12915_v48 = vld [vmem:[%s16711_s5 + $0x1c0] sm:$0xff]   ;;  %v12916_v5 = vld [vmem:[%s16711_s5 + $0x238] sm:$0xff]  }
 0x536   :  { %v8085_v15 = vadd.f32 %v16339_v35, %v8059_v44  ;;  %8548 = vmatprep.subr.bf16.mxu0 %v16214_v12  ;;  %v8097_v13 = vmax.f32 %v8083_v3, 0.0  ;;  %v12917_v41 = vld [vmem:[%s16711_s5 + $0x1c8] sm:$0xff]   ;;  %v12918_v6 = vld [vmem:[%s16711_s5 + $0x240] sm:$0xff]   ;;  %v12921_v9 = vld [vmem:[%s16711_s5 + $0x1d8] sm:$0xff]  }
 0x537   :  { %v8086_v31 = vadd.f32 %v16346_v14, %v8060_v10  ;;  %8711 = vmatpush1.bf16.msra.mxu1 %v12890_v24  ;;  %v6449_v63 = vpop.f32.mrb[80].mxu0  ;;  %10995 = vmatprep.mubr.msk.bf16.mxu1 %vm8257_vm4, %v8617_v58  ;;  %v8098_v1 = vmax.f32 %v8084_v17, 0.0  ;;  %v12920_v53 = vld [vmem:[%s16711_s5 + $0x248] sm:$0xff]   ;;  %v12922_v11 = vld [vmem:[%s16711_s5 + $0x250] sm:$0xff]   ;;  %v12923_v32 = vld [vmem:[%s16711_s5 + $0x1e0] sm:$0xff]  }
 0x538   :  { %v8099_v4 = vmax.f32 %v8085_v15, 0.0  ;;  %v6468_v20 = vmax.f32 %v4875_v45, %v6449_v63  ;;  %v8042_v42 = vpop.f32.mrb[88].mxu1  ;;  %v6451_v49 = vpop.f32.mrb[81].mxu0  ;;  %8712 = vmatprep.subr.bf16.mxu1 %v16214_v12  ;;  %v12924_v24 = vld [vmem:[%s16711_s5 + $0x258] sm:$0xff]   ;;  %v12925_v3 = vld [vmem:[%s16711_s5 + $0x1e8] sm:$0xff]   ;;  %v12926_v44 = vld [vmem:[%s16711_s5 + $0x260] sm:$0xff]  }
 0x539   :  { %v8100_v43 = vmax.f32 %v8086_v31, 0.0  ;;  %v6469_v21 = vmax.f32 %v4876_v36, %v6451_v49  ;;  %v8044_v55 = vpop.f32.mrb[89].mxu1  ;;  %8549 = vmatpush1.bf16.msra.mxu0 %v12891_v16  ;;  %v6453_v56 = vpop.f32.mrb[82].mxu0  ;;  %v12927_v58 = vld [vmem:[%s16711_s5 + $0x1f0] sm:$0xff]   ;;  %v12928_v17 = vld [vmem:[%s16711_s5 + $0x268] sm:$0xff]   ;;  %v12929_v10 = vld [vmem:[%s16711_s5 + $0x1f8] sm:$0xff]  }
 0x53a   :  { %v16431_v52 = vpack.c.bf16 %v8099_v4, %v8097_v13  ;;  %v8061_v22 = vmax.f32 %v6468_v20, %v8042_v42  ;;  %v8046_v34 = vpop.f32.mrb[90].mxu1  ;;  %v6454_v45 = vpop.f32.mrb[83].mxu0  ;;  %8550 = vmatprep.subr.bf16.mxu0 %v16214_v12  ;;  %v12930_v16 = vld [vmem:[%s16711_s5 + $0x270] sm:$0xff]   ;;  %v12931_v15 = vld [vmem:[%s16711_s5 + $0x200] sm:$0xff]   ;;  %v12932_v31 = vld [vmem:[%s16711_s5 + $0x278] sm:$0xff]  }
 0x53b   :  { %v16434_v0 = vpack.c.bf16 %v8100_v43, %v8098_v1  ;;  %v8062_v47 = vmax.f32 %v6469_v21, %v8044_v55  ;;  %v8047_v57 = vpop.f32.mrb[91].mxu1  ;;  %8713 = vmatpush1.bf16.msra.mxu1 %v12892_v60  ;;  %v12933_v63 = vld [vmem:[%s16711_s5 + $0x208] sm:$0xff]   ;;  %v12934_v60 = vld [vmem:[%s16711_s5 + $0x280] sm:$0xff]   ;;  %v12935_v13 = vld [vmem:[%s16711_s5 + $0x210] sm:$0xff]  }
 0x53c   :  { %v16440_v25 = vadd.f32 %v16339_v35, %v8061_v22  ;;  %8714 = vmatprep.subr.bf16.mxu1 %v16214_v12  ;;  %v12897_v35 = vld [vmem:[%s16711_s5 + $0x108] sm:$0xff]   ;;  %v12937_v20 = vld [vmem:[%s16711_s5 + $0x218] sm:$0xff]   ;;  %v12938_v42 = vld [vmem:[%s16711_s5 + $0x290] sm:$0xff]   ;;  %v8935_v55 = vrot.slane %v16431_v52, 4 }
 0x53d   :  { %v16444_v36 = vadd.f32 %v16346_v14, %v8062_v47  ;;  %8551 = vmatpush1.bf16.msra.mxu0 %v12893_v27  ;;  %v12898_v14 = vld [vmem:[%s16711_s5 + $0x180] sm:$0xff]   ;;  %v8936_v7 = vrot.slane %v16434_v0, 4  ;;  %v12936_v4 = vld [vmem:[%s16711_s5 + $0x288] sm:$0xff]   ;;  %v12940_v1 = vld [vmem:[%s16711_s5 + $0x298] sm:$0xff]  }
 0x53e   :  { %8552 = vmatprep.subr.bf16.mxu0 %v16214_v12  ;;  %v12939_v49 = vld [vmem:[%s16711_s5 + $0x220] sm:$0xff]   ;;  %v12941_v43 = vld [vmem:[%s16711_s5 + $0x228] sm:$0xff]   ;;  %v12944_v34 = vld [vmem:[%s16711_s5 + $0x2b0] sm:$0xff]  }
 0x53f   :  { %8715 = vmatpush1.bf16.msra.mxu1 %v12894_v54  ;;  %v8102_v21 = vmax.f32 %v16444_v36, 0.0  ;;  %v12942_v56 = vld [vmem:[%s16711_s5 + $0x2a0] sm:$0xff]   ;;  %v12943_v22 = vld [vmem:[%s16711_s5 + $0x2a8] sm:$0xff]   ;;  %v12948_v47 = vld [vmem:[%s16711_s5 + $0x2d0] sm:$0xff]  }
 0x540   :  { %8716 = vmatprep.subr.bf16.mxu1 %v16214_v12  ;;  %v12946_v45 = vld [vmem:[%s16711_s5 + $0x2c0] sm:$0xff]   ;;  %v12949_v57 = vld [vmem:[%s16711_s5 + $0x2d8] sm:$0xff]   ;;  %v12951_v36 = vld [vmem:[%s16711_s5 + $0x2e8] sm:$0xff]  }
 0x541   :  { %8553 = vmatpush1.bf16.msra.mxu0 %v12895_v29  ;;  %v8110_v27 = vpack.c.bf16 %v8102_v21, %v8102_v21  ;;  %v12950_v54 = vld [vmem:[%s16711_s5 + $0x2e0] sm:$0xff]   ;;  %v12952_v29 = vld [vmem:[%s16711_s5 + $0x2f0] sm:$0xff]  }
 0x542   :  { %8554 = vmatprep.subr.bf16.mxu0 %v16214_v12 }
 0x543   :  { %8717 = vmatpush1.bf16.msra.mxu1 %v12896_v38  ;;  %v12953_v38 = vld [vmem:[%s16711_s5 + $0x2f8] sm:$0xff]  }
 0x544   :  { %8718 = vmatprep.subr.bf16.mxu1 %v16214_v12 }
 0x545   :  { %8555 = vmatpush1.bf16.msra.mxu0 %v12897_v35  ;;  %v12954_v35 = vld [vmem:[%s16711_s5 + $0x300] sm:$0xff]  }
 0x546   :  { %8556 = vmatprep.subr.bf16.mxu0 %v16214_v12 }
 0x547   :  { %8719 = vmatpush1.bf16.msra.mxu1 %v12898_v14  ;;  %v12955_v14 = vld [vmem:[%s16711_s5 + $0x308] sm:$0xff]  }
 0x548   :  { %8720 = vmatprep.subr.bf16.mxu1 %v16214_v12 }
 0x549   :  { %8557 = vmatpush1.bf16.msra.mxu0 %v12899_v51  ;;  %v8101_v51 = vmax.f32 %v16440_v25, 0.0 }
 0x54a   :  { %8558 = vmatprep.subr.bf16.mxu0 %v16214_v12 }
 0x54b   :  { %8721 = vmatpush1.bf16.msra.mxu1 %v12900_v39  ;;  %v8109_v39 = vpack.c.bf16 %v8101_v51, %v8101_v51 }
 0x54c   :  { %8722 = vmatprep.subr.bf16.mxu1 %v16214_v12 }
 0x54d   :  { %8559 = vmatpush1.bf16.msra.mxu0 %v12901_v26 }
 0x54e   :  { %8560 = vmatprep.subr.bf16.mxu0 %v16214_v12 }
 0x54f   :  { %8723 = vmatpush1.bf16.msra.mxu1 %v12902_v40 }
 0x550   :  { %8724 = vmatprep.subr.bf16.mxu1 %v16214_v12 }
 0x551   :  { %8561 = vmatpush1.bf16.msra.mxu0 %v12903_v62 }
 0x552   :  { %8562 = vmatprep.subr.bf16.mxu0 %v16214_v12 }
 0x553   :  { %8725 = vmatpush1.bf16.msra.mxu1 %v12904_v37 }
 0x554   :  { %8726 = vmatprep.subr.bf16.mxu1 %v16214_v12 }
 0x555   :  { %8563 = vmatpush1.bf16.msra.mxu0 %v12905_v8 }
 0x556   :  { %8564 = vmatprep.subr.bf16.mxu0 %v16214_v12 }
 0x557   :  { %8727 = vmatpush1.bf16.msra.mxu1 %v12906_v59 }
 0x558   :  { %8728 = vmatprep.subr.bf16.mxu1 %v16214_v12 }
 0x559   :  { %8565 = vmatpush1.bf16.msra.mxu0 %v12907_v18 }
 0x55a   :  { %8566 = vmatprep.subr.bf16.mxu0 %v16214_v12 }
 0x55b   :  { %8729 = vmatpush1.bf16.msra.mxu1 %v12908_v2 }
 0x55c   :  { %8730 = vmatprep.subr.bf16.mxu1 %v16214_v12 }
 0x55d   :  { %8567 = vmatpush1.bf16.msra.mxu0 %v12909_v23 }
 0x55e   :  { %8568 = vmatprep.subr.bf16.mxu0 %v16214_v12 }
 0x55f   :  { %8731 = vmatpush1.bf16.msra.mxu1 %v12910_v33 }
 0x560   :  { %8732 = vmatprep.subr.bf16.mxu1 %v16214_v12 }
 0x561   :  { %8569 = vmatpush1.bf16.msra.mxu0 %v12911_v61 }
 0x562   :  { %8570 = vmatprep.subr.bf16.mxu0 %v16214_v12 }
 0x563   :  { %8733 = vmatpush1.bf16.msra.mxu1 %v12912_v30 }
 0x564   :  { %9025 = vmatprep.subr.bf16.mxu1 %v16214_v12 }
 0x565   :  { %8571 = vmatpush1.bf16.msra.mxu0 %v12913_v28 }
 0x566   :  { %8739 = vmatmul.mubr.bf16.vlgmr.msra.gmra.mrb[96].mxu1 %v8616_v19  ;;  %8863 = vmatprep.subr.bf16.mxu0 %v16214_v12 }
 0x567   :  { %9026 = vmatpush1.bf16.msra.mxu1 %v12914_v50  ;;  %11081 = vmatprep.mubr.msk.bf16.mxu1 %vm8257_vm4, %v8936_v7 }
 0x568   :  { %8577 = vmatmul.mubr.bf16.vlgmr.msra.gmra.mrb[88].mxu0 %v16395_v46  ;;  %9027 = vmatprep.subr.bf16.mxu1 %v16214_v12  ;;  %v12919_v46 = vld [vmem:[%s16711_s5 + $0x1d0] sm:$0xff]  }
 0x569   :  { %8864 = vmatpush1.bf16.msra.mxu0 %v12915_v48  ;;  %11038 = vmatprep.mubr.msk.bf16.mxu0 %vm8257_vm4, %v16434_v0  ;;  %v12947_v0 = vld [vmem:[%s16711_s5 + $0x2c8] sm:$0xff]  }
 0x56a   :  { %8865 = vmatprep.subr.bf16.mxu0 %v16214_v12 }
 0x56b   :  { %9028 = vmatpush1.bf16.msra.mxu1 %v12916_v5 }
 0x56c   :  { %9029 = vmatprep.subr.bf16.mxu1 %v16214_v12 }
 0x56d   :  { %8866 = vmatpush1.bf16.msra.mxu0 %v12917_v41 }
 0x56e   :  { %8867 = vmatprep.subr.bf16.mxu0 %v16214_v12 }
 0x56f   :  { %9030 = vmatpush1.bf16.msra.mxu1 %v12918_v6 }
 0x570   :  { %9031 = vmatprep.subr.bf16.mxu1 %v16214_v12 }
 0x571   :  { %8868 = vmatpush1.bf16.msra.mxu0 %v12919_v46 }
 0x572   :  { %8869 = vmatprep.subr.bf16.mxu0 %v16214_v12 }
 0x573   :  { %9032 = vmatpush1.bf16.msra.mxu1 %v12920_v53 }
 0x574   :  { %9033 = vmatprep.subr.bf16.mxu1 %v16214_v12 }
 0x575   :  { %8870 = vmatpush1.bf16.msra.mxu0 %v12921_v9 }
 0x576   :  { %8871 = vmatprep.subr.bf16.mxu0 %v16214_v12 }
 0x577   :  { %9034 = vmatpush1.bf16.msra.mxu1 %v12922_v11 }
 0x578   :  { %9035 = vmatprep.subr.bf16.mxu1 %v16214_v12 }
 0x579   :  { %8872 = vmatpush1.bf16.msra.mxu0 %v12923_v32 }
 0x57a   :  { %8873 = vmatprep.subr.bf16.mxu0 %v16214_v12 }
 0x57b   :  { %9036 = vmatpush1.bf16.msra.mxu1 %v12924_v24 }
 0x57c   :  { %9037 = vmatprep.subr.bf16.mxu1 %v16214_v12 }
 0x57d   :  { %8874 = vmatpush1.bf16.msra.mxu0 %v12925_v3 }
 0x57e   :  { %8875 = vmatprep.subr.bf16.mxu0 %v16214_v12 }
 0x57f   :  { %9038 = vmatpush1.bf16.msra.mxu1 %v12926_v44 }
 0x580   :  { %9039 = vmatprep.subr.bf16.mxu1 %v16214_v12 }
 0x581   :  { %8876 = vmatpush1.bf16.msra.mxu0 %v12927_v58  ;;  %v11125_v58 = vld [vmem:[%s16713_s6] ss:$0 sm:$0xff] }
 0x582   :  { %8877 = vmatprep.subr.bf16.mxu0 %v16214_v12 }
 0x583   :  { %9040 = vmatpush1.bf16.msra.mxu1 %v12928_v17 }
 0x584   :  { %9041 = vmatprep.subr.bf16.mxu1 %v16214_v12 }
 0x585   :  { %8878 = vmatpush1.bf16.msra.mxu0 %v12929_v10 }
 0x586   :  { %8879 = vmatprep.subr.bf16.mxu0 %v16214_v12 }
 0x587   :  { %9042 = vmatpush1.bf16.msra.mxu1 %v12930_v16 }
 0x588   :  { %9043 = vmatprep.subr.bf16.mxu1 %v16214_v12 }
 0x589   :  { %8880 = vmatpush1.bf16.msra.mxu0 %v12931_v15 }
 0x58a   :  { %8881 = vmatprep.subr.bf16.mxu0 %v16214_v12 }
 0x58b   :  { %9044 = vmatpush1.bf16.msra.mxu1 %v12932_v31 }
 0x58c   :  { %9045 = vmatprep.subr.bf16.mxu1 %v16214_v12 }
 0x58d   :  { %8882 = vmatpush1.bf16.msra.mxu0 %v12933_v63 }
 0x58e   :  { %8883 = vmatprep.subr.bf16.mxu0 %v16214_v12 }
 0x58f   :  { %9046 = vmatpush1.bf16.msra.mxu1 %v12934_v60 }
 0x590   :  { %9047 = vmatprep.subr.bf16.mxu1 %v16214_v12 }
 0x591   :  { %8884 = vmatpush1.bf16.msra.mxu0 %v12935_v13 }
 0x592   :  { %8885 = vmatprep.subr.bf16.mxu0 %v16214_v12 }
 0x593   :  { %9048 = vmatpush1.bf16.msra.mxu1 %v12936_v4 }
 0x594   :  { %9049 = vmatprep.subr.bf16.mxu1 %v16214_v12 }
 0x595   :  { %8886 = vmatpush1.bf16.msra.mxu0 %v12937_v20 }
 0x596   :  { %8887 = vmatprep.subr.bf16.mxu0 %v16214_v12 }
 0x597   :  { %9050 = vmatpush1.bf16.msra.mxu1 %v12938_v42 }
 0x598   :  { %9051 = vmatprep.subr.bf16.mxu1 %v16214_v12 }
 0x599   :  { %8888 = vmatpush1.bf16.msra.mxu0 %v12939_v49 }
 0x59a   :  { %8889 = vmatprep.subr.bf16.mxu0 %v16214_v12 }
 0x59b   :  { %9052 = vmatpush1.bf16.msra.mxu1 %v12940_v1 }
 0x59d   :  { %8890 = vmatpush1.bf16.msra.mxu0 %v12941_v43 }
 0x59e   :  { %9058 = vmatmul.mubr.bf16.vlgmr.msra.gmra.mrb[100].mxu1 %v8935_v55  ;;  %9182 = vmatprep.subr.bf16.mxu0 %v16214_v12 }
 0x5a0   :  { %8896 = vmatmul.mubr.bf16.vlgmr.msra.gmra.mrb[92].mxu0 %v16431_v52  ;;  %v12945_v52 = vld [vmem:[%s16711_s5 + $0x2b8] sm:$0xff]  }
 0x5a1   :  { %9183 = vmatpush1.bf16.msra.mxu0 %v12942_v56  ;;  %11124 = vmatprep.mubr.msk.bf16.mxu0 %vm8257_vm4, %v8110_v27 }
 0x5a2   :  { %9184 = vmatprep.subr.bf16.mxu0 %v16214_v12 }
 0x5a5   :  { %9185 = vmatpush1.bf16.msra.mxu0 %v12943_v22 }
 0x5a6   :  { %9186 = vmatprep.subr.bf16.mxu0 %v16214_v12 }
 0x5a9   :  { %9187 = vmatpush1.bf16.msra.mxu0 %v12944_v34 }
 0x5aa   :  { %9188 = vmatprep.subr.bf16.mxu0 %v16214_v12 }
 0x5ad   :  { %9189 = vmatpush1.bf16.msra.mxu0 %v12945_v52 }
 0x5ae   :  { %9190 = vmatprep.subr.bf16.mxu0 %v16214_v12 }
 0x5b1   :  { %9191 = vmatpush1.bf16.msra.mxu0 %v12946_v45 }
 0x5b2   :  { %9192 = vmatprep.subr.bf16.mxu0 %v16214_v12 }
 0x5b5   :  { %9193 = vmatpush1.bf16.msra.mxu0 %v12947_v0 }
 0x5b6   :  { %9194 = vmatprep.subr.bf16.mxu0 %v16214_v12 }
 0x5b9   :  { %9195 = vmatpush1.bf16.msra.mxu0 %v12948_v47 }
 0x5ba   :  { %9196 = vmatprep.subr.bf16.mxu0 %v16214_v12 }
 0x5bd   :  { %9197 = vmatpush1.bf16.msra.mxu0 %v12949_v57 }
 0x5be   :  { %9198 = vmatprep.subr.bf16.mxu0 %v16214_v12 }
 0x5c1   :  { %9199 = vmatpush1.bf16.msra.mxu0 %v12950_v54 }
 0x5c2   :  { %9200 = vmatprep.subr.bf16.mxu0 %v16214_v12 }
 0x5c5   :  { %9201 = vmatpush1.bf16.msra.mxu0 %v12951_v36 }
 0x5c6   :  { %9202 = vmatprep.subr.bf16.mxu0 %v16214_v12 }
 0x5c9   :  { %9203 = vmatpush1.bf16.msra.mxu0 %v12952_v29 }
 0x5ca   :  { %9204 = vmatprep.subr.bf16.mxu0 %v16214_v12 }
 0x5cd   :  { %9205 = vmatpush1.bf16.msra.mxu0 %v12953_v38 }
 0x5ce   :  { %9206 = vmatprep.subr.bf16.mxu0 %v16214_v12 }
 0x5d1   :  { %9207 = vmatpush1.bf16.msra.mxu0 %v12954_v35 }
 0x5d2   :  { %9208 = vmatprep.subr.bf16.mxu0 %v16214_v12 }
 0x5d5   :  { %9209 = vmatpush1.bf16.msra.mxu0 %v12955_v14 }
 0x5d8   :  { %9215 = vmatmul.mubr.bf16.vlgmr.msra.gmra.mrb[96].mxu0 %v8109_v39 }
 0x601   :  { %v8422_v26 = vpop.f32.mrb[92].mxu1 }
 0x602   :  { %v8424_v40 = vpop.f32.mrb[93].mxu1 }
 0x603   :  { %v8295_v62 = vpop.f32.mrb[84].mxu0  ;;  %v8425_v37 = vpop.f32.mrb[94].mxu1 }
 0x604   :  { %v8423_v8 = vadd.f32 %v8422_v26, %v8295_v62  ;;  %v8297_v59 = vpop.f32.mrb[85].mxu0  ;;  %v8426_v18 = vpop.f32.mrb[95].mxu1 }
 0x605   :  { %v8298_v2 = vpop.f32.mrb[86].mxu0 }
 0x606   :  { %v8299_v23 = vpop.f32.mrb[87].mxu0 }
 0x639   :  { %v8740_v33 = vpop.f32.mrb[96].mxu1 }
 0x63a   :  { %v8742_v61 = vpop.f32.mrb[97].mxu1 }
 0x63b   :  { %v8578_v30 = vpop.f32.mrb[88].mxu0  ;;  %v8743_v28 = vpop.f32.mrb[98].mxu1 }
 0x63c   :  { %v8584_v50 = vadd.f32 %v8578_v30, %v8423_v8  ;;  %v8580_v25 = vpop.f32.mrb[89].mxu0  ;;  %v8744_v19 = vpop.f32.mrb[99].mxu1 }
 0x63d   :  { %v8581_v12 = vpop.f32.mrb[90].mxu0 }
 0x63e   :  { %v8582_v7 = vpop.f32.mrb[91].mxu0  ;;  %v8746_v48 = vadd.f32 %v8740_v33, %v8584_v50 }
 0x671   :  { %v9059_v5 = vpop.f32.mrb[100].mxu1 }
 0x672   :  { %v9061_v41 = vpop.f32.mrb[101].mxu1 }
 0x673   :  { %v8897_v6 = vpop.f32.mrb[92].mxu0  ;;  %v9062_v46 = vpop.f32.mrb[102].mxu1 }
 0x674   :  { %v8903_v53 = vadd.f32 %v8897_v6, %v8746_v48  ;;  %v8899_v9 = vpop.f32.mrb[93].mxu0  ;;  %v9063_v11 = vpop.f32.mrb[103].mxu1 }
 0x675   :  { %v8900_v32 = vpop.f32.mrb[94].mxu0 }
 0x676   :  { %v8901_v24 = vpop.f32.mrb[95].mxu0  ;;  %v9065_v3 = vadd.f32 %v9059_v5, %v8903_v53 }
 0x6ab   :  { %v9216_v44 = vpop.f32.mrb[96].mxu0 }
 0x6ac   :  { %v9222_v17 = vadd.f32 %v9216_v44, %v9065_v3  ;;  %v9218_v10 = vpop.f32.mrb[97].mxu0 }
 0x6ad   :  { %v9219_v16 = vpop.f32.mrb[98].mxu0 }
 0x6ae   :  { %v9230_v15 = vadd.f32 %v11125_v58, %v9222_v17  ;;  %v9220_v31 = vpop.f32.mrb[99].mxu0 }
 0x6b0   :  { %9231 = vst [vmem:[%s16714_s7] sm:$0xff] %v9230_v15 }

</bundles_post_ra>
